<compile_context>
chip_gen: v7x
topology: tpu7x:2x2x1
jax: 0.10.0
libtpu: 0.0.40
codegen_flags: <defaults>
</compile_context>

<pallas_src>
import jax
import jax.numpy as jnp
from jax.experimental import pallas as pl
from jax.experimental.pallas import tpu as pltpu

# --------------------------- configuration ------------------------------------
C_IN = 4                 # irreps_in  = 4x0e
N_SCALARS = 4            # 4x0e scalars  (relu)
N_GATES = 2              # 2x0e gates    (sigmoid)
N_GATED = 2              # 2x1e gated irreps (3 components each)
C_MID = N_SCALARS + N_GATES + 3 * N_GATED      # 12  (conv output / gate input channels)
C_OUT = N_SCALARS + 3 * N_GATED                # 10  (block output channels)
KSIZE = 5
PAD = KSIZE // 2
K3 = KSIZE ** 3                                # 125 taps
K_DIM = K3 * C_IN                              # 500 contraction length
K_PAD = 512                                    # padded to a 128-multiple
CENTER_ROW = ((PAD * KSIZE + PAD) * KSIZE + PAD) * C_IN      # 248: centre-tap rows
TP_WEIGHT_NUMEL = C_IN * N_SCALARS + C_IN * N_GATES + C_IN * N_GATED   # 32
TILE_M = 2048            # voxels per grid step (lane axis)


# --------------------------- e3nn buffer construction (plain JAX glue) --------
def _soft_unit_step(x):
    safe = jnp.where(x > 0.0, x, 1.0)
    return jnp.where(x > 0.0, jnp.exp(-1.0 / safe), 0.0)


def _soft_one_hot_smooth_finite(x, start, end, number):
    # e3nn.math.soft_one_hot_linspace, basis='smooth_finite', cutoff=True
    values = jnp.linspace(start, end, number + 2)
    step = values[1] - values[0]
    values = values[1:-1]
    diff = (x[..., None] - values) / step
    return 1.14136 * jnp.exp(2.0) * _soft_unit_step(diff + 1.0) * _soft_unit_step(1.0 - diff)


def _build_buffers():
    r = jnp.linspace(-1.0, 1.0, KSIZE)
    gx, gy, gz = jnp.meshgrid(r, r, r, indexing="ij")
    lattice = jnp.stack([gx, gy, gz], axis=-1)                    # (k,k,k,3)
    norm = jnp.linalg.norm(lattice, axis=-1)
    emb = _soft_one_hot_smooth_finite(norm, 0.0, 1.0, KSIZE)      # (k,k,k,k)
    # spherical harmonics (normalize=True, 'component' normalization)
    safe = jnp.where(norm > 0.0, norm, 1.0)
    unit = lattice / safe[..., None]
    nx, ny, nz = unit[..., 0], unit[..., 1], unit[..., 2]
    sh0 = jnp.ones_like(norm)                                     # l=0
    sh1 = jnp.sqrt(3.0) * jnp.stack([ny, nz, nx], axis=-1)        # l=1 (e3nn order y,z,x)
    # l=2 harmonics are computed by the torch module but have no output path
    # (irreps_out has no 2e), so tp.right drops them -> omitted here.
    return emb, sh0, sh1


def _build_conv_kernel(emb, sh0, sh1, tp_weight):
    """Equivalent of tp.right(sh, emb @ weight / k**1.5) -> (k,k,k,C_IN,C_MID)."""
    wp = jnp.einsum("xyzk,kw->xyzw", emb, tp_weight) / (KSIZE ** 1.5)
    o1 = C_IN * N_SCALARS
    o2 = o1 + C_IN * N_GATES
    w1 = wp[..., :o1].reshape(KSIZE, KSIZE, KSIZE, C_IN, N_SCALARS)
    w2 = wp[..., o1:o2].reshape(KSIZE, KSIZE, KSIZE, C_IN, N_GATES)
    w3 = wp[..., o2:].reshape(KSIZE, KSIZE, KSIZE, C_IN, N_GATED)
    alpha = 1.0 / jnp.sqrt(float(C_IN))        # e3nn 'element' path normalization, fan_in = 4
    k0a = alpha * sh0[..., None, None] * w1                                   # 0e x 0e -> 4x0e
    k0b = alpha * sh0[..., None, None] * w2                                   # 0e x 0e -> 2x0e
    k1 = alpha * w3[..., None] * sh1[..., None, None, :]                      # 0e x 1e -> 2x1e
    k1 = k1.reshape(KSIZE, KSIZE, KSIZE, C_IN, 3 * N_GATED)
    return jnp.concatenate([k0a, k0b, k1], axis=-1)                           # (k,k,k,C_IN,C_MID)


# NOTE(perf): a further HBM-traffic reduction is possible by expanding the 125 taps
# in-kernel from a VMEM-resident halo slab instead of materialising this (K_DIM x M)
# patch matrix; with only C_IN=4 channels that on-chip expansion is sublane/lane
# inefficient (4/16 bf16 sublanes per copy, unaligned lane shifts through the XLU),
# so the patch-fed fused matmul below is kept and the im2col stays host-side but
# inside the same jit (no extra HBM round trip).
def _im2col_t(x_cf_pad, X, Y, Z):
    """x_cf_pad: (C_IN, N, X+2P, Y+2P, Z+2P) bf16 -> (K3*C_IN, N*X*Y*Z) patch matrix,
    voxel axis last (lane-dense).  Row order (dx,dy,dz,i); column order (n,x,y,z)."""
    taps = [x_cf_pad[:, :, dx:dx + X, dy:dy + Y, dz:dz + Z]
            for dx in range(KSIZE) for dy in range(KSIZE) for dz in range(KSIZE)]
    taps = jnp.stack(taps, axis=0)                   # (K3, C, N, X, Y, Z)
    return taps.reshape(K3 * C_IN, -1)               # (K_DIM, M)


def _prepare(x, params):
    """Prep fused into the same jit as the pallas_call: transposed bf16 im2col,
    self-connection folded into the conv weights, K padded 500->512."""
    N, C, X, Y, Z = x.shape
    assert C == C_IN
    # channel-first + bf16 BEFORE the 125-tap stack: the only transpose/cast happens
    # on the tiny input, and the large patch tensor is born in its final layout/dtype.
    x_cf = jnp.transpose(x, (1, 0, 2, 3, 4)).astype(jnp.bfloat16)      # (C, N, X, Y, Z)
    x_cf = jnp.pad(x_cf, ((0, 0), (0, 0), (PAD, PAD), (PAD, PAD), (PAD, PAD)))
    patches = _im2col_t(x_cf, X, Y, Z)                                 # (K_DIM, M) bf16

    emb, sh0, sh1 = _build_buffers()
    kmat = _build_conv_kernel(emb, sh0, sh1, params["tp_weight"])
    kmat = kmat.reshape(K_DIM, C_MID)                                  # rows ordered (dx,dy,dz,i)
    # Fold the self-connection into the centre tap: the (dx,dy,dz)=(2,2,2) im2col rows
    # are exactly x itself, so 0.2*Linear_sc(x) + 0.8*conv(x) == conv(x; kmat_fused).
    kmat = 0.8 * kmat
    kmat = kmat.at[CENTER_ROW:CENTER_ROW + C_IN, :].add(0.2 * params["w_sc"])

    M = N * X * Y * Z
    Mp = ((M + TILE_M - 1) // TILE_M) * TILE_M
    patches = jnp.pad(patches, ((0, K_PAD - K_DIM), (0, Mp - M)))      # (K_PAD, Mp) bf16
    kmat_t = jnp.pad(kmat.T, ((0, 0), (0, K_PAD - K_DIM))).astype(jnp.bfloat16)  # (C_MID, K_PAD)
    return patches, kmat_t, (N, X, Y, Z, M, Mp)


def _unpack(out_t, N, X, Y, Z, M):
    out = out_t[:, :M].reshape(C_OUT, N, X, Y, Z)
    return jnp.transpose(out, (1, 0, 2, 3, 4))                 # back to NCDHW


# --------------------------- Pallas kernel (hot path) --------------------------
def _conv_block_kernel(patches_ref, kmat_ref, out_ref):
    # Single fused MXU matmul: conv3d (im2col) and the 0.2*self-connection are both
    # folded into kmat.  bf16 operands, f32 accumulation.  Voxel axis TILE_M is on
    # lanes, so the store below is unmasked and lane-dense.
    mid = jnp.dot(kmat_ref[...], patches_ref[...],
                  preferred_element_type=jnp.float32)          # (C_MID, TILE_M) f32

    # e3nn Gate: relu(scalars), sigmoid(gates)[u] * gated_1e[u, m], assembled into one
    # dense (C_OUT, TILE_M) tensor and written with a single store.
    scalars = jnp.maximum(mid[:N_SCALARS, :], 0.0)
    gates = jax.nn.sigmoid(mid[N_SCALARS:N_SCALARS + N_GATES, :])
    gated = mid[N_SCALARS + N_GATES:, :]
    pieces = [scalars] + [gated[3 * u:3 * (u + 1), :] * gates[u:u + 1, :]
                          for u in range(N_GATED)]
    out_ref[...] = jnp.concatenate(pieces, axis=0)
    # TODO(synk): e3nn's normalize2mom rescaling of relu/sigmoid and training-mode
    # Dropout/BatchNorm are not modelled (dropout_prob=0.0, batchnorm_bool=False here).


def _forward_impl(x, params):
    patches, kmat_t, (N, X, Y, Z, M, Mp) = _prepare(x, params)
    cost = pl.CostEstimate(
        flops=2 * C_MID * K_PAD * Mp,
        transcendentals=N_GATES * Mp,
        bytes_accessed=K_PAD * Mp * 2 + C_MID * K_PAD * 2 + C_OUT * Mp * 4,
    )
    out_t = pl.pallas_call(
        _conv_block_kernel,
        out_shape=jax.ShapeDtypeStruct((C_OUT, Mp), jnp.float32),
        grid_spec=pltpu.PrefetchScalarGridSpec(
            num_scalar_prefetch=0,
            grid=(Mp // TILE_M,),
            in_specs=[
                pl.BlockSpec((K_PAD, TILE_M), lambda i: (0, i)),   # patch tile (lanes = voxels)
                pl.BlockSpec((C_MID, K_PAD), lambda i: (0, 0)),    # fused weights (resident)
            ],
            out_specs=pl.BlockSpec((C_OUT, TILE_M), lambda i: (0, i)),
        ),
        compiler_params=pltpu.CompilerParams(
            dimension_semantics=("parallel",),
            vmem_limit_bytes=32 * 1024 * 1024,   # explicit; safe on v7x's 64 MiB VMEM
        ),
        cost_estimate=cost,
    )(patches, kmat_t)
    return _unpack(out_t, N, X, Y, Z, M)


conv_block_forward = jax.jit(_forward_impl)


# --------------------------- pure-JAX reference --------------------------------
def _reference_impl(x, params):
    # Uses the same prepared (bf16-quantised) operands as the kernel — the bf16 cast is
    # a deliberate, consistently-applied perf choice; math below is f32.
    patches, kmat_t, (N, X, Y, Z, M, Mp) = _prepare(x, params)
    mid = jnp.dot(kmat_t.astype(jnp.float32), patches.astype(jnp.float32),
                  precision=jax.lax.Precision.HIGHEST)         # (C_MID, Mp)
    scalars = jnp.maximum(mid[:N_SCALARS], 0.0)
    gates = jax.nn.sigmoid(mid[N_SCALARS:N_SCALARS + N_GATES])
    gated = mid[N_SCALARS + N_GATES:]
    pieces = [scalars] + [gated[3 * u:3 * (u + 1)] * gates[u:u + 1]
                          for u in range(N_GATED)]
    return _unpack(jnp.concatenate(pieces, axis=0), N, X, Y, Z, M)


conv_block_reference = jax.jit(_reference_impl)


# --------------------------- main ----------------------------------------------
if __name__ == "__main__":
    key = jax.random.PRNGKey(0)
    k1, k2, k3 = jax.random.split(key, 3)

    # deterministic synthetic parameters (shapes from the module's __init__)
    tp_weight = jax.random.normal(k1, (KSIZE, TP_WEIGHT_NUMEL), jnp.float32)
    # e3nn Linear(4x0e -> 6x0e+2x1e): only 0e->0e paths exist, 1e outputs are zero.
    w_sc_scalar = jax.random.normal(k2, (C_IN, N_SCALARS + N_GATES), jnp.float32) / jnp.sqrt(
        float(C_IN)
    )
    w_sc = jnp.concatenate([w_sc_scalar, jnp.zeros((C_IN, 3 * N_GATED), jnp.float32)], axis=1)
    params = {"tp_weight": tp_weight, "w_sc": w_sc}

    x = jax.random.normal(k3, (2, C_IN, 16, 16, 16), jnp.float32)   # NCDHW

    out = jax.block_until_ready(conv_block_forward(x, params))
    ref = jax.block_until_ready(conv_block_reference(x, params))

    assert out.shape == (2, C_OUT, 16, 16, 16), out.shape
    max_err = float(jnp.max(jnp.abs(out - ref)))
    assert jnp.allclose(out, ref, atol=1e-2, rtol=1e-2), max_err
    print("KERNEL_OK")
</pallas_src>

<mosaic_0001>
module attributes {stable_mosaic.version = 11 : i64} {
  func.func @_conv_block_kernel(%arg0: i32, %arg1: memref<512x2048xbf16, #tpu.memory_space<vmem>>, %arg2: memref<12x512xbf16, #tpu.memory_space<vmem>>, %arg3: memref<10x2048xf32, #tpu.memory_space<vmem>>) attributes {dimension_semantics = [#tpu.dimension_semantics<parallel>], iteration_bounds = array<i64: 4>, scalar_prefetch = 0 : i64, scratch_operands = 0 : i64, tpu.core_type = #tpu.core_type<tc>, window_params = [{transform_indices = @transform_0, window_bounds = array<i64: 512, 2048>}, {pipeline_mode = #tpu.pipeline_mode<synchronous>, transform_indices = @transform_1, window_bounds = array<i64: 12, 512>}, {transform_indices = @transform_2, window_bounds = array<i64: 10, 2048>}]} {
    %c0 = arith.constant 0 : index
    %c0_0 = arith.constant 0 : index
    %0 = vector.load %arg2[%c0, %c0_0] : memref<12x512xbf16, #tpu.memory_space<vmem>>, vector<12x512xbf16>
    %c0_1 = arith.constant 0 : index
    %c0_2 = arith.constant 0 : index
    %1 = vector.load %arg1[%c0_1, %c0_2] : memref<512x2048xbf16, #tpu.memory_space<vmem>>, vector<512x2048xbf16>
    %cst = arith.constant dense<0.000000e+00> : vector<12x2048xf32>
    %2 = tpu.matmul %0, %1, %cst {dimension_numbers = #tpu.dot_dimension_numbers<[1], [0], [0], [1], [0, 0, 1, 1], [], []>} : vector<12x512xbf16>, vector<512x2048xbf16>, vector<12x2048xf32> -> vector<12x2048xf32>
    %3 = vector.extract_strided_slice %2 {offsets = [0, 0], sizes = [4, 2048], strides = [1, 1]} : vector<12x2048xf32> to vector<4x2048xf32>
    %cst_3 = arith.constant 0.000000e+00 : f32
    %4 = vector.broadcast %cst_3 : f32 to vector<4x2048xf32>
    %5 = arith.maximumf %3, %4 : vector<4x2048xf32>
    %6 = vector.extract_strided_slice %2 {offsets = [4, 0], sizes = [2, 2048], strides = [1, 1]} : vector<12x2048xf32> to vector<2x2048xf32>
    %7 = arith.negf %6 : vector<2x2048xf32>
    %8 = math.exp %7 : vector<2x2048xf32>
    %cst_4 = arith.constant 1.000000e+00 : f32
    %9 = vector.broadcast %cst_4 : f32 to vector<2x2048xf32>
    %10 = arith.addf %9, %8 : vector<2x2048xf32>
    %11 = arith.divf %9, %10 : vector<2x2048xf32>
    %12 = vector.extract_strided_slice %2 {offsets = [6, 0], sizes = [6, 2048], strides = [1, 1]} : vector<12x2048xf32> to vector<6x2048xf32>
    %13 = vector.extract_strided_slice %12 {offsets = [0, 0], sizes = [3, 2048], strides = [1, 1]} : vector<6x2048xf32> to vector<3x2048xf32>
    %14 = vector.extract_strided_slice %11 {offsets = [0, 0], sizes = [1, 2048], strides = [1, 1]} : vector<2x2048xf32> to vector<1x2048xf32>
    %15 = vector.broadcast %14 : vector<1x2048xf32> to vector<3x2048xf32>
    %16 = arith.mulf %13, %15 : vector<3x2048xf32>
    %17 = vector.extract_strided_slice %12 {offsets = [3, 0], sizes = [3, 2048], strides = [1, 1]} : vector<6x2048xf32> to vector<3x2048xf32>
    %18 = vector.extract_strided_slice %11 {offsets = [1, 0], sizes = [1, 2048], strides = [1, 1]} : vector<2x2048xf32> to vector<1x2048xf32>
    %19 = vector.broadcast %18 : vector<1x2048xf32> to vector<3x2048xf32>
    %20 = arith.mulf %17, %19 : vector<3x2048xf32>
    %21 = tpu.concatenate %5, %16, %20 in 0 : vector<4x2048xf32>, vector<3x2048xf32>, vector<3x2048xf32> -> vector<10x2048xf32>
    %c0_5 = arith.constant 0 : index
    %c0_6 = arith.constant 0 : index
    %22 = vector.load %arg3[%c0_5, %c0_6] : memref<10x2048xf32, #tpu.memory_space<vmem>>, vector<10x2048xf32>
    tpu.vector_store %arg3[%c0_5, %c0_6], %21 {strides = array<i32>} : memref<10x2048xf32, #tpu.memory_space<vmem>>, vector<10x2048xf32>,
    return
  }
  func.func @transform_0(%arg0: i32) -> (i32, i32) {
    %c0_i32 = arith.constant 0 : i32
    %c0_i32_0 = arith.constant 0 : i32
    return %c0_i32, %arg0 : i32, i32
  }
  func.func @transform_1(%arg0: i32) -> (i32, i32) {
    %c0_i32 = arith.constant 0 : i32
    %c0_i32_0 = arith.constant 0 : i32
    %c0_i32_1 = arith.constant 0 : i32
    return %c0_i32, %c0_i32_0 : i32, i32
  }
  func.func @transform_2(%arg0: i32) -> (i32, i32) {
    %c0_i32 = arith.constant 0 : i32
    %c0_i32_0 = arith.constant 0 : i32
    return %c0_i32, %arg0 : i32, i32
  }
}

</mosaic_0001>

<bundles_post_ra>
// kernel: mul.32
= control target key start
LH: loop header
LB: loop body
LE: loop exit
PB: predicated region body
PF: predicated region fallthrough
CT: control target
= control target key end

     0   :  { %s100_s0 = inlined_call_operand.vmem [shape: f32[500,6], index: 0, kind: input, shape index: {}]   ;;  %s101_s1 = inlined_call_operand.vmem [shape: f32[500,6], index: 1, kind: input, shape index: {}]   ;;  %s102_s2 = inlined_call_operand.vmem [shape: f32[500,6], index: 2, kind: output, shape index: {}]  }
   0x1   :  { %v3_v0 = vld [vmem:[%s100_s0] sm:$0x3f]  ;;  %v40_v2 = vld [vmem:[%s100_s0 + $0x8] sm:$0x3f]  ;;  %v43_v5 = vld [vmem:[%s100_s0 + $0x10] sm:$0x3f] }
   0x2   :  { %v4_v1 = vld [vmem:[%s101_s1] sm:$0x3f]  ;;  %v41_v4 = vld [vmem:[%s101_s1 + $0x8] sm:$0x3f]  ;;  %v44_v6 = vld [vmem:[%s101_s1 + $0x10] sm:$0x3f] }
   0x3   :  { %v7_v3 = vmul.f32 %v4_v1, %v3_v0  ;;  %v16_v7 = vmul.f32 %v41_v4, %v40_v2  ;;  %v26_v8 = vmul.f32 %v44_v6, %v43_v5  ;;  %v46_v9 = vld [vmem:[%s100_s0 + $0x18] sm:$0x3f] }
   0x4   :  { %v47_v10 = vld [vmem:[%s101_s1 + $0x18] sm:$0x3f] }
   0x5   :  { %9 = vst [vmem:[%s102_s2] sm:$0xff] %v7_v3  ;;  %v36_v11 = vmul.f32 %v47_v10, %v46_v9  ;;  %42 = vst [vmem:[%s102_s2 + $0x8] sm:$0xff] %v16_v7 }
   0x6   :  { %45 = vst [vmem:[%s102_s2 + $0x10] sm:$0xff] %v26_v8 }
   0x7   :  { %48 = vst [vmem:[%s102_s2 + $0x18] sm:$0xff] %v36_v11 }

// kernel: _forward_impl.1
= control target key start
LH: loop header
LB: loop body
LE: loop exit
PB: predicated region body
PF: predicated region fallthrough
CT: control target
= control target key end

     0   :  { %s6328_s9 = smov 0   ;;  %s6330_s10 = smov 0   ;;  %s8435_s0 = inlined_call_operand.vmem [shape: bf16[512,8192], index: 0, kind: input, shape index: {}]   ;;  %s8436_s1 = inlined_call_operand.vmem [shape: bf16[12,512], index: 1, kind: input, shape index: {}]   ;;  %s8437_s2 = inlined_call_operand.vmem [shape: f32[10,8192], index: 2, kind: output, shape index: {}]  }
   0x1   :  { %s6332_s11 = smov 0  }
   0x2 LB: > { %s5610_s12 = sadd.s32 4294967295, %s6311_s11   ;;  %s6345_s13 = sadd.s32 1, %s6311_s11   ;;  %s6311_s11 = sphi %s6332_s11, %s8441_s11   ;;  %s6307_s10 = sphi %s6330_s10, %s8440_s10   ;;  %s6303_s9 = sphi %s6328_s9, %s8439_s9  }
   0x3   : > { %s16_s14 = ssub.s32 %s6311_s11, %s6345_s13  ;;  %s19_s15 = sadd.s32 1, %s6307_s10 }
   0x4   : > { %p17_p0 = scmp.eq.s32.totalorder %s16_s14, 0  ;;  %p26_p1 = scmp.ne.s32.totalorder %s6307_s10, %s6303_s9 }
   0x5   : > { %p27_p2 = scmp.eq.s32.totalorder %s6311_s11, 0  ;;  %p77_p3 = scmp.eq.s32.totalorder %s5610_s12, 3 }
   0x6   : > { %s6356_s16 = scalar_select %p17_p0, %s6307_s10, %s19_s15  }
   0x7   : > { %p28_p4 = por %p27_p2, %p26_p1  ;;  %p6358_p5 = por %p77_p3, %p26_p1 }
   0x8   : > { %p5613_p6 = scmp.ge.s32.totalorder %s6311_s11, 4 }
   0xa   : > { %102 = sbr.rel (%p5613_p6) target bundleno = 277 (0x115), region = 20 }
  0x11   : > { %105 = sbr.rel (!%p28_p4) target bundleno = 277 (0x115), region = 24  ;;  %s107_s18 = sand.u32 (%p28_p4), 1, %s6307_s10  }
  0x12   : > { %s6157_s19 = sshll.u32 (%p28_p4), %s6311_s11, 6  ;;  %s5614_s20 = sshll.u32 (%p28_p4), %s107_s18, 12 }
  0x13   : > { %s6368_s23 = scalar_lea.vmem (%p28_p4), %s8435_s0, %s6157_s19  ;;  %s6373_s24 = scalar_lea.vmem (%p28_p4), [#allocation2], %s5614_s20 }
  0x14   : > { %v125_v0 = vld [vmem:[%s6368_s23] sm:$0xff] (%p28_p4)  ;;  %v127_v1 = vld [vmem:[%s6368_s23 + $0x8] sm:$0xff] (%p28_p4)  ;;  %v129_v2 = vld [vmem:[%s6368_s23 + $0x10] sm:$0xff] (%p28_p4) }
  0x15   : > { %126 = vst [vmem:[%s6373_s24] sm:$0xff] (%p28_p4), %v125_v0  ;;  %128 = vst [vmem:[%s6373_s24 + $0x8] sm:$0xff] (%p28_p4), %v127_v1  ;;  %v131_v3 = vld [vmem:[%s6368_s23 + $0x18] sm:$0xff] (%p28_p4)  ;;  %v133_v4 = vld [vmem:[%s6368_s23 + $0x20] sm:$0xff] (%p28_p4) }
  0x16   : > { %130 = vst [vmem:[%s6373_s24 + $0x10] sm:$0xff] (%p28_p4), %v129_v2  ;;  %v135_v5 = vld [vmem:[%s6368_s23 + $0x28] sm:$0xff] (%p28_p4)  ;;  %132 = vst [vmem:[%s6373_s24 + $0x18] sm:$0xff] (%p28_p4), %v131_v3  ;;  %v137_v6 = vld [vmem:[%s6368_s23 + $0x30] sm:$0xff] (%p28_p4) }
  0x17   : > { %134 = vst [vmem:[%s6373_s24 + $0x20] sm:$0xff] (%p28_p4), %v133_v4  ;;  %136 = vst [vmem:[%s6373_s24 + $0x28] sm:$0xff] (%p28_p4), %v135_v5  ;;  %v139_v7 = vld [vmem:[%s6368_s23 + $0x38] sm:$0xff] (%p28_p4)  ;;  %v141_v8 = vld [vmem:[%s6368_s23 + $0x100] sm:$0xff] (%p28_p4) }
  0x18   : > { %138 = vst [vmem:[%s6373_s24 + $0x30] sm:$0xff] %v137_v6  ;;  %140 = vst [vmem:[%s6373_s24 + $0x38] sm:$0xff] %v139_v7  ;;  %v143_v9 = vld [vmem:[%s6368_s23 + $0x108] sm:$0xff]  ;;  %v145_v10 = vld [vmem:[%s6368_s23 + $0x110] sm:$0xff] }
  0x19   : > { %142 = vst [vmem:[%s6373_s24 + $0x40] sm:$0xff] %v141_v8  ;;  %v147_v11 = vld [vmem:[%s6368_s23 + $0x118] sm:$0xff]  ;;  %144 = vst [vmem:[%s6373_s24 + $0x48] sm:$0xff] %v143_v9  ;;  %v149_v12 = vld [vmem:[%s6368_s23 + $0x120] sm:$0xff] }
  0x1a   : > { %146 = vst [vmem:[%s6373_s24 + $0x50] sm:$0xff] %v145_v10  ;;  %148 = vst [vmem:[%s6373_s24 + $0x58] sm:$0xff] %v147_v11  ;;  %v151_v13 = vld [vmem:[%s6368_s23 + $0x128] sm:$0xff]  ;;  %v153_v14 = vld [vmem:[%s6368_s23 + $0x130] sm:$0xff] }
  0x1b   : > { %150 = vst [vmem:[%s6373_s24 + $0x60] sm:$0xff] %v149_v12  ;;  %152 = vst [vmem:[%s6373_s24 + $0x68] sm:$0xff] %v151_v13  ;;  %v155_v15 = vld [vmem:[%s6368_s23 + $0x138] sm:$0xff]  ;;  %v157_v16 = vld [vmem:[%s6368_s23 + $0x200] sm:$0xff] }
  0x1c   : > { %154 = vst [vmem:[%s6373_s24 + $0x70] sm:$0xff] %v153_v14  ;;  %v159_v17 = vld [vmem:[%s6368_s23 + $0x208] sm:$0xff]  ;;  %156 = vst [vmem:[%s6373_s24 + $0x78] sm:$0xff] %v155_v15  ;;  %v161_v18 = vld [vmem:[%s6368_s23 + $0x210] sm:$0xff] }
  0x1d   : > { %158 = vst [vmem:[%s6373_s24 + $0x80] sm:$0xff] %v157_v16  ;;  %160 = vst [vmem:[%s6373_s24 + $0x88] sm:$0xff] %v159_v17  ;;  %v163_v19 = vld [vmem:[%s6368_s23 + $0x218] sm:$0xff]  ;;  %v165_v20 = vld [vmem:[%s6368_s23 + $0x220] sm:$0xff] }
  0x1e   : > { %162 = vst [vmem:[%s6373_s24 + $0x90] sm:$0xff] %v161_v18  ;;  %164 = vst [vmem:[%s6373_s24 + $0x98] sm:$0xff] %v163_v19  ;;  %v167_v21 = vld [vmem:[%s6368_s23 + $0x228] sm:$0xff]  ;;  %v169_v22 = vld [vmem:[%s6368_s23 + $0x230] sm:$0xff] }
  0x1f   : > { %166 = vst [vmem:[%s6373_s24 + $0xa0] sm:$0xff] %v165_v20  ;;  %v171_v23 = vld [vmem:[%s6368_s23 + $0x238] sm:$0xff]  ;;  %168 = vst [vmem:[%s6373_s24 + $0xa8] sm:$0xff] %v167_v21  ;;  %v173_v24 = vld [vmem:[%s6368_s23 + $0x300] sm:$0xff] }
  0x20   : > { %170 = vst [vmem:[%s6373_s24 + $0xb0] sm:$0xff] %v169_v22  ;;  %172 = vst [vmem:[%s6373_s24 + $0xb8] sm:$0xff] %v171_v23  ;;  %v175_v25 = vld [vmem:[%s6368_s23 + $0x308] sm:$0xff]  ;;  %v177_v26 = vld [vmem:[%s6368_s23 + $0x310] sm:$0xff] }
  0x21   : > { %174 = vst [vmem:[%s6373_s24 + $0xc0] sm:$0xff] %v173_v24  ;;  %176 = vst [vmem:[%s6373_s24 + $0xc8] sm:$0xff] %v175_v25  ;;  %v179_v27 = vld [vmem:[%s6368_s23 + $0x318] sm:$0xff]  ;;  %v181_v28 = vld [vmem:[%s6368_s23 + $0x320] sm:$0xff] }
  0x22   : > { %178 = vst [vmem:[%s6373_s24 + $0xd0] sm:$0xff] %v177_v26  ;;  %v183_v29 = vld [vmem:[%s6368_s23 + $0x328] sm:$0xff]  ;;  %180 = vst [vmem:[%s6373_s24 + $0xd8] sm:$0xff] %v179_v27  ;;  %v185_v30 = vld [vmem:[%s6368_s23 + $0x330] sm:$0xff] }
  0x23   : > { %182 = vst [vmem:[%s6373_s24 + $0xe0] sm:$0xff] %v181_v28  ;;  %184 = vst [vmem:[%s6373_s24 + $0xe8] sm:$0xff] %v183_v29  ;;  %v187_v31 = vld [vmem:[%s6368_s23 + $0x338] sm:$0xff]  ;;  %v189_v32 = vld [vmem:[%s6368_s23 + $0x400] sm:$0xff] }
  0x24   : > { %186 = vst [vmem:[%s6373_s24 + $0xf0] sm:$0xff] %v185_v30  ;;  %188 = vst [vmem:[%s6373_s24 + $0xf8] sm:$0xff] %v187_v31  ;;  %v191_v33 = vld [vmem:[%s6368_s23 + $0x408] sm:$0xff]  ;;  %v193_v34 = vld [vmem:[%s6368_s23 + $0x410] sm:$0xff] }
  0x25   : > { %190 = vst [vmem:[%s6373_s24 + $0x100] sm:$0xff] %v189_v32  ;;  %v195_v35 = vld [vmem:[%s6368_s23 + $0x418] sm:$0xff]  ;;  %192 = vst [vmem:[%s6373_s24 + $0x108] sm:$0xff] %v191_v33  ;;  %v197_v36 = vld [vmem:[%s6368_s23 + $0x420] sm:$0xff] }
  0x26   : > { %194 = vst [vmem:[%s6373_s24 + $0x110] sm:$0xff] %v193_v34  ;;  %196 = vst [vmem:[%s6373_s24 + $0x118] sm:$0xff] %v195_v35  ;;  %v199_v37 = vld [vmem:[%s6368_s23 + $0x428] sm:$0xff]  ;;  %v201_v38 = vld [vmem:[%s6368_s23 + $0x430] sm:$0xff] }
  0x27   : > { %198 = vst [vmem:[%s6373_s24 + $0x120] sm:$0xff] %v197_v36  ;;  %200 = vst [vmem:[%s6373_s24 + $0x128] sm:$0xff] %v199_v37  ;;  %v203_v39 = vld [vmem:[%s6368_s23 + $0x438] sm:$0xff]  ;;  %v205_v40 = vld [vmem:[%s6368_s23 + $0x500] sm:$0xff] }
  0x28   : > { %202 = vst [vmem:[%s6373_s24 + $0x130] sm:$0xff] %v201_v38  ;;  %v207_v41 = vld [vmem:[%s6368_s23 + $0x508] sm:$0xff]  ;;  %204 = vst [vmem:[%s6373_s24 + $0x138] sm:$0xff] %v203_v39  ;;  %v209_v42 = vld [vmem:[%s6368_s23 + $0x510] sm:$0xff] }
  0x29   : > { %206 = vst [vmem:[%s6373_s24 + $0x140] sm:$0xff] %v205_v40  ;;  %208 = vst [vmem:[%s6373_s24 + $0x148] sm:$0xff] %v207_v41  ;;  %v211_v43 = vld [vmem:[%s6368_s23 + $0x518] sm:$0xff]  ;;  %v213_v44 = vld [vmem:[%s6368_s23 + $0x520] sm:$0xff] }
  0x2a   : > { %210 = vst [vmem:[%s6373_s24 + $0x150] sm:$0xff] %v209_v42  ;;  %212 = vst [vmem:[%s6373_s24 + $0x158] sm:$0xff] %v211_v43  ;;  %v215_v45 = vld [vmem:[%s6368_s23 + $0x528] sm:$0xff]  ;;  %v217_v46 = vld [vmem:[%s6368_s23 + $0x530] sm:$0xff] }
  0x2b   : > { %214 = vst [vmem:[%s6373_s24 + $0x160] sm:$0xff] %v213_v44  ;;  %v219_v47 = vld [vmem:[%s6368_s23 + $0x538] sm:$0xff]  ;;  %216 = vst [vmem:[%s6373_s24 + $0x168] sm:$0xff] %v215_v45  ;;  %v221_v48 = vld [vmem:[%s6368_s23 + $0x600] sm:$0xff] }
  0x2c   : > { %218 = vst [vmem:[%s6373_s24 + $0x170] sm:$0xff] %v217_v46  ;;  %220 = vst [vmem:[%s6373_s24 + $0x178] sm:$0xff] %v219_v47  ;;  %v223_v49 = vld [vmem:[%s6368_s23 + $0x608] sm:$0xff]  ;;  %v225_v50 = vld [vmem:[%s6368_s23 + $0x610] sm:$0xff] }
  0x2d   : > { %222 = vst [vmem:[%s6373_s24 + $0x180] sm:$0xff] %v221_v48  ;;  %224 = vst [vmem:[%s6373_s24 + $0x188] sm:$0xff] %v223_v49  ;;  %v227_v51 = vld [vmem:[%s6368_s23 + $0x618] sm:$0xff]  ;;  %v229_v52 = vld [vmem:[%s6368_s23 + $0x620] sm:$0xff] }
  0x2e   : > { %226 = vst [vmem:[%s6373_s24 + $0x190] sm:$0xff] %v225_v50  ;;  %v231_v53 = vld [vmem:[%s6368_s23 + $0x628] sm:$0xff]  ;;  %228 = vst [vmem:[%s6373_s24 + $0x198] sm:$0xff] %v227_v51  ;;  %v233_v54 = vld [vmem:[%s6368_s23 + $0x630] sm:$0xff] }
  0x2f   : > { %230 = vst [vmem:[%s6373_s24 + $0x1a0] sm:$0xff] %v229_v52  ;;  %232 = vst [vmem:[%s6373_s24 + $0x1a8] sm:$0xff] %v231_v53  ;;  %v235_v55 = vld [vmem:[%s6368_s23 + $0x638] sm:$0xff]  ;;  %v237_v56 = vld [vmem:[%s6368_s23 + $0x700] sm:$0xff] }
  0x30   : > { %234 = vst [vmem:[%s6373_s24 + $0x1b0] sm:$0xff] %v233_v54  ;;  %236 = vst [vmem:[%s6373_s24 + $0x1b8] sm:$0xff] %v235_v55  ;;  %v239_v57 = vld [vmem:[%s6368_s23 + $0x708] sm:$0xff]  ;;  %v241_v58 = vld [vmem:[%s6368_s23 + $0x710] sm:$0xff] }
  0x31   : > { %238 = vst [vmem:[%s6373_s24 + $0x1c0] sm:$0xff] %v237_v56  ;;  %v243_v59 = vld [vmem:[%s6368_s23 + $0x718] sm:$0xff]  ;;  %240 = vst [vmem:[%s6373_s24 + $0x1c8] sm:$0xff] %v239_v57  ;;  %v245_v60 = vld [vmem:[%s6368_s23 + $0x720] sm:$0xff] }
  0x32   : > { %242 = vst [vmem:[%s6373_s24 + $0x1d0] sm:$0xff] %v241_v58  ;;  %244 = vst [vmem:[%s6373_s24 + $0x1d8] sm:$0xff] %v243_v59  ;;  %v247_v61 = vld [vmem:[%s6368_s23 + $0x728] sm:$0xff]  ;;  %v249_v62 = vld [vmem:[%s6368_s23 + $0x730] sm:$0xff] }
  0x33   : > { %246 = vst [vmem:[%s6373_s24 + $0x1e0] sm:$0xff] %v245_v60  ;;  %248 = vst [vmem:[%s6373_s24 + $0x1e8] sm:$0xff] %v247_v61  ;;  %v251_v63 = vld [vmem:[%s6368_s23 + $0x738] sm:$0xff]  ;;  %v253_v0 = vld [vmem:[%s6368_s23 + $0x800] sm:$0xff] }
  0x34   : > { %250 = vst [vmem:[%s6373_s24 + $0x1f0] sm:$0xff] %v249_v62  ;;  %v255_v1 = vld [vmem:[%s6368_s23 + $0x808] sm:$0xff]  ;;  %252 = vst [vmem:[%s6373_s24 + $0x1f8] sm:$0xff] %v251_v63  ;;  %v257_v2 = vld [vmem:[%s6368_s23 + $0x810] sm:$0xff] }
  0x35   : > { %254 = vst [vmem:[%s6373_s24 + $0x200] sm:$0xff] %v253_v0  ;;  %256 = vst [vmem:[%s6373_s24 + $0x208] sm:$0xff] %v255_v1  ;;  %v259_v3 = vld [vmem:[%s6368_s23 + $0x818] sm:$0xff]  ;;  %v261_v4 = vld [vmem:[%s6368_s23 + $0x820] sm:$0xff] }
  0x36   : > { %258 = vst [vmem:[%s6373_s24 + $0x210] sm:$0xff] %v257_v2  ;;  %260 = vst [vmem:[%s6373_s24 + $0x218] sm:$0xff] %v259_v3  ;;  %v263_v5 = vld [vmem:[%s6368_s23 + $0x828] sm:$0xff]  ;;  %v265_v6 = vld [vmem:[%s6368_s23 + $0x830] sm:$0xff] }
  0x37   : > { %262 = vst [vmem:[%s6373_s24 + $0x220] sm:$0xff] %v261_v4  ;;  %v267_v7 = vld [vmem:[%s6368_s23 + $0x838] sm:$0xff]  ;;  %264 = vst [vmem:[%s6373_s24 + $0x228] sm:$0xff] %v263_v5  ;;  %v269_v8 = vld [vmem:[%s6368_s23 + $0x900] sm:$0xff] }
  0x38   : > { %266 = vst [vmem:[%s6373_s24 + $0x230] sm:$0xff] %v265_v6  ;;  %268 = vst [vmem:[%s6373_s24 + $0x238] sm:$0xff] %v267_v7  ;;  %v271_v9 = vld [vmem:[%s6368_s23 + $0x908] sm:$0xff]  ;;  %v273_v10 = vld [vmem:[%s6368_s23 + $0x910] sm:$0xff] }
  0x39   : > { %270 = vst [vmem:[%s6373_s24 + $0x240] sm:$0xff] %v269_v8  ;;  %272 = vst [vmem:[%s6373_s24 + $0x248] sm:$0xff] %v271_v9  ;;  %v275_v11 = vld [vmem:[%s6368_s23 + $0x918] sm:$0xff]  ;;  %v277_v12 = vld [vmem:[%s6368_s23 + $0x920] sm:$0xff] }
  0x3a   : > { %274 = vst [vmem:[%s6373_s24 + $0x250] sm:$0xff] %v273_v10  ;;  %v279_v13 = vld [vmem:[%s6368_s23 + $0x928] sm:$0xff]  ;;  %276 = vst [vmem:[%s6373_s24 + $0x258] sm:$0xff] %v275_v11  ;;  %v281_v14 = vld [vmem:[%s6368_s23 + $0x930] sm:$0xff] }
  0x3b   : > { %278 = vst [vmem:[%s6373_s24 + $0x260] sm:$0xff] %v277_v12  ;;  %280 = vst [vmem:[%s6373_s24 + $0x268] sm:$0xff] %v279_v13  ;;  %v283_v15 = vld [vmem:[%s6368_s23 + $0x938] sm:$0xff]  ;;  %v285_v16 = vld [vmem:[%s6368_s23 + $0xa00] sm:$0xff] }
  0x3c   : > { %282 = vst [vmem:[%s6373_s24 + $0x270] sm:$0xff] %v281_v14  ;;  %284 = vst [vmem:[%s6373_s24 + $0x278] sm:$0xff] %v283_v15  ;;  %v287_v17 = vld [vmem:[%s6368_s23 + $0xa08] sm:$0xff]  ;;  %v289_v18 = vld [vmem:[%s6368_s23 + $0xa10] sm:$0xff] }
  0x3d   : > { %286 = vst [vmem:[%s6373_s24 + $0x280] sm:$0xff] %v285_v16  ;;  %v291_v19 = vld [vmem:[%s6368_s23 + $0xa18] sm:$0xff]  ;;  %288 = vst [vmem:[%s6373_s24 + $0x288] sm:$0xff] %v287_v17  ;;  %v293_v20 = vld [vmem:[%s6368_s23 + $0xa20] sm:$0xff] }
  0x3e   : > { %290 = vst [vmem:[%s6373_s24 + $0x290] sm:$0xff] %v289_v18  ;;  %292 = vst [vmem:[%s6373_s24 + $0x298] sm:$0xff] %v291_v19  ;;  %v295_v21 = vld [vmem:[%s6368_s23 + $0xa28] sm:$0xff]  ;;  %v297_v22 = vld [vmem:[%s6368_s23 + $0xa30] sm:$0xff] }
  0x3f   : > { %294 = vst [vmem:[%s6373_s24 + $0x2a0] sm:$0xff] %v293_v20  ;;  %296 = vst [vmem:[%s6373_s24 + $0x2a8] sm:$0xff] %v295_v21  ;;  %v299_v23 = vld [vmem:[%s6368_s23 + $0xa38] sm:$0xff]  ;;  %v301_v24 = vld [vmem:[%s6368_s23 + $0xb00] sm:$0xff] }
  0x40   : > { %298 = vst [vmem:[%s6373_s24 + $0x2b0] sm:$0xff] %v297_v22  ;;  %v303_v25 = vld [vmem:[%s6368_s23 + $0xb08] sm:$0xff]  ;;  %300 = vst [vmem:[%s6373_s24 + $0x2b8] sm:$0xff] %v299_v23  ;;  %v305_v26 = vld [vmem:[%s6368_s23 + $0xb10] sm:$0xff] }
  0x41   : > { %302 = vst [vmem:[%s6373_s24 + $0x2c0] sm:$0xff] %v301_v24  ;;  %304 = vst [vmem:[%s6373_s24 + $0x2c8] sm:$0xff] %v303_v25  ;;  %v307_v27 = vld [vmem:[%s6368_s23 + $0xb18] sm:$0xff]  ;;  %v309_v28 = vld [vmem:[%s6368_s23 + $0xb20] sm:$0xff] }
  0x42   : > { %306 = vst [vmem:[%s6373_s24 + $0x2d0] sm:$0xff] %v305_v26  ;;  %308 = vst [vmem:[%s6373_s24 + $0x2d8] sm:$0xff] %v307_v27  ;;  %v311_v29 = vld [vmem:[%s6368_s23 + $0xb28] sm:$0xff]  ;;  %v313_v30 = vld [vmem:[%s6368_s23 + $0xb30] sm:$0xff] }
  0x43   : > { %310 = vst [vmem:[%s6373_s24 + $0x2e0] sm:$0xff] %v309_v28  ;;  %v315_v31 = vld [vmem:[%s6368_s23 + $0xb38] sm:$0xff]  ;;  %312 = vst [vmem:[%s6373_s24 + $0x2e8] sm:$0xff] %v311_v29  ;;  %v317_v32 = vld [vmem:[%s6368_s23 + $0xc00] sm:$0xff] }
  0x44   : > { %314 = vst [vmem:[%s6373_s24 + $0x2f0] sm:$0xff] %v313_v30  ;;  %316 = vst [vmem:[%s6373_s24 + $0x2f8] sm:$0xff] %v315_v31  ;;  %v319_v33 = vld [vmem:[%s6368_s23 + $0xc08] sm:$0xff]  ;;  %v321_v34 = vld [vmem:[%s6368_s23 + $0xc10] sm:$0xff] }
  0x45   : > { %318 = vst [vmem:[%s6373_s24 + $0x300] sm:$0xff] %v317_v32  ;;  %320 = vst [vmem:[%s6373_s24 + $0x308] sm:$0xff] %v319_v33  ;;  %v323_v35 = vld [vmem:[%s6368_s23 + $0xc18] sm:$0xff]  ;;  %v325_v36 = vld [vmem:[%s6368_s23 + $0xc20] sm:$0xff] }
  0x46   : > { %322 = vst [vmem:[%s6373_s24 + $0x310] sm:$0xff] %v321_v34  ;;  %v327_v37 = vld [vmem:[%s6368_s23 + $0xc28] sm:$0xff]  ;;  %324 = vst [vmem:[%s6373_s24 + $0x318] sm:$0xff] %v323_v35  ;;  %v329_v38 = vld [vmem:[%s6368_s23 + $0xc30] sm:$0xff] }
  0x47   : > { %326 = vst [vmem:[%s6373_s24 + $0x320] sm:$0xff] %v325_v36  ;;  %328 = vst [vmem:[%s6373_s24 + $0x328] sm:$0xff] %v327_v37  ;;  %v331_v39 = vld [vmem:[%s6368_s23 + $0xc38] sm:$0xff]  ;;  %v333_v40 = vld [vmem:[%s6368_s23 + $0xd00] sm:$0xff] }
  0x48   : > { %330 = vst [vmem:[%s6373_s24 + $0x330] sm:$0xff] %v329_v38  ;;  %332 = vst [vmem:[%s6373_s24 + $0x338] sm:$0xff] %v331_v39  ;;  %v335_v41 = vld [vmem:[%s6368_s23 + $0xd08] sm:$0xff]  ;;  %v337_v42 = vld [vmem:[%s6368_s23 + $0xd10] sm:$0xff] }
  0x49   : > { %334 = vst [vmem:[%s6373_s24 + $0x340] sm:$0xff] %v333_v40  ;;  %v339_v43 = vld [vmem:[%s6368_s23 + $0xd18] sm:$0xff]  ;;  %336 = vst [vmem:[%s6373_s24 + $0x348] sm:$0xff] %v335_v41  ;;  %v341_v44 = vld [vmem:[%s6368_s23 + $0xd20] sm:$0xff] }
  0x4a   : > { %338 = vst [vmem:[%s6373_s24 + $0x350] sm:$0xff] %v337_v42  ;;  %340 = vst [vmem:[%s6373_s24 + $0x358] sm:$0xff] %v339_v43  ;;  %v343_v45 = vld [vmem:[%s6368_s23 + $0xd28] sm:$0xff]  ;;  %v345_v46 = vld [vmem:[%s6368_s23 + $0xd30] sm:$0xff] }
  0x4b   : > { %342 = vst [vmem:[%s6373_s24 + $0x360] sm:$0xff] %v341_v44  ;;  %344 = vst [vmem:[%s6373_s24 + $0x368] sm:$0xff] %v343_v45  ;;  %v347_v47 = vld [vmem:[%s6368_s23 + $0xd38] sm:$0xff]  ;;  %v349_v48 = vld [vmem:[%s6368_s23 + $0xe00] sm:$0xff] }
  0x4c   : > { %346 = vst [vmem:[%s6373_s24 + $0x370] sm:$0xff] %v345_v46  ;;  %v351_v49 = vld [vmem:[%s6368_s23 + $0xe08] sm:$0xff]  ;;  %348 = vst [vmem:[%s6373_s24 + $0x378] sm:$0xff] %v347_v47  ;;  %v353_v50 = vld [vmem:[%s6368_s23 + $0xe10] sm:$0xff] }
  0x4d   : > { %350 = vst [vmem:[%s6373_s24 + $0x380] sm:$0xff] %v349_v48  ;;  %352 = vst [vmem:[%s6373_s24 + $0x388] sm:$0xff] %v351_v49  ;;  %v355_v51 = vld [vmem:[%s6368_s23 + $0xe18] sm:$0xff]  ;;  %v357_v52 = vld [vmem:[%s6368_s23 + $0xe20] sm:$0xff] }
  0x4e   : > { %354 = vst [vmem:[%s6373_s24 + $0x390] sm:$0xff] %v353_v50  ;;  %356 = vst [vmem:[%s6373_s24 + $0x398] sm:$0xff] %v355_v51  ;;  %v359_v53 = vld [vmem:[%s6368_s23 + $0xe28] sm:$0xff]  ;;  %v361_v54 = vld [vmem:[%s6368_s23 + $0xe30] sm:$0xff] }
  0x4f   : > { %358 = vst [vmem:[%s6373_s24 + $0x3a0] sm:$0xff] %v357_v52  ;;  %v363_v55 = vld [vmem:[%s6368_s23 + $0xe38] sm:$0xff]  ;;  %360 = vst [vmem:[%s6373_s24 + $0x3a8] sm:$0xff] %v359_v53  ;;  %v365_v56 = vld [vmem:[%s6368_s23 + $0xf00] sm:$0xff] }
  0x50   : > { %362 = vst [vmem:[%s6373_s24 + $0x3b0] sm:$0xff] %v361_v54  ;;  %364 = vst [vmem:[%s6373_s24 + $0x3b8] sm:$0xff] %v363_v55  ;;  %v367_v57 = vld [vmem:[%s6368_s23 + $0xf08] sm:$0xff]  ;;  %v369_v58 = vld [vmem:[%s6368_s23 + $0xf10] sm:$0xff] }
  0x51   : > { %366 = vst [vmem:[%s6373_s24 + $0x3c0] sm:$0xff] %v365_v56  ;;  %368 = vst [vmem:[%s6373_s24 + $0x3c8] sm:$0xff] %v367_v57  ;;  %v371_v59 = vld [vmem:[%s6368_s23 + $0xf18] sm:$0xff]  ;;  %v373_v60 = vld [vmem:[%s6368_s23 + $0xf20] sm:$0xff] }
  0x52   : > { %370 = vst [vmem:[%s6373_s24 + $0x3d0] sm:$0xff] %v369_v58  ;;  %v375_v61 = vld [vmem:[%s6368_s23 + $0xf28] sm:$0xff]  ;;  %372 = vst [vmem:[%s6373_s24 + $0x3d8] sm:$0xff] %v371_v59  ;;  %v377_v62 = vld [vmem:[%s6368_s23 + $0xf30] sm:$0xff] }
  0x53   : > { %374 = vst [vmem:[%s6373_s24 + $0x3e0] sm:$0xff] %v373_v60  ;;  %376 = vst [vmem:[%s6373_s24 + $0x3e8] sm:$0xff] %v375_v61  ;;  %v379_v63 = vld [vmem:[%s6368_s23 + $0xf38] sm:$0xff]  ;;  %v381_v0 = vld [vmem:[%s6368_s23 + $0x1000] sm:$0xff] }
  0x54   : > { %378 = vst [vmem:[%s6373_s24 + $0x3f0] sm:$0xff] %v377_v62  ;;  %380 = vst [vmem:[%s6373_s24 + $0x3f8] sm:$0xff] %v379_v63  ;;  %v383_v1 = vld [vmem:[%s6368_s23 + $0x1008] sm:$0xff]  ;;  %v385_v2 = vld [vmem:[%s6368_s23 + $0x1010] sm:$0xff] }
  0x55   : > { %382 = vst [vmem:[%s6373_s24 + $0x400] sm:$0xff] %v381_v0  ;;  %v387_v3 = vld [vmem:[%s6368_s23 + $0x1018] sm:$0xff]  ;;  %384 = vst [vmem:[%s6373_s24 + $0x408] sm:$0xff] %v383_v1  ;;  %v389_v4 = vld [vmem:[%s6368_s23 + $0x1020] sm:$0xff] }
  0x56   : > { %386 = vst [vmem:[%s6373_s24 + $0x410] sm:$0xff] %v385_v2  ;;  %388 = vst [vmem:[%s6373_s24 + $0x418] sm:$0xff] %v387_v3  ;;  %v391_v5 = vld [vmem:[%s6368_s23 + $0x1028] sm:$0xff]  ;;  %v393_v6 = vld [vmem:[%s6368_s23 + $0x1030] sm:$0xff] }
  0x57   : > { %390 = vst [vmem:[%s6373_s24 + $0x420] sm:$0xff] %v389_v4  ;;  %392 = vst [vmem:[%s6373_s24 + $0x428] sm:$0xff] %v391_v5  ;;  %v395_v7 = vld [vmem:[%s6368_s23 + $0x1038] sm:$0xff]  ;;  %v397_v8 = vld [vmem:[%s6368_s23 + $0x1100] sm:$0xff] }
  0x58   : > { %394 = vst [vmem:[%s6373_s24 + $0x430] sm:$0xff] %v393_v6  ;;  %v399_v9 = vld [vmem:[%s6368_s23 + $0x1108] sm:$0xff]  ;;  %396 = vst [vmem:[%s6373_s24 + $0x438] sm:$0xff] %v395_v7  ;;  %v401_v10 = vld [vmem:[%s6368_s23 + $0x1110] sm:$0xff] }
  0x59   : > { %398 = vst [vmem:[%s6373_s24 + $0x440] sm:$0xff] %v397_v8  ;;  %400 = vst [vmem:[%s6373_s24 + $0x448] sm:$0xff] %v399_v9  ;;  %v403_v11 = vld [vmem:[%s6368_s23 + $0x1118] sm:$0xff]  ;;  %v405_v12 = vld [vmem:[%s6368_s23 + $0x1120] sm:$0xff] }
  0x5a   : > { %402 = vst [vmem:[%s6373_s24 + $0x450] sm:$0xff] %v401_v10  ;;  %404 = vst [vmem:[%s6373_s24 + $0x458] sm:$0xff] %v403_v11  ;;  %v407_v13 = vld [vmem:[%s6368_s23 + $0x1128] sm:$0xff]  ;;  %v409_v14 = vld [vmem:[%s6368_s23 + $0x1130] sm:$0xff] }
  0x5b   : > { %406 = vst [vmem:[%s6373_s24 + $0x460] sm:$0xff] %v405_v12  ;;  %v411_v15 = vld [vmem:[%s6368_s23 + $0x1138] sm:$0xff]  ;;  %408 = vst [vmem:[%s6373_s24 + $0x468] sm:$0xff] %v407_v13  ;;  %v413_v16 = vld [vmem:[%s6368_s23 + $0x1200] sm:$0xff] }
  0x5c   : > { %410 = vst [vmem:[%s6373_s24 + $0x470] sm:$0xff] %v409_v14  ;;  %412 = vst [vmem:[%s6373_s24 + $0x478] sm:$0xff] %v411_v15  ;;  %v415_v17 = vld [vmem:[%s6368_s23 + $0x1208] sm:$0xff]  ;;  %v417_v18 = vld [vmem:[%s6368_s23 + $0x1210] sm:$0xff] }
  0x5d   : > { %414 = vst [vmem:[%s6373_s24 + $0x480] sm:$0xff] %v413_v16  ;;  %416 = vst [vmem:[%s6373_s24 + $0x488] sm:$0xff] %v415_v17  ;;  %v419_v19 = vld [vmem:[%s6368_s23 + $0x1218] sm:$0xff]  ;;  %v421_v20 = vld [vmem:[%s6368_s23 + $0x1220] sm:$0xff] }
  0x5e   : > { %418 = vst [vmem:[%s6373_s24 + $0x490] sm:$0xff] %v417_v18  ;;  %v423_v21 = vld [vmem:[%s6368_s23 + $0x1228] sm:$0xff]  ;;  %420 = vst [vmem:[%s6373_s24 + $0x498] sm:$0xff] %v419_v19  ;;  %v425_v22 = vld [vmem:[%s6368_s23 + $0x1230] sm:$0xff] }
  0x5f   : > { %422 = vst [vmem:[%s6373_s24 + $0x4a0] sm:$0xff] %v421_v20  ;;  %424 = vst [vmem:[%s6373_s24 + $0x4a8] sm:$0xff] %v423_v21  ;;  %v427_v23 = vld [vmem:[%s6368_s23 + $0x1238] sm:$0xff]  ;;  %v429_v24 = vld [vmem:[%s6368_s23 + $0x1300] sm:$0xff] }
  0x60   : > { %426 = vst [vmem:[%s6373_s24 + $0x4b0] sm:$0xff] %v425_v22  ;;  %428 = vst [vmem:[%s6373_s24 + $0x4b8] sm:$0xff] %v427_v23  ;;  %v431_v25 = vld [vmem:[%s6368_s23 + $0x1308] sm:$0xff]  ;;  %v433_v26 = vld [vmem:[%s6368_s23 + $0x1310] sm:$0xff] }
  0x61   : > { %430 = vst [vmem:[%s6373_s24 + $0x4c0] sm:$0xff] %v429_v24  ;;  %v435_v27 = vld [vmem:[%s6368_s23 + $0x1318] sm:$0xff]  ;;  %432 = vst [vmem:[%s6373_s24 + $0x4c8] sm:$0xff] %v431_v25  ;;  %v437_v28 = vld [vmem:[%s6368_s23 + $0x1320] sm:$0xff] }
  0x62   : > { %434 = vst [vmem:[%s6373_s24 + $0x4d0] sm:$0xff] %v433_v26  ;;  %436 = vst [vmem:[%s6373_s24 + $0x4d8] sm:$0xff] %v435_v27  ;;  %v439_v29 = vld [vmem:[%s6368_s23 + $0x1328] sm:$0xff]  ;;  %v441_v30 = vld [vmem:[%s6368_s23 + $0x1330] sm:$0xff] }
  0x63   : > { %438 = vst [vmem:[%s6373_s24 + $0x4e0] sm:$0xff] %v437_v28  ;;  %440 = vst [vmem:[%s6373_s24 + $0x4e8] sm:$0xff] %v439_v29  ;;  %v443_v31 = vld [vmem:[%s6368_s23 + $0x1338] sm:$0xff]  ;;  %v445_v32 = vld [vmem:[%s6368_s23 + $0x1400] sm:$0xff] }
  0x64   : > { %442 = vst [vmem:[%s6373_s24 + $0x4f0] sm:$0xff] %v441_v30  ;;  %v447_v33 = vld [vmem:[%s6368_s23 + $0x1408] sm:$0xff]  ;;  %444 = vst [vmem:[%s6373_s24 + $0x4f8] sm:$0xff] %v443_v31  ;;  %v449_v34 = vld [vmem:[%s6368_s23 + $0x1410] sm:$0xff] }
  0x65   : > { %446 = vst [vmem:[%s6373_s24 + $0x500] sm:$0xff] %v445_v32  ;;  %448 = vst [vmem:[%s6373_s24 + $0x508] sm:$0xff] %v447_v33  ;;  %v451_v35 = vld [vmem:[%s6368_s23 + $0x1418] sm:$0xff]  ;;  %v453_v36 = vld [vmem:[%s6368_s23 + $0x1420] sm:$0xff] }
  0x66   : > { %450 = vst [vmem:[%s6373_s24 + $0x510] sm:$0xff] %v449_v34  ;;  %452 = vst [vmem:[%s6373_s24 + $0x518] sm:$0xff] %v451_v35  ;;  %v455_v37 = vld [vmem:[%s6368_s23 + $0x1428] sm:$0xff]  ;;  %v457_v38 = vld [vmem:[%s6368_s23 + $0x1430] sm:$0xff] }
  0x67   : > { %454 = vst [vmem:[%s6373_s24 + $0x520] sm:$0xff] %v453_v36  ;;  %v459_v39 = vld [vmem:[%s6368_s23 + $0x1438] sm:$0xff]  ;;  %456 = vst [vmem:[%s6373_s24 + $0x528] sm:$0xff] %v455_v37  ;;  %v461_v40 = vld [vmem:[%s6368_s23 + $0x1500] sm:$0xff] }
  0x68   : > { %458 = vst [vmem:[%s6373_s24 + $0x530] sm:$0xff] %v457_v38  ;;  %460 = vst [vmem:[%s6373_s24 + $0x538] sm:$0xff] %v459_v39  ;;  %v463_v41 = vld [vmem:[%s6368_s23 + $0x1508] sm:$0xff]  ;;  %v465_v42 = vld [vmem:[%s6368_s23 + $0x1510] sm:$0xff] }
  0x69   : > { %462 = vst [vmem:[%s6373_s24 + $0x540] sm:$0xff] %v461_v40  ;;  %464 = vst [vmem:[%s6373_s24 + $0x548] sm:$0xff] %v463_v41  ;;  %v467_v43 = vld [vmem:[%s6368_s23 + $0x1518] sm:$0xff]  ;;  %v469_v44 = vld [vmem:[%s6368_s23 + $0x1520] sm:$0xff] }
  0x6a   : > { %466 = vst [vmem:[%s6373_s24 + $0x550] sm:$0xff] %v465_v42  ;;  %v471_v45 = vld [vmem:[%s6368_s23 + $0x1528] sm:$0xff]  ;;  %468 = vst [vmem:[%s6373_s24 + $0x558] sm:$0xff] %v467_v43  ;;  %v473_v46 = vld [vmem:[%s6368_s23 + $0x1530] sm:$0xff] }
  0x6b   : > { %470 = vst [vmem:[%s6373_s24 + $0x560] sm:$0xff] %v469_v44  ;;  %472 = vst [vmem:[%s6373_s24 + $0x568] sm:$0xff] %v471_v45  ;;  %v475_v47 = vld [vmem:[%s6368_s23 + $0x1538] sm:$0xff]  ;;  %v477_v48 = vld [vmem:[%s6368_s23 + $0x1600] sm:$0xff] }
  0x6c   : > { %474 = vst [vmem:[%s6373_s24 + $0x570] sm:$0xff] %v473_v46  ;;  %476 = vst [vmem:[%s6373_s24 + $0x578] sm:$0xff] %v475_v47  ;;  %v479_v49 = vld [vmem:[%s6368_s23 + $0x1608] sm:$0xff]  ;;  %v481_v50 = vld [vmem:[%s6368_s23 + $0x1610] sm:$0xff] }
  0x6d   : > { %478 = vst [vmem:[%s6373_s24 + $0x580] sm:$0xff] %v477_v48  ;;  %v483_v51 = vld [vmem:[%s6368_s23 + $0x1618] sm:$0xff]  ;;  %480 = vst [vmem:[%s6373_s24 + $0x588] sm:$0xff] %v479_v49  ;;  %v485_v52 = vld [vmem:[%s6368_s23 + $0x1620] sm:$0xff] }
  0x6e   : > { %482 = vst [vmem:[%s6373_s24 + $0x590] sm:$0xff] %v481_v50  ;;  %484 = vst [vmem:[%s6373_s24 + $0x598] sm:$0xff] %v483_v51  ;;  %v487_v53 = vld [vmem:[%s6368_s23 + $0x1628] sm:$0xff]  ;;  %v489_v54 = vld [vmem:[%s6368_s23 + $0x1630] sm:$0xff] }
  0x6f   : > { %486 = vst [vmem:[%s6373_s24 + $0x5a0] sm:$0xff] %v485_v52  ;;  %488 = vst [vmem:[%s6373_s24 + $0x5a8] sm:$0xff] %v487_v53  ;;  %v491_v55 = vld [vmem:[%s6368_s23 + $0x1638] sm:$0xff]  ;;  %v493_v56 = vld [vmem:[%s6368_s23 + $0x1700] sm:$0xff] }
  0x70   : > { %490 = vst [vmem:[%s6373_s24 + $0x5b0] sm:$0xff] %v489_v54  ;;  %v495_v57 = vld [vmem:[%s6368_s23 + $0x1708] sm:$0xff]  ;;  %492 = vst [vmem:[%s6373_s24 + $0x5b8] sm:$0xff] %v491_v55  ;;  %v497_v58 = vld [vmem:[%s6368_s23 + $0x1710] sm:$0xff] }
  0x71   : > { %494 = vst [vmem:[%s6373_s24 + $0x5c0] sm:$0xff] %v493_v56  ;;  %496 = vst [vmem:[%s6373_s24 + $0x5c8] sm:$0xff] %v495_v57  ;;  %v499_v59 = vld [vmem:[%s6368_s23 + $0x1718] sm:$0xff]  ;;  %v501_v60 = vld [vmem:[%s6368_s23 + $0x1720] sm:$0xff] }
  0x72   : > { %498 = vst [vmem:[%s6373_s24 + $0x5d0] sm:$0xff] %v497_v58  ;;  %500 = vst [vmem:[%s6373_s24 + $0x5d8] sm:$0xff] %v499_v59  ;;  %v503_v61 = vld [vmem:[%s6368_s23 + $0x1728] sm:$0xff]  ;;  %v505_v62 = vld [vmem:[%s6368_s23 + $0x1730] sm:$0xff] }
  0x73   : > { %502 = vst [vmem:[%s6373_s24 + $0x5e0] sm:$0xff] %v501_v60  ;;  %v507_v63 = vld [vmem:[%s6368_s23 + $0x1738] sm:$0xff]  ;;  %504 = vst [vmem:[%s6373_s24 + $0x5e8] sm:$0xff] %v503_v61  ;;  %v509_v0 = vld [vmem:[%s6368_s23 + $0x1800] sm:$0xff] }
  0x74   : > { %506 = vst [vmem:[%s6373_s24 + $0x5f0] sm:$0xff] %v505_v62  ;;  %508 = vst [vmem:[%s6373_s24 + $0x5f8] sm:$0xff] %v507_v63  ;;  %v511_v1 = vld [vmem:[%s6368_s23 + $0x1808] sm:$0xff]  ;;  %v513_v2 = vld [vmem:[%s6368_s23 + $0x1810] sm:$0xff] }
  0x75   : > { %510 = vst [vmem:[%s6373_s24 + $0x600] sm:$0xff] %v509_v0  ;;  %512 = vst [vmem:[%s6373_s24 + $0x608] sm:$0xff] %v511_v1  ;;  %v515_v3 = vld [vmem:[%s6368_s23 + $0x1818] sm:$0xff]  ;;  %v517_v4 = vld [vmem:[%s6368_s23 + $0x1820] sm:$0xff] }
  0x76   : > { %514 = vst [vmem:[%s6373_s24 + $0x610] sm:$0xff] %v513_v2  ;;  %v519_v5 = vld [vmem:[%s6368_s23 + $0x1828] sm:$0xff]  ;;  %516 = vst [vmem:[%s6373_s24 + $0x618] sm:$0xff] %v515_v3  ;;  %v521_v6 = vld [vmem:[%s6368_s23 + $0x1830] sm:$0xff] }
  0x77   : > { %518 = vst [vmem:[%s6373_s24 + $0x620] sm:$0xff] %v517_v4  ;;  %520 = vst [vmem:[%s6373_s24 + $0x628] sm:$0xff] %v519_v5  ;;  %v523_v7 = vld [vmem:[%s6368_s23 + $0x1838] sm:$0xff]  ;;  %v525_v8 = vld [vmem:[%s6368_s23 + $0x1900] sm:$0xff] }
  0x78   : > { %522 = vst [vmem:[%s6373_s24 + $0x630] sm:$0xff] %v521_v6  ;;  %524 = vst [vmem:[%s6373_s24 + $0x638] sm:$0xff] %v523_v7  ;;  %v527_v9 = vld [vmem:[%s6368_s23 + $0x1908] sm:$0xff]  ;;  %v529_v10 = vld [vmem:[%s6368_s23 + $0x1910] sm:$0xff] }
  0x79   : > { %526 = vst [vmem:[%s6373_s24 + $0x640] sm:$0xff] %v525_v8  ;;  %v531_v11 = vld [vmem:[%s6368_s23 + $0x1918] sm:$0xff]  ;;  %528 = vst [vmem:[%s6373_s24 + $0x648] sm:$0xff] %v527_v9  ;;  %v533_v12 = vld [vmem:[%s6368_s23 + $0x1920] sm:$0xff] }
  0x7a   : > { %530 = vst [vmem:[%s6373_s24 + $0x650] sm:$0xff] %v529_v10  ;;  %532 = vst [vmem:[%s6373_s24 + $0x658] sm:$0xff] %v531_v11  ;;  %v535_v13 = vld [vmem:[%s6368_s23 + $0x1928] sm:$0xff]  ;;  %v537_v14 = vld [vmem:[%s6368_s23 + $0x1930] sm:$0xff] }
  0x7b   : > { %534 = vst [vmem:[%s6373_s24 + $0x660] sm:$0xff] %v533_v12  ;;  %536 = vst [vmem:[%s6373_s24 + $0x668] sm:$0xff] %v535_v13  ;;  %v539_v15 = vld [vmem:[%s6368_s23 + $0x1938] sm:$0xff]  ;;  %v541_v16 = vld [vmem:[%s6368_s23 + $0x1a00] sm:$0xff] }
  0x7c   : > { %538 = vst [vmem:[%s6373_s24 + $0x670] sm:$0xff] %v537_v14  ;;  %v543_v17 = vld [vmem:[%s6368_s23 + $0x1a08] sm:$0xff]  ;;  %540 = vst [vmem:[%s6373_s24 + $0x678] sm:$0xff] %v539_v15  ;;  %v545_v18 = vld [vmem:[%s6368_s23 + $0x1a10] sm:$0xff] }
  0x7d   : > { %542 = vst [vmem:[%s6373_s24 + $0x680] sm:$0xff] %v541_v16  ;;  %544 = vst [vmem:[%s6373_s24 + $0x688] sm:$0xff] %v543_v17  ;;  %v547_v19 = vld [vmem:[%s6368_s23 + $0x1a18] sm:$0xff]  ;;  %v549_v20 = vld [vmem:[%s6368_s23 + $0x1a20] sm:$0xff] }
  0x7e   : > { %546 = vst [vmem:[%s6373_s24 + $0x690] sm:$0xff] %v545_v18  ;;  %548 = vst [vmem:[%s6373_s24 + $0x698] sm:$0xff] %v547_v19  ;;  %v551_v21 = vld [vmem:[%s6368_s23 + $0x1a28] sm:$0xff]  ;;  %v553_v22 = vld [vmem:[%s6368_s23 + $0x1a30] sm:$0xff] }
  0x7f   : > { %550 = vst [vmem:[%s6373_s24 + $0x6a0] sm:$0xff] %v549_v20  ;;  %v555_v23 = vld [vmem:[%s6368_s23 + $0x1a38] sm:$0xff]  ;;  %552 = vst [vmem:[%s6373_s24 + $0x6a8] sm:$0xff] %v551_v21  ;;  %v557_v24 = vld [vmem:[%s6368_s23 + $0x1b00] sm:$0xff] }
  0x80   : > { %554 = vst [vmem:[%s6373_s24 + $0x6b0] sm:$0xff] %v553_v22  ;;  %556 = vst [vmem:[%s6373_s24 + $0x6b8] sm:$0xff] %v555_v23  ;;  %v559_v25 = vld [vmem:[%s6368_s23 + $0x1b08] sm:$0xff]  ;;  %v561_v26 = vld [vmem:[%s6368_s23 + $0x1b10] sm:$0xff] }
  0x81   : > { %558 = vst [vmem:[%s6373_s24 + $0x6c0] sm:$0xff] %v557_v24  ;;  %560 = vst [vmem:[%s6373_s24 + $0x6c8] sm:$0xff] %v559_v25  ;;  %v563_v27 = vld [vmem:[%s6368_s23 + $0x1b18] sm:$0xff]  ;;  %v565_v28 = vld [vmem:[%s6368_s23 + $0x1b20] sm:$0xff] }
  0x82   : > { %562 = vst [vmem:[%s6373_s24 + $0x6d0] sm:$0xff] %v561_v26  ;;  %v567_v29 = vld [vmem:[%s6368_s23 + $0x1b28] sm:$0xff]  ;;  %564 = vst [vmem:[%s6373_s24 + $0x6d8] sm:$0xff] %v563_v27  ;;  %v569_v30 = vld [vmem:[%s6368_s23 + $0x1b30] sm:$0xff] }
  0x83   : > { %566 = vst [vmem:[%s6373_s24 + $0x6e0] sm:$0xff] %v565_v28  ;;  %568 = vst [vmem:[%s6373_s24 + $0x6e8] sm:$0xff] %v567_v29  ;;  %v571_v31 = vld [vmem:[%s6368_s23 + $0x1b38] sm:$0xff]  ;;  %v573_v32 = vld [vmem:[%s6368_s23 + $0x1c00] sm:$0xff] }
  0x84   : > { %570 = vst [vmem:[%s6373_s24 + $0x6f0] sm:$0xff] %v569_v30  ;;  %572 = vst [vmem:[%s6373_s24 + $0x6f8] sm:$0xff] %v571_v31  ;;  %v575_v33 = vld [vmem:[%s6368_s23 + $0x1c08] sm:$0xff]  ;;  %v577_v34 = vld [vmem:[%s6368_s23 + $0x1c10] sm:$0xff] }
  0x85   : > { %574 = vst [vmem:[%s6373_s24 + $0x700] sm:$0xff] %v573_v32  ;;  %v579_v35 = vld [vmem:[%s6368_s23 + $0x1c18] sm:$0xff]  ;;  %576 = vst [vmem:[%s6373_s24 + $0x708] sm:$0xff] %v575_v33  ;;  %v581_v36 = vld [vmem:[%s6368_s23 + $0x1c20] sm:$0xff] }
  0x86   : > { %578 = vst [vmem:[%s6373_s24 + $0x710] sm:$0xff] %v577_v34  ;;  %580 = vst [vmem:[%s6373_s24 + $0x718] sm:$0xff] %v579_v35  ;;  %v583_v37 = vld [vmem:[%s6368_s23 + $0x1c28] sm:$0xff]  ;;  %v585_v38 = vld [vmem:[%s6368_s23 + $0x1c30] sm:$0xff] }
  0x87   : > { %582 = vst [vmem:[%s6373_s24 + $0x720] sm:$0xff] %v581_v36  ;;  %584 = vst [vmem:[%s6373_s24 + $0x728] sm:$0xff] %v583_v37  ;;  %v587_v39 = vld [vmem:[%s6368_s23 + $0x1c38] sm:$0xff]  ;;  %v589_v40 = vld [vmem:[%s6368_s23 + $0x1d00] sm:$0xff] }
  0x88   : > { %586 = vst [vmem:[%s6373_s24 + $0x730] sm:$0xff] %v585_v38  ;;  %v591_v41 = vld [vmem:[%s6368_s23 + $0x1d08] sm:$0xff]  ;;  %588 = vst [vmem:[%s6373_s24 + $0x738] sm:$0xff] %v587_v39  ;;  %v593_v42 = vld [vmem:[%s6368_s23 + $0x1d10] sm:$0xff] }
  0x89   : > { %590 = vst [vmem:[%s6373_s24 + $0x740] sm:$0xff] %v589_v40  ;;  %592 = vst [vmem:[%s6373_s24 + $0x748] sm:$0xff] %v591_v41  ;;  %v595_v43 = vld [vmem:[%s6368_s23 + $0x1d18] sm:$0xff]  ;;  %v597_v44 = vld [vmem:[%s6368_s23 + $0x1d20] sm:$0xff] }
  0x8a   : > { %594 = vst [vmem:[%s6373_s24 + $0x750] sm:$0xff] %v593_v42  ;;  %596 = vst [vmem:[%s6373_s24 + $0x758] sm:$0xff] %v595_v43  ;;  %v599_v45 = vld [vmem:[%s6368_s23 + $0x1d28] sm:$0xff]  ;;  %v601_v46 = vld [vmem:[%s6368_s23 + $0x1d30] sm:$0xff] }
  0x8b   : > { %598 = vst [vmem:[%s6373_s24 + $0x760] sm:$0xff] %v597_v44  ;;  %v603_v47 = vld [vmem:[%s6368_s23 + $0x1d38] sm:$0xff]  ;;  %600 = vst [vmem:[%s6373_s24 + $0x768] sm:$0xff] %v599_v45  ;;  %v605_v48 = vld [vmem:[%s6368_s23 + $0x1e00] sm:$0xff] }
  0x8c   : > { %602 = vst [vmem:[%s6373_s24 + $0x770] sm:$0xff] %v601_v46  ;;  %604 = vst [vmem:[%s6373_s24 + $0x778] sm:$0xff] %v603_v47  ;;  %v607_v49 = vld [vmem:[%s6368_s23 + $0x1e08] sm:$0xff]  ;;  %v609_v50 = vld [vmem:[%s6368_s23 + $0x1e10] sm:$0xff] }
  0x8d   : > { %606 = vst [vmem:[%s6373_s24 + $0x780] sm:$0xff] %v605_v48  ;;  %608 = vst [vmem:[%s6373_s24 + $0x788] sm:$0xff] %v607_v49  ;;  %v611_v51 = vld [vmem:[%s6368_s23 + $0x1e18] sm:$0xff]  ;;  %v613_v52 = vld [vmem:[%s6368_s23 + $0x1e20] sm:$0xff] }
  0x8e   : > { %610 = vst [vmem:[%s6373_s24 + $0x790] sm:$0xff] %v609_v50  ;;  %v615_v53 = vld [vmem:[%s6368_s23 + $0x1e28] sm:$0xff]  ;;  %612 = vst [vmem:[%s6373_s24 + $0x798] sm:$0xff] %v611_v51  ;;  %v617_v54 = vld [vmem:[%s6368_s23 + $0x1e30] sm:$0xff] }
  0x8f   : > { %614 = vst [vmem:[%s6373_s24 + $0x7a0] sm:$0xff] %v613_v52  ;;  %616 = vst [vmem:[%s6373_s24 + $0x7a8] sm:$0xff] %v615_v53  ;;  %v619_v55 = vld [vmem:[%s6368_s23 + $0x1e38] sm:$0xff]  ;;  %v621_v56 = vld [vmem:[%s6368_s23 + $0x1f00] sm:$0xff] }
  0x90   : > { %618 = vst [vmem:[%s6373_s24 + $0x7b0] sm:$0xff] %v617_v54  ;;  %620 = vst [vmem:[%s6373_s24 + $0x7b8] sm:$0xff] %v619_v55  ;;  %v623_v57 = vld [vmem:[%s6368_s23 + $0x1f08] sm:$0xff]  ;;  %v625_v58 = vld [vmem:[%s6368_s23 + $0x1f10] sm:$0xff] }
  0x91   : > { %622 = vst [vmem:[%s6373_s24 + $0x7c0] sm:$0xff] %v621_v56  ;;  %v627_v59 = vld [vmem:[%s6368_s23 + $0x1f18] sm:$0xff]  ;;  %624 = vst [vmem:[%s6373_s24 + $0x7c8] sm:$0xff] %v623_v57  ;;  %v629_v60 = vld [vmem:[%s6368_s23 + $0x1f20] sm:$0xff] }
  0x92   : > { %626 = vst [vmem:[%s6373_s24 + $0x7d0] sm:$0xff] %v625_v58  ;;  %628 = vst [vmem:[%s6373_s24 + $0x7d8] sm:$0xff] %v627_v59  ;;  %v631_v61 = vld [vmem:[%s6368_s23 + $0x1f28] sm:$0xff]  ;;  %v633_v62 = vld [vmem:[%s6368_s23 + $0x1f30] sm:$0xff] }
  0x93   : > { %630 = vst [vmem:[%s6373_s24 + $0x7e0] sm:$0xff] %v629_v60  ;;  %632 = vst [vmem:[%s6373_s24 + $0x7e8] sm:$0xff] %v631_v61  ;;  %v635_v63 = vld [vmem:[%s6368_s23 + $0x1f38] sm:$0xff]  ;;  %v637_v0 = vld [vmem:[%s6368_s23 + $0x2000] sm:$0xff] }
  0x94   : > { %634 = vst [vmem:[%s6373_s24 + $0x7f0] sm:$0xff] %v633_v62  ;;  %v639_v1 = vld [vmem:[%s6368_s23 + $0x2008] sm:$0xff]  ;;  %636 = vst [vmem:[%s6373_s24 + $0x7f8] sm:$0xff] %v635_v63  ;;  %v641_v2 = vld [vmem:[%s6368_s23 + $0x2010] sm:$0xff] }
  0x95   : > { %638 = vst [vmem:[%s6373_s24 + $0x800] sm:$0xff] %v637_v0  ;;  %640 = vst [vmem:[%s6373_s24 + $0x808] sm:$0xff] %v639_v1  ;;  %v643_v3 = vld [vmem:[%s6368_s23 + $0x2018] sm:$0xff]  ;;  %v645_v4 = vld [vmem:[%s6368_s23 + $0x2020] sm:$0xff] }
  0x96   : > { %642 = vst [vmem:[%s6373_s24 + $0x810] sm:$0xff] %v641_v2  ;;  %644 = vst [vmem:[%s6373_s24 + $0x818] sm:$0xff] %v643_v3  ;;  %v647_v5 = vld [vmem:[%s6368_s23 + $0x2028] sm:$0xff]  ;;  %v649_v6 = vld [vmem:[%s6368_s23 + $0x2030] sm:$0xff] }
  0x97   : > { %646 = vst [vmem:[%s6373_s24 + $0x820] sm:$0xff] %v645_v4  ;;  %v651_v7 = vld [vmem:[%s6368_s23 + $0x2038] sm:$0xff]  ;;  %648 = vst [vmem:[%s6373_s24 + $0x828] sm:$0xff] %v647_v5  ;;  %v653_v8 = vld [vmem:[%s6368_s23 + $0x2100] sm:$0xff] }
  0x98   : > { %650 = vst [vmem:[%s6373_s24 + $0x830] sm:$0xff] %v649_v6  ;;  %652 = vst [vmem:[%s6373_s24 + $0x838] sm:$0xff] %v651_v7  ;;  %v655_v9 = vld [vmem:[%s6368_s23 + $0x2108] sm:$0xff]  ;;  %v657_v10 = vld [vmem:[%s6368_s23 + $0x2110] sm:$0xff] }
  0x99   : > { %654 = vst [vmem:[%s6373_s24 + $0x840] sm:$0xff] %v653_v8  ;;  %656 = vst [vmem:[%s6373_s24 + $0x848] sm:$0xff] %v655_v9  ;;  %v659_v11 = vld [vmem:[%s6368_s23 + $0x2118] sm:$0xff]  ;;  %v661_v12 = vld [vmem:[%s6368_s23 + $0x2120] sm:$0xff] }
  0x9a   : > { %658 = vst [vmem:[%s6373_s24 + $0x850] sm:$0xff] %v657_v10  ;;  %v663_v13 = vld [vmem:[%s6368_s23 + $0x2128] sm:$0xff]  ;;  %660 = vst [vmem:[%s6373_s24 + $0x858] sm:$0xff] %v659_v11  ;;  %v665_v14 = vld [vmem:[%s6368_s23 + $0x2130] sm:$0xff] }
  0x9b   : > { %662 = vst [vmem:[%s6373_s24 + $0x860] sm:$0xff] %v661_v12  ;;  %664 = vst [vmem:[%s6373_s24 + $0x868] sm:$0xff] %v663_v13  ;;  %v667_v15 = vld [vmem:[%s6368_s23 + $0x2138] sm:$0xff]  ;;  %v669_v16 = vld [vmem:[%s6368_s23 + $0x2200] sm:$0xff] }
  0x9c   : > { %666 = vst [vmem:[%s6373_s24 + $0x870] sm:$0xff] %v665_v14  ;;  %668 = vst [vmem:[%s6373_s24 + $0x878] sm:$0xff] %v667_v15  ;;  %v671_v17 = vld [vmem:[%s6368_s23 + $0x2208] sm:$0xff]  ;;  %v673_v18 = vld [vmem:[%s6368_s23 + $0x2210] sm:$0xff] }
  0x9d   : > { %670 = vst [vmem:[%s6373_s24 + $0x880] sm:$0xff] %v669_v16  ;;  %v675_v19 = vld [vmem:[%s6368_s23 + $0x2218] sm:$0xff]  ;;  %672 = vst [vmem:[%s6373_s24 + $0x888] sm:$0xff] %v671_v17  ;;  %v677_v20 = vld [vmem:[%s6368_s23 + $0x2220] sm:$0xff] }
  0x9e   : > { %674 = vst [vmem:[%s6373_s24 + $0x890] sm:$0xff] %v673_v18  ;;  %676 = vst [vmem:[%s6373_s24 + $0x898] sm:$0xff] %v675_v19  ;;  %v679_v21 = vld [vmem:[%s6368_s23 + $0x2228] sm:$0xff]  ;;  %v681_v22 = vld [vmem:[%s6368_s23 + $0x2230] sm:$0xff] }
  0x9f   : > { %678 = vst [vmem:[%s6373_s24 + $0x8a0] sm:$0xff] %v677_v20  ;;  %680 = vst [vmem:[%s6373_s24 + $0x8a8] sm:$0xff] %v679_v21  ;;  %v683_v23 = vld [vmem:[%s6368_s23 + $0x2238] sm:$0xff]  ;;  %v685_v24 = vld [vmem:[%s6368_s23 + $0x2300] sm:$0xff] }
  0xa0   : > { %682 = vst [vmem:[%s6373_s24 + $0x8b0] sm:$0xff] %v681_v22  ;;  %v687_v25 = vld [vmem:[%s6368_s23 + $0x2308] sm:$0xff]  ;;  %684 = vst [vmem:[%s6373_s24 + $0x8b8] sm:$0xff] %v683_v23  ;;  %v689_v26 = vld [vmem:[%s6368_s23 + $0x2310] sm:$0xff] }
  0xa1   : > { %686 = vst [vmem:[%s6373_s24 + $0x8c0] sm:$0xff] %v685_v24  ;;  %688 = vst [vmem:[%s6373_s24 + $0x8c8] sm:$0xff] %v687_v25  ;;  %v691_v27 = vld [vmem:[%s6368_s23 + $0x2318] sm:$0xff]  ;;  %v693_v28 = vld [vmem:[%s6368_s23 + $0x2320] sm:$0xff] }
  0xa2   : > { %690 = vst [vmem:[%s6373_s24 + $0x8d0] sm:$0xff] %v689_v26  ;;  %692 = vst [vmem:[%s6373_s24 + $0x8d8] sm:$0xff] %v691_v27  ;;  %v695_v29 = vld [vmem:[%s6368_s23 + $0x2328] sm:$0xff]  ;;  %v697_v30 = vld [vmem:[%s6368_s23 + $0x2330] sm:$0xff] }
  0xa3   : > { %694 = vst [vmem:[%s6373_s24 + $0x8e0] sm:$0xff] %v693_v28  ;;  %v699_v31 = vld [vmem:[%s6368_s23 + $0x2338] sm:$0xff]  ;;  %696 = vst [vmem:[%s6373_s24 + $0x8e8] sm:$0xff] %v695_v29  ;;  %v701_v32 = vld [vmem:[%s6368_s23 + $0x2400] sm:$0xff] }
  0xa4   : > { %698 = vst [vmem:[%s6373_s24 + $0x8f0] sm:$0xff] %v697_v30  ;;  %700 = vst [vmem:[%s6373_s24 + $0x8f8] sm:$0xff] %v699_v31  ;;  %v703_v33 = vld [vmem:[%s6368_s23 + $0x2408] sm:$0xff]  ;;  %v705_v34 = vld [vmem:[%s6368_s23 + $0x2410] sm:$0xff] }
  0xa5   : > { %702 = vst [vmem:[%s6373_s24 + $0x900] sm:$0xff] %v701_v32  ;;  %704 = vst [vmem:[%s6373_s24 + $0x908] sm:$0xff] %v703_v33  ;;  %v707_v35 = vld [vmem:[%s6368_s23 + $0x2418] sm:$0xff]  ;;  %v709_v36 = vld [vmem:[%s6368_s23 + $0x2420] sm:$0xff] }
  0xa6   : > { %706 = vst [vmem:[%s6373_s24 + $0x910] sm:$0xff] %v705_v34  ;;  %v711_v37 = vld [vmem:[%s6368_s23 + $0x2428] sm:$0xff]  ;;  %708 = vst [vmem:[%s6373_s24 + $0x918] sm:$0xff] %v707_v35  ;;  %v713_v38 = vld [vmem:[%s6368_s23 + $0x2430] sm:$0xff] }
  0xa7   : > { %710 = vst [vmem:[%s6373_s24 + $0x920] sm:$0xff] %v709_v36  ;;  %712 = vst [vmem:[%s6373_s24 + $0x928] sm:$0xff] %v711_v37  ;;  %v715_v39 = vld [vmem:[%s6368_s23 + $0x2438] sm:$0xff]  ;;  %v717_v40 = vld [vmem:[%s6368_s23 + $0x2500] sm:$0xff] }
  0xa8   : > { %714 = vst [vmem:[%s6373_s24 + $0x930] sm:$0xff] %v713_v38  ;;  %716 = vst [vmem:[%s6373_s24 + $0x938] sm:$0xff] %v715_v39  ;;  %v719_v41 = vld [vmem:[%s6368_s23 + $0x2508] sm:$0xff]  ;;  %v721_v42 = vld [vmem:[%s6368_s23 + $0x2510] sm:$0xff] }
  0xa9   : > { %718 = vst [vmem:[%s6373_s24 + $0x940] sm:$0xff] %v717_v40  ;;  %v723_v43 = vld [vmem:[%s6368_s23 + $0x2518] sm:$0xff]  ;;  %720 = vst [vmem:[%s6373_s24 + $0x948] sm:$0xff] %v719_v41  ;;  %v725_v44 = vld [vmem:[%s6368_s23 + $0x2520] sm:$0xff] }
  0xaa   : > { %722 = vst [vmem:[%s6373_s24 + $0x950] sm:$0xff] %v721_v42  ;;  %724 = vst [vmem:[%s6373_s24 + $0x958] sm:$0xff] %v723_v43  ;;  %v727_v45 = vld [vmem:[%s6368_s23 + $0x2528] sm:$0xff]  ;;  %v729_v46 = vld [vmem:[%s6368_s23 + $0x2530] sm:$0xff] }
  0xab   : > { %726 = vst [vmem:[%s6373_s24 + $0x960] sm:$0xff] %v725_v44  ;;  %728 = vst [vmem:[%s6373_s24 + $0x968] sm:$0xff] %v727_v45  ;;  %v731_v47 = vld [vmem:[%s6368_s23 + $0x2538] sm:$0xff]  ;;  %v733_v48 = vld [vmem:[%s6368_s23 + $0x2600] sm:$0xff] }
  0xac   : > { %730 = vst [vmem:[%s6373_s24 + $0x970] sm:$0xff] %v729_v46  ;;  %v735_v49 = vld [vmem:[%s6368_s23 + $0x2608] sm:$0xff]  ;;  %732 = vst [vmem:[%s6373_s24 + $0x978] sm:$0xff] %v731_v47  ;;  %v737_v50 = vld [vmem:[%s6368_s23 + $0x2610] sm:$0xff] }
  0xad   : > { %734 = vst [vmem:[%s6373_s24 + $0x980] sm:$0xff] %v733_v48  ;;  %736 = vst [vmem:[%s6373_s24 + $0x988] sm:$0xff] %v735_v49  ;;  %v739_v51 = vld [vmem:[%s6368_s23 + $0x2618] sm:$0xff]  ;;  %v741_v52 = vld [vmem:[%s6368_s23 + $0x2620] sm:$0xff] }
  0xae   : > { %738 = vst [vmem:[%s6373_s24 + $0x990] sm:$0xff] %v737_v50  ;;  %740 = vst [vmem:[%s6373_s24 + $0x998] sm:$0xff] %v739_v51  ;;  %v743_v53 = vld [vmem:[%s6368_s23 + $0x2628] sm:$0xff]  ;;  %v745_v54 = vld [vmem:[%s6368_s23 + $0x2630] sm:$0xff] }
  0xaf   : > { %742 = vst [vmem:[%s6373_s24 + $0x9a0] sm:$0xff] %v741_v52  ;;  %v747_v55 = vld [vmem:[%s6368_s23 + $0x2638] sm:$0xff]  ;;  %744 = vst [vmem:[%s6373_s24 + $0x9a8] sm:$0xff] %v743_v53  ;;  %v749_v56 = vld [vmem:[%s6368_s23 + $0x2700] sm:$0xff] }
  0xb0   : > { %746 = vst [vmem:[%s6373_s24 + $0x9b0] sm:$0xff] %v745_v54  ;;  %748 = vst [vmem:[%s6373_s24 + $0x9b8] sm:$0xff] %v747_v55  ;;  %v751_v57 = vld [vmem:[%s6368_s23 + $0x2708] sm:$0xff]  ;;  %v753_v58 = vld [vmem:[%s6368_s23 + $0x2710] sm:$0xff] }
  0xb1   : > { %750 = vst [vmem:[%s6373_s24 + $0x9c0] sm:$0xff] %v749_v56  ;;  %752 = vst [vmem:[%s6373_s24 + $0x9c8] sm:$0xff] %v751_v57  ;;  %v755_v59 = vld [vmem:[%s6368_s23 + $0x2718] sm:$0xff]  ;;  %v757_v60 = vld [vmem:[%s6368_s23 + $0x2720] sm:$0xff] }
  0xb2   : > { %754 = vst [vmem:[%s6373_s24 + $0x9d0] sm:$0xff] %v753_v58  ;;  %v759_v61 = vld [vmem:[%s6368_s23 + $0x2728] sm:$0xff]  ;;  %756 = vst [vmem:[%s6373_s24 + $0x9d8] sm:$0xff] %v755_v59  ;;  %v761_v62 = vld [vmem:[%s6368_s23 + $0x2730] sm:$0xff] }
  0xb3   : > { %758 = vst [vmem:[%s6373_s24 + $0x9e0] sm:$0xff] %v757_v60  ;;  %760 = vst [vmem:[%s6373_s24 + $0x9e8] sm:$0xff] %v759_v61  ;;  %v763_v63 = vld [vmem:[%s6368_s23 + $0x2738] sm:$0xff]  ;;  %v765_v0 = vld [vmem:[%s6368_s23 + $0x2800] sm:$0xff] }
  0xb4   : > { %762 = vst [vmem:[%s6373_s24 + $0x9f0] sm:$0xff] %v761_v62  ;;  %764 = vst [vmem:[%s6373_s24 + $0x9f8] sm:$0xff] %v763_v63  ;;  %v767_v1 = vld [vmem:[%s6368_s23 + $0x2808] sm:$0xff]  ;;  %v769_v2 = vld [vmem:[%s6368_s23 + $0x2810] sm:$0xff] }
  0xb5   : > { %766 = vst [vmem:[%s6373_s24 + $0xa00] sm:$0xff] %v765_v0  ;;  %v771_v3 = vld [vmem:[%s6368_s23 + $0x2818] sm:$0xff]  ;;  %768 = vst [vmem:[%s6373_s24 + $0xa08] sm:$0xff] %v767_v1  ;;  %v773_v4 = vld [vmem:[%s6368_s23 + $0x2820] sm:$0xff] }
  0xb6   : > { %770 = vst [vmem:[%s6373_s24 + $0xa10] sm:$0xff] %v769_v2  ;;  %772 = vst [vmem:[%s6373_s24 + $0xa18] sm:$0xff] %v771_v3  ;;  %v775_v5 = vld [vmem:[%s6368_s23 + $0x2828] sm:$0xff]  ;;  %v777_v6 = vld [vmem:[%s6368_s23 + $0x2830] sm:$0xff] }
  0xb7   : > { %774 = vst [vmem:[%s6373_s24 + $0xa20] sm:$0xff] %v773_v4  ;;  %776 = vst [vmem:[%s6373_s24 + $0xa28] sm:$0xff] %v775_v5  ;;  %v779_v7 = vld [vmem:[%s6368_s23 + $0x2838] sm:$0xff]  ;;  %v781_v8 = vld [vmem:[%s6368_s23 + $0x2900] sm:$0xff] }
  0xb8   : > { %778 = vst [vmem:[%s6373_s24 + $0xa30] sm:$0xff] %v777_v6  ;;  %v783_v9 = vld [vmem:[%s6368_s23 + $0x2908] sm:$0xff]  ;;  %780 = vst [vmem:[%s6373_s24 + $0xa38] sm:$0xff] %v779_v7  ;;  %v785_v10 = vld [vmem:[%s6368_s23 + $0x2910] sm:$0xff] }
  0xb9   : > { %782 = vst [vmem:[%s6373_s24 + $0xa40] sm:$0xff] %v781_v8  ;;  %784 = vst [vmem:[%s6373_s24 + $0xa48] sm:$0xff] %v783_v9  ;;  %v787_v11 = vld [vmem:[%s6368_s23 + $0x2918] sm:$0xff]  ;;  %v789_v12 = vld [vmem:[%s6368_s23 + $0x2920] sm:$0xff] }
  0xba   : > { %786 = vst [vmem:[%s6373_s24 + $0xa50] sm:$0xff] %v785_v10  ;;  %788 = vst [vmem:[%s6373_s24 + $0xa58] sm:$0xff] %v787_v11  ;;  %v791_v13 = vld [vmem:[%s6368_s23 + $0x2928] sm:$0xff]  ;;  %v793_v14 = vld [vmem:[%s6368_s23 + $0x2930] sm:$0xff] }
  0xbb   : > { %790 = vst [vmem:[%s6373_s24 + $0xa60] sm:$0xff] %v789_v12  ;;  %v795_v15 = vld [vmem:[%s6368_s23 + $0x2938] sm:$0xff]  ;;  %792 = vst [vmem:[%s6373_s24 + $0xa68] sm:$0xff] %v791_v13  ;;  %v797_v16 = vld [vmem:[%s6368_s23 + $0x2a00] sm:$0xff] }
  0xbc   : > { %794 = vst [vmem:[%s6373_s24 + $0xa70] sm:$0xff] %v793_v14  ;;  %796 = vst [vmem:[%s6373_s24 + $0xa78] sm:$0xff] %v795_v15  ;;  %v799_v17 = vld [vmem:[%s6368_s23 + $0x2a08] sm:$0xff]  ;;  %v801_v18 = vld [vmem:[%s6368_s23 + $0x2a10] sm:$0xff] }
  0xbd   : > { %798 = vst [vmem:[%s6373_s24 + $0xa80] sm:$0xff] %v797_v16  ;;  %800 = vst [vmem:[%s6373_s24 + $0xa88] sm:$0xff] %v799_v17  ;;  %v803_v19 = vld [vmem:[%s6368_s23 + $0x2a18] sm:$0xff]  ;;  %v805_v20 = vld [vmem:[%s6368_s23 + $0x2a20] sm:$0xff] }
  0xbe   : > { %802 = vst [vmem:[%s6373_s24 + $0xa90] sm:$0xff] %v801_v18  ;;  %v807_v21 = vld [vmem:[%s6368_s23 + $0x2a28] sm:$0xff]  ;;  %804 = vst [vmem:[%s6373_s24 + $0xa98] sm:$0xff] %v803_v19  ;;  %v809_v22 = vld [vmem:[%s6368_s23 + $0x2a30] sm:$0xff] }
  0xbf   : > { %806 = vst [vmem:[%s6373_s24 + $0xaa0] sm:$0xff] %v805_v20  ;;  %808 = vst [vmem:[%s6373_s24 + $0xaa8] sm:$0xff] %v807_v21  ;;  %v811_v23 = vld [vmem:[%s6368_s23 + $0x2a38] sm:$0xff]  ;;  %v813_v24 = vld [vmem:[%s6368_s23 + $0x2b00] sm:$0xff] }
  0xc0   : > { %810 = vst [vmem:[%s6373_s24 + $0xab0] sm:$0xff] %v809_v22  ;;  %812 = vst [vmem:[%s6373_s24 + $0xab8] sm:$0xff] %v811_v23  ;;  %v815_v25 = vld [vmem:[%s6368_s23 + $0x2b08] sm:$0xff]  ;;  %v817_v26 = vld [vmem:[%s6368_s23 + $0x2b10] sm:$0xff] }
  0xc1   : > { %814 = vst [vmem:[%s6373_s24 + $0xac0] sm:$0xff] %v813_v24  ;;  %v819_v27 = vld [vmem:[%s6368_s23 + $0x2b18] sm:$0xff]  ;;  %816 = vst [vmem:[%s6373_s24 + $0xac8] sm:$0xff] %v815_v25  ;;  %v821_v28 = vld [vmem:[%s6368_s23 + $0x2b20] sm:$0xff] }
  0xc2   : > { %818 = vst [vmem:[%s6373_s24 + $0xad0] sm:$0xff] %v817_v26  ;;  %820 = vst [vmem:[%s6373_s24 + $0xad8] sm:$0xff] %v819_v27  ;;  %v823_v29 = vld [vmem:[%s6368_s23 + $0x2b28] sm:$0xff]  ;;  %v825_v30 = vld [vmem:[%s6368_s23 + $0x2b30] sm:$0xff] }
  0xc3   : > { %822 = vst [vmem:[%s6373_s24 + $0xae0] sm:$0xff] %v821_v28  ;;  %824 = vst [vmem:[%s6373_s24 + $0xae8] sm:$0xff] %v823_v29  ;;  %v827_v31 = vld [vmem:[%s6368_s23 + $0x2b38] sm:$0xff]  ;;  %v829_v32 = vld [vmem:[%s6368_s23 + $0x2c00] sm:$0xff] }
  0xc4   : > { %826 = vst [vmem:[%s6373_s24 + $0xaf0] sm:$0xff] %v825_v30  ;;  %v831_v33 = vld [vmem:[%s6368_s23 + $0x2c08] sm:$0xff]  ;;  %828 = vst [vmem:[%s6373_s24 + $0xaf8] sm:$0xff] %v827_v31  ;;  %v833_v34 = vld [vmem:[%s6368_s23 + $0x2c10] sm:$0xff] }
  0xc5   : > { %830 = vst [vmem:[%s6373_s24 + $0xb00] sm:$0xff] %v829_v32  ;;  %832 = vst [vmem:[%s6373_s24 + $0xb08] sm:$0xff] %v831_v33  ;;  %v835_v35 = vld [vmem:[%s6368_s23 + $0x2c18] sm:$0xff]  ;;  %v837_v36 = vld [vmem:[%s6368_s23 + $0x2c20] sm:$0xff] }
  0xc6   : > { %834 = vst [vmem:[%s6373_s24 + $0xb10] sm:$0xff] %v833_v34  ;;  %836 = vst [vmem:[%s6373_s24 + $0xb18] sm:$0xff] %v835_v35  ;;  %v839_v37 = vld [vmem:[%s6368_s23 + $0x2c28] sm:$0xff]  ;;  %v841_v38 = vld [vmem:[%s6368_s23 + $0x2c30] sm:$0xff] }
  0xc7   : > { %838 = vst [vmem:[%s6373_s24 + $0xb20] sm:$0xff] %v837_v36  ;;  %v843_v39 = vld [vmem:[%s6368_s23 + $0x2c38] sm:$0xff]  ;;  %840 = vst [vmem:[%s6373_s24 + $0xb28] sm:$0xff] %v839_v37  ;;  %v845_v40 = vld [vmem:[%s6368_s23 + $0x2d00] sm:$0xff] }
  0xc8   : > { %842 = vst [vmem:[%s6373_s24 + $0xb30] sm:$0xff] %v841_v38  ;;  %844 = vst [vmem:[%s6373_s24 + $0xb38] sm:$0xff] %v843_v39  ;;  %v847_v41 = vld [vmem:[%s6368_s23 + $0x2d08] sm:$0xff]  ;;  %v849_v42 = vld [vmem:[%s6368_s23 + $0x2d10] sm:$0xff] }
  0xc9   : > { %846 = vst [vmem:[%s6373_s24 + $0xb40] sm:$0xff] %v845_v40  ;;  %848 = vst [vmem:[%s6373_s24 + $0xb48] sm:$0xff] %v847_v41  ;;  %v851_v43 = vld [vmem:[%s6368_s23 + $0x2d18] sm:$0xff]  ;;  %v853_v44 = vld [vmem:[%s6368_s23 + $0x2d20] sm:$0xff] }
  0xca   : > { %850 = vst [vmem:[%s6373_s24 + $0xb50] sm:$0xff] %v849_v42  ;;  %v855_v45 = vld [vmem:[%s6368_s23 + $0x2d28] sm:$0xff]  ;;  %852 = vst [vmem:[%s6373_s24 + $0xb58] sm:$0xff] %v851_v43  ;;  %v857_v46 = vld [vmem:[%s6368_s23 + $0x2d30] sm:$0xff] }
  0xcb   : > { %854 = vst [vmem:[%s6373_s24 + $0xb60] sm:$0xff] %v853_v44  ;;  %856 = vst [vmem:[%s6373_s24 + $0xb68] sm:$0xff] %v855_v45  ;;  %v859_v47 = vld [vmem:[%s6368_s23 + $0x2d38] sm:$0xff]  ;;  %v861_v48 = vld [vmem:[%s6368_s23 + $0x2e00] sm:$0xff] }
  0xcc   : > { %858 = vst [vmem:[%s6373_s24 + $0xb70] sm:$0xff] %v857_v46  ;;  %860 = vst [vmem:[%s6373_s24 + $0xb78] sm:$0xff] %v859_v47  ;;  %v863_v49 = vld [vmem:[%s6368_s23 + $0x2e08] sm:$0xff]  ;;  %v865_v50 = vld [vmem:[%s6368_s23 + $0x2e10] sm:$0xff] }
  0xcd   : > { %862 = vst [vmem:[%s6373_s24 + $0xb80] sm:$0xff] %v861_v48  ;;  %v867_v51 = vld [vmem:[%s6368_s23 + $0x2e18] sm:$0xff]  ;;  %864 = vst [vmem:[%s6373_s24 + $0xb88] sm:$0xff] %v863_v49  ;;  %v869_v52 = vld [vmem:[%s6368_s23 + $0x2e20] sm:$0xff] }
  0xce   : > { %866 = vst [vmem:[%s6373_s24 + $0xb90] sm:$0xff] %v865_v50  ;;  %868 = vst [vmem:[%s6373_s24 + $0xb98] sm:$0xff] %v867_v51  ;;  %v871_v53 = vld [vmem:[%s6368_s23 + $0x2e28] sm:$0xff]  ;;  %v873_v54 = vld [vmem:[%s6368_s23 + $0x2e30] sm:$0xff] }
  0xcf   : > { %870 = vst [vmem:[%s6373_s24 + $0xba0] sm:$0xff] %v869_v52  ;;  %872 = vst [vmem:[%s6373_s24 + $0xba8] sm:$0xff] %v871_v53  ;;  %v875_v55 = vld [vmem:[%s6368_s23 + $0x2e38] sm:$0xff]  ;;  %v877_v56 = vld [vmem:[%s6368_s23 + $0x2f00] sm:$0xff] }
  0xd0   : > { %874 = vst [vmem:[%s6373_s24 + $0xbb0] sm:$0xff] %v873_v54  ;;  %v879_v57 = vld [vmem:[%s6368_s23 + $0x2f08] sm:$0xff]  ;;  %876 = vst [vmem:[%s6373_s24 + $0xbb8] sm:$0xff] %v875_v55  ;;  %v881_v58 = vld [vmem:[%s6368_s23 + $0x2f10] sm:$0xff] }
  0xd1   : > { %878 = vst [vmem:[%s6373_s24 + $0xbc0] sm:$0xff] %v877_v56  ;;  %880 = vst [vmem:[%s6373_s24 + $0xbc8] sm:$0xff] %v879_v57  ;;  %v883_v59 = vld [vmem:[%s6368_s23 + $0x2f18] sm:$0xff]  ;;  %v885_v60 = vld [vmem:[%s6368_s23 + $0x2f20] sm:$0xff] }
  0xd2   : > { %882 = vst [vmem:[%s6373_s24 + $0xbd0] sm:$0xff] %v881_v58  ;;  %884 = vst [vmem:[%s6373_s24 + $0xbd8] sm:$0xff] %v883_v59  ;;  %v887_v61 = vld [vmem:[%s6368_s23 + $0x2f28] sm:$0xff]  ;;  %v889_v62 = vld [vmem:[%s6368_s23 + $0x2f30] sm:$0xff] }
  0xd3   : > { %886 = vst [vmem:[%s6373_s24 + $0xbe0] sm:$0xff] %v885_v60  ;;  %v891_v63 = vld [vmem:[%s6368_s23 + $0x2f38] sm:$0xff]  ;;  %888 = vst [vmem:[%s6373_s24 + $0xbe8] sm:$0xff] %v887_v61  ;;  %v893_v0 = vld [vmem:[%s6368_s23 + $0x3000] sm:$0xff] }
  0xd4   : > { %890 = vst [vmem:[%s6373_s24 + $0xbf0] sm:$0xff] %v889_v62  ;;  %892 = vst [vmem:[%s6373_s24 + $0xbf8] sm:$0xff] %v891_v63  ;;  %v895_v1 = vld [vmem:[%s6368_s23 + $0x3008] sm:$0xff]  ;;  %v897_v2 = vld [vmem:[%s6368_s23 + $0x3010] sm:$0xff] }
  0xd5   : > { %894 = vst [vmem:[%s6373_s24 + $0xc00] sm:$0xff] %v893_v0  ;;  %896 = vst [vmem:[%s6373_s24 + $0xc08] sm:$0xff] %v895_v1  ;;  %v899_v3 = vld [vmem:[%s6368_s23 + $0x3018] sm:$0xff]  ;;  %v901_v4 = vld [vmem:[%s6368_s23 + $0x3020] sm:$0xff] }
  0xd6   : > { %898 = vst [vmem:[%s6373_s24 + $0xc10] sm:$0xff] %v897_v2  ;;  %v903_v5 = vld [vmem:[%s6368_s23 + $0x3028] sm:$0xff]  ;;  %900 = vst [vmem:[%s6373_s24 + $0xc18] sm:$0xff] %v899_v3  ;;  %v905_v6 = vld [vmem:[%s6368_s23 + $0x3030] sm:$0xff] }
  0xd7   : > { %902 = vst [vmem:[%s6373_s24 + $0xc20] sm:$0xff] %v901_v4  ;;  %904 = vst [vmem:[%s6373_s24 + $0xc28] sm:$0xff] %v903_v5  ;;  %v907_v7 = vld [vmem:[%s6368_s23 + $0x3038] sm:$0xff]  ;;  %v909_v8 = vld [vmem:[%s6368_s23 + $0x3100] sm:$0xff] }
  0xd8   : > { %906 = vst [vmem:[%s6373_s24 + $0xc30] sm:$0xff] %v905_v6  ;;  %908 = vst [vmem:[%s6373_s24 + $0xc38] sm:$0xff] %v907_v7  ;;  %v911_v9 = vld [vmem:[%s6368_s23 + $0x3108] sm:$0xff]  ;;  %v913_v10 = vld [vmem:[%s6368_s23 + $0x3110] sm:$0xff] }
  0xd9   : > { %910 = vst [vmem:[%s6373_s24 + $0xc40] sm:$0xff] %v909_v8  ;;  %v915_v11 = vld [vmem:[%s6368_s23 + $0x3118] sm:$0xff]  ;;  %912 = vst [vmem:[%s6373_s24 + $0xc48] sm:$0xff] %v911_v9  ;;  %v917_v12 = vld [vmem:[%s6368_s23 + $0x3120] sm:$0xff] }
  0xda   : > { %914 = vst [vmem:[%s6373_s24 + $0xc50] sm:$0xff] %v913_v10  ;;  %916 = vst [vmem:[%s6373_s24 + $0xc58] sm:$0xff] %v915_v11  ;;  %v919_v13 = vld [vmem:[%s6368_s23 + $0x3128] sm:$0xff]  ;;  %v921_v14 = vld [vmem:[%s6368_s23 + $0x3130] sm:$0xff] }
  0xdb   : > { %918 = vst [vmem:[%s6373_s24 + $0xc60] sm:$0xff] %v917_v12  ;;  %920 = vst [vmem:[%s6373_s24 + $0xc68] sm:$0xff] %v919_v13  ;;  %v923_v15 = vld [vmem:[%s6368_s23 + $0x3138] sm:$0xff]  ;;  %v925_v16 = vld [vmem:[%s6368_s23 + $0x3200] sm:$0xff] }
  0xdc   : > { %922 = vst [vmem:[%s6373_s24 + $0xc70] sm:$0xff] %v921_v14  ;;  %v927_v17 = vld [vmem:[%s6368_s23 + $0x3208] sm:$0xff]  ;;  %924 = vst [vmem:[%s6373_s24 + $0xc78] sm:$0xff] %v923_v15  ;;  %v929_v18 = vld [vmem:[%s6368_s23 + $0x3210] sm:$0xff] }
  0xdd   : > { %926 = vst [vmem:[%s6373_s24 + $0xc80] sm:$0xff] %v925_v16  ;;  %928 = vst [vmem:[%s6373_s24 + $0xc88] sm:$0xff] %v927_v17  ;;  %v931_v19 = vld [vmem:[%s6368_s23 + $0x3218] sm:$0xff]  ;;  %v933_v20 = vld [vmem:[%s6368_s23 + $0x3220] sm:$0xff] }
  0xde   : > { %930 = vst [vmem:[%s6373_s24 + $0xc90] sm:$0xff] %v929_v18  ;;  %932 = vst [vmem:[%s6373_s24 + $0xc98] sm:$0xff] %v931_v19  ;;  %v935_v21 = vld [vmem:[%s6368_s23 + $0x3228] sm:$0xff]  ;;  %v937_v22 = vld [vmem:[%s6368_s23 + $0x3230] sm:$0xff] }
  0xdf   : > { %934 = vst [vmem:[%s6373_s24 + $0xca0] sm:$0xff] %v933_v20  ;;  %v939_v23 = vld [vmem:[%s6368_s23 + $0x3238] sm:$0xff]  ;;  %936 = vst [vmem:[%s6373_s24 + $0xca8] sm:$0xff] %v935_v21  ;;  %v941_v24 = vld [vmem:[%s6368_s23 + $0x3300] sm:$0xff] }
  0xe0   : > { %938 = vst [vmem:[%s6373_s24 + $0xcb0] sm:$0xff] %v937_v22  ;;  %940 = vst [vmem:[%s6373_s24 + $0xcb8] sm:$0xff] %v939_v23  ;;  %v943_v25 = vld [vmem:[%s6368_s23 + $0x3308] sm:$0xff]  ;;  %v945_v26 = vld [vmem:[%s6368_s23 + $0x3310] sm:$0xff] }
  0xe1   : > { %942 = vst [vmem:[%s6373_s24 + $0xcc0] sm:$0xff] %v941_v24  ;;  %944 = vst [vmem:[%s6373_s24 + $0xcc8] sm:$0xff] %v943_v25  ;;  %v947_v27 = vld [vmem:[%s6368_s23 + $0x3318] sm:$0xff]  ;;  %v949_v28 = vld [vmem:[%s6368_s23 + $0x3320] sm:$0xff] }
  0xe2   : > { %946 = vst [vmem:[%s6373_s24 + $0xcd0] sm:$0xff] %v945_v26  ;;  %v951_v29 = vld [vmem:[%s6368_s23 + $0x3328] sm:$0xff]  ;;  %948 = vst [vmem:[%s6373_s24 + $0xcd8] sm:$0xff] %v947_v27  ;;  %v953_v30 = vld [vmem:[%s6368_s23 + $0x3330] sm:$0xff] }
  0xe3   : > { %950 = vst [vmem:[%s6373_s24 + $0xce0] sm:$0xff] %v949_v28  ;;  %952 = vst [vmem:[%s6373_s24 + $0xce8] sm:$0xff] %v951_v29  ;;  %v955_v31 = vld [vmem:[%s6368_s23 + $0x3338] sm:$0xff]  ;;  %v957_v32 = vld [vmem:[%s6368_s23 + $0x3400] sm:$0xff] }
  0xe4   : > { %954 = vst [vmem:[%s6373_s24 + $0xcf0] sm:$0xff] %v953_v30  ;;  %956 = vst [vmem:[%s6373_s24 + $0xcf8] sm:$0xff] %v955_v31  ;;  %v959_v33 = vld [vmem:[%s6368_s23 + $0x3408] sm:$0xff]  ;;  %v961_v34 = vld [vmem:[%s6368_s23 + $0x3410] sm:$0xff] }
  0xe5   : > { %958 = vst [vmem:[%s6373_s24 + $0xd00] sm:$0xff] %v957_v32  ;;  %v963_v35 = vld [vmem:[%s6368_s23 + $0x3418] sm:$0xff]  ;;  %960 = vst [vmem:[%s6373_s24 + $0xd08] sm:$0xff] %v959_v33  ;;  %v965_v36 = vld [vmem:[%s6368_s23 + $0x3420] sm:$0xff] }
  0xe6   : > { %962 = vst [vmem:[%s6373_s24 + $0xd10] sm:$0xff] %v961_v34  ;;  %964 = vst [vmem:[%s6373_s24 + $0xd18] sm:$0xff] %v963_v35  ;;  %v967_v37 = vld [vmem:[%s6368_s23 + $0x3428] sm:$0xff]  ;;  %v969_v38 = vld [vmem:[%s6368_s23 + $0x3430] sm:$0xff] }
  0xe7   : > { %966 = vst [vmem:[%s6373_s24 + $0xd20] sm:$0xff] %v965_v36  ;;  %968 = vst [vmem:[%s6373_s24 + $0xd28] sm:$0xff] %v967_v37  ;;  %v971_v39 = vld [vmem:[%s6368_s23 + $0x3438] sm:$0xff]  ;;  %v973_v40 = vld [vmem:[%s6368_s23 + $0x3500] sm:$0xff] }
  0xe8   : > { %970 = vst [vmem:[%s6373_s24 + $0xd30] sm:$0xff] %v969_v38  ;;  %v975_v41 = vld [vmem:[%s6368_s23 + $0x3508] sm:$0xff]  ;;  %972 = vst [vmem:[%s6373_s24 + $0xd38] sm:$0xff] %v971_v39  ;;  %v977_v42 = vld [vmem:[%s6368_s23 + $0x3510] sm:$0xff] }
  0xe9   : > { %974 = vst [vmem:[%s6373_s24 + $0xd40] sm:$0xff] %v973_v40  ;;  %976 = vst [vmem:[%s6373_s24 + $0xd48] sm:$0xff] %v975_v41  ;;  %v979_v43 = vld [vmem:[%s6368_s23 + $0x3518] sm:$0xff]  ;;  %v981_v44 = vld [vmem:[%s6368_s23 + $0x3520] sm:$0xff] }
  0xea   : > { %978 = vst [vmem:[%s6373_s24 + $0xd50] sm:$0xff] %v977_v42  ;;  %980 = vst [vmem:[%s6373_s24 + $0xd58] sm:$0xff] %v979_v43  ;;  %v983_v45 = vld [vmem:[%s6368_s23 + $0x3528] sm:$0xff]  ;;  %v985_v46 = vld [vmem:[%s6368_s23 + $0x3530] sm:$0xff] }
  0xeb   : > { %982 = vst [vmem:[%s6373_s24 + $0xd60] sm:$0xff] %v981_v44  ;;  %v987_v47 = vld [vmem:[%s6368_s23 + $0x3538] sm:$0xff]  ;;  %984 = vst [vmem:[%s6373_s24 + $0xd68] sm:$0xff] %v983_v45  ;;  %v989_v48 = vld [vmem:[%s6368_s23 + $0x3600] sm:$0xff] }
  0xec   : > { %986 = vst [vmem:[%s6373_s24 + $0xd70] sm:$0xff] %v985_v46  ;;  %988 = vst [vmem:[%s6373_s24 + $0xd78] sm:$0xff] %v987_v47  ;;  %v991_v49 = vld [vmem:[%s6368_s23 + $0x3608] sm:$0xff]  ;;  %v993_v50 = vld [vmem:[%s6368_s23 + $0x3610] sm:$0xff] }
  0xed   : > { %990 = vst [vmem:[%s6373_s24 + $0xd80] sm:$0xff] %v989_v48  ;;  %992 = vst [vmem:[%s6373_s24 + $0xd88] sm:$0xff] %v991_v49  ;;  %v995_v51 = vld [vmem:[%s6368_s23 + $0x3618] sm:$0xff]  ;;  %v997_v52 = vld [vmem:[%s6368_s23 + $0x3620] sm:$0xff] }
  0xee   : > { %994 = vst [vmem:[%s6373_s24 + $0xd90] sm:$0xff] %v993_v50  ;;  %v999_v53 = vld [vmem:[%s6368_s23 + $0x3628] sm:$0xff]  ;;  %996 = vst [vmem:[%s6373_s24 + $0xd98] sm:$0xff] %v995_v51  ;;  %v1001_v54 = vld [vmem:[%s6368_s23 + $0x3630] sm:$0xff] }
  0xef   : > { %998 = vst [vmem:[%s6373_s24 + $0xda0] sm:$0xff] %v997_v52  ;;  %1000 = vst [vmem:[%s6373_s24 + $0xda8] sm:$0xff] %v999_v53  ;;  %v1003_v55 = vld [vmem:[%s6368_s23 + $0x3638] sm:$0xff]  ;;  %v1005_v56 = vld [vmem:[%s6368_s23 + $0x3700] sm:$0xff] }
  0xf0   : > { %1002 = vst [vmem:[%s6373_s24 + $0xdb0] sm:$0xff] %v1001_v54  ;;  %1004 = vst [vmem:[%s6373_s24 + $0xdb8] sm:$0xff] %v1003_v55  ;;  %v1007_v57 = vld [vmem:[%s6368_s23 + $0x3708] sm:$0xff]  ;;  %v1009_v58 = vld [vmem:[%s6368_s23 + $0x3710] sm:$0xff] }
  0xf1   : > { %1006 = vst [vmem:[%s6373_s24 + $0xdc0] sm:$0xff] %v1005_v56  ;;  %v1011_v59 = vld [vmem:[%s6368_s23 + $0x3718] sm:$0xff]  ;;  %1008 = vst [vmem:[%s6373_s24 + $0xdc8] sm:$0xff] %v1007_v57  ;;  %v1013_v60 = vld [vmem:[%s6368_s23 + $0x3720] sm:$0xff] }
  0xf2   : > { %1010 = vst [vmem:[%s6373_s24 + $0xdd0] sm:$0xff] %v1009_v58  ;;  %1012 = vst [vmem:[%s6373_s24 + $0xdd8] sm:$0xff] %v1011_v59  ;;  %v1015_v61 = vld [vmem:[%s6368_s23 + $0x3728] sm:$0xff]  ;;  %v1017_v62 = vld [vmem:[%s6368_s23 + $0x3730] sm:$0xff] }
  0xf3   : > { %1014 = vst [vmem:[%s6373_s24 + $0xde0] sm:$0xff] %v1013_v60  ;;  %1016 = vst [vmem:[%s6373_s24 + $0xde8] sm:$0xff] %v1015_v61  ;;  %v1019_v63 = vld [vmem:[%s6368_s23 + $0x3738] sm:$0xff]  ;;  %v1021_v0 = vld [vmem:[%s6368_s23 + $0x3800] sm:$0xff] }
  0xf4   : > { %1018 = vst [vmem:[%s6373_s24 + $0xdf0] sm:$0xff] %v1017_v62  ;;  %v1023_v1 = vld [vmem:[%s6368_s23 + $0x3808] sm:$0xff]  ;;  %1020 = vst [vmem:[%s6373_s24 + $0xdf8] sm:$0xff] %v1019_v63  ;;  %v1025_v2 = vld [vmem:[%s6368_s23 + $0x3810] sm:$0xff] }
  0xf5   : > { %1022 = vst [vmem:[%s6373_s24 + $0xe00] sm:$0xff] %v1021_v0  ;;  %1024 = vst [vmem:[%s6373_s24 + $0xe08] sm:$0xff] %v1023_v1  ;;  %v1027_v3 = vld [vmem:[%s6368_s23 + $0x3818] sm:$0xff]  ;;  %v1029_v4 = vld [vmem:[%s6368_s23 + $0x3820] sm:$0xff] }
  0xf6   : > { %1026 = vst [vmem:[%s6373_s24 + $0xe10] sm:$0xff] %v1025_v2  ;;  %1028 = vst [vmem:[%s6373_s24 + $0xe18] sm:$0xff] %v1027_v3  ;;  %v1031_v5 = vld [vmem:[%s6368_s23 + $0x3828] sm:$0xff]  ;;  %v1033_v6 = vld [vmem:[%s6368_s23 + $0x3830] sm:$0xff] }
  0xf7   : > { %1030 = vst [vmem:[%s6373_s24 + $0xe20] sm:$0xff] %v1029_v4  ;;  %v1035_v7 = vld [vmem:[%s6368_s23 + $0x3838] sm:$0xff]  ;;  %1032 = vst [vmem:[%s6373_s24 + $0xe28] sm:$0xff] %v1031_v5  ;;  %v1037_v8 = vld [vmem:[%s6368_s23 + $0x3900] sm:$0xff] }
  0xf8   : > { %1034 = vst [vmem:[%s6373_s24 + $0xe30] sm:$0xff] %v1033_v6  ;;  %1036 = vst [vmem:[%s6373_s24 + $0xe38] sm:$0xff] %v1035_v7  ;;  %v1039_v9 = vld [vmem:[%s6368_s23 + $0x3908] sm:$0xff]  ;;  %v1041_v10 = vld [vmem:[%s6368_s23 + $0x3910] sm:$0xff] }
  0xf9   : > { %1038 = vst [vmem:[%s6373_s24 + $0xe40] sm:$0xff] %v1037_v8  ;;  %1040 = vst [vmem:[%s6373_s24 + $0xe48] sm:$0xff] %v1039_v9  ;;  %v1043_v11 = vld [vmem:[%s6368_s23 + $0x3918] sm:$0xff]  ;;  %v1045_v12 = vld [vmem:[%s6368_s23 + $0x3920] sm:$0xff] }
  0xfa   : > { %1042 = vst [vmem:[%s6373_s24 + $0xe50] sm:$0xff] %v1041_v10  ;;  %v1047_v13 = vld [vmem:[%s6368_s23 + $0x3928] sm:$0xff]  ;;  %1044 = vst [vmem:[%s6373_s24 + $0xe58] sm:$0xff] %v1043_v11  ;;  %v1049_v14 = vld [vmem:[%s6368_s23 + $0x3930] sm:$0xff] }
  0xfb   : > { %1046 = vst [vmem:[%s6373_s24 + $0xe60] sm:$0xff] %v1045_v12  ;;  %1048 = vst [vmem:[%s6373_s24 + $0xe68] sm:$0xff] %v1047_v13  ;;  %v1051_v15 = vld [vmem:[%s6368_s23 + $0x3938] sm:$0xff]  ;;  %v1053_v16 = vld [vmem:[%s6368_s23 + $0x3a00] sm:$0xff] }
  0xfc   : > { %1050 = vst [vmem:[%s6373_s24 + $0xe70] sm:$0xff] %v1049_v14  ;;  %1052 = vst [vmem:[%s6373_s24 + $0xe78] sm:$0xff] %v1051_v15  ;;  %v1055_v17 = vld [vmem:[%s6368_s23 + $0x3a08] sm:$0xff]  ;;  %v1057_v18 = vld [vmem:[%s6368_s23 + $0x3a10] sm:$0xff] }
  0xfd   : > { %1054 = vst [vmem:[%s6373_s24 + $0xe80] sm:$0xff] %v1053_v16  ;;  %v1059_v19 = vld [vmem:[%s6368_s23 + $0x3a18] sm:$0xff]  ;;  %1056 = vst [vmem:[%s6373_s24 + $0xe88] sm:$0xff] %v1055_v17  ;;  %v1061_v20 = vld [vmem:[%s6368_s23 + $0x3a20] sm:$0xff] }
  0xfe   : > { %1058 = vst [vmem:[%s6373_s24 + $0xe90] sm:$0xff] %v1057_v18  ;;  %1060 = vst [vmem:[%s6373_s24 + $0xe98] sm:$0xff] %v1059_v19  ;;  %v1063_v21 = vld [vmem:[%s6368_s23 + $0x3a28] sm:$0xff]  ;;  %v1065_v22 = vld [vmem:[%s6368_s23 + $0x3a30] sm:$0xff] }
  0xff   : > { %1062 = vst [vmem:[%s6373_s24 + $0xea0] sm:$0xff] %v1061_v20  ;;  %1064 = vst [vmem:[%s6373_s24 + $0xea8] sm:$0xff] %v1063_v21  ;;  %v1067_v23 = vld [vmem:[%s6368_s23 + $0x3a38] sm:$0xff]  ;;  %v1069_v24 = vld [vmem:[%s6368_s23 + $0x3b00] sm:$0xff] }
 0x100   : > { %1066 = vst [vmem:[%s6373_s24 + $0xeb0] sm:$0xff] %v1065_v22  ;;  %v1071_v25 = vld [vmem:[%s6368_s23 + $0x3b08] sm:$0xff]  ;;  %1068 = vst [vmem:[%s6373_s24 + $0xeb8] sm:$0xff] %v1067_v23  ;;  %v1073_v26 = vld [vmem:[%s6368_s23 + $0x3b10] sm:$0xff] }
 0x101   : > { %1070 = vst [vmem:[%s6373_s24 + $0xec0] sm:$0xff] %v1069_v24  ;;  %1072 = vst [vmem:[%s6373_s24 + $0xec8] sm:$0xff] %v1071_v25  ;;  %v1075_v27 = vld [vmem:[%s6368_s23 + $0x3b18] sm:$0xff]  ;;  %v1077_v28 = vld [vmem:[%s6368_s23 + $0x3b20] sm:$0xff] }
 0x102   : > { %1074 = vst [vmem:[%s6373_s24 + $0xed0] sm:$0xff] %v1073_v26  ;;  %1076 = vst [vmem:[%s6373_s24 + $0xed8] sm:$0xff] %v1075_v27  ;;  %v1079_v29 = vld [vmem:[%s6368_s23 + $0x3b28] sm:$0xff]  ;;  %v1081_v30 = vld [vmem:[%s6368_s23 + $0x3b30] sm:$0xff] }
 0x103   : > { %1078 = vst [vmem:[%s6373_s24 + $0xee0] sm:$0xff] %v1077_v28  ;;  %v1083_v31 = vld [vmem:[%s6368_s23 + $0x3b38] sm:$0xff]  ;;  %1080 = vst [vmem:[%s6373_s24 + $0xee8] sm:$0xff] %v1079_v29  ;;  %v1085_v32 = vld [vmem:[%s6368_s23 + $0x3c00] sm:$0xff] }
 0x104   : > { %1082 = vst [vmem:[%s6373_s24 + $0xef0] sm:$0xff] %v1081_v30  ;;  %1084 = vst [vmem:[%s6373_s24 + $0xef8] sm:$0xff] %v1083_v31  ;;  %v1087_v33 = vld [vmem:[%s6368_s23 + $0x3c08] sm:$0xff]  ;;  %v1089_v34 = vld [vmem:[%s6368_s23 + $0x3c10] sm:$0xff] }
 0x105   : > { %1086 = vst [vmem:[%s6373_s24 + $0xf00] sm:$0xff] %v1085_v32  ;;  %1088 = vst [vmem:[%s6373_s24 + $0xf08] sm:$0xff] %v1087_v33  ;;  %v1091_v35 = vld [vmem:[%s6368_s23 + $0x3c18] sm:$0xff]  ;;  %v1093_v36 = vld [vmem:[%s6368_s23 + $0x3c20] sm:$0xff] }
 0x106   : > { %1090 = vst [vmem:[%s6373_s24 + $0xf10] sm:$0xff] %v1089_v34  ;;  %v1095_v37 = vld [vmem:[%s6368_s23 + $0x3c28] sm:$0xff]  ;;  %1092 = vst [vmem:[%s6373_s24 + $0xf18] sm:$0xff] %v1091_v35  ;;  %v1097_v38 = vld [vmem:[%s6368_s23 + $0x3c30] sm:$0xff] }
 0x107   : > { %1094 = vst [vmem:[%s6373_s24 + $0xf20] sm:$0xff] %v1093_v36  ;;  %1096 = vst [vmem:[%s6373_s24 + $0xf28] sm:$0xff] %v1095_v37  ;;  %v1099_v39 = vld [vmem:[%s6368_s23 + $0x3c38] sm:$0xff]  ;;  %v1101_v40 = vld [vmem:[%s6368_s23 + $0x3d00] sm:$0xff] }
 0x108   : > { %1098 = vst [vmem:[%s6373_s24 + $0xf30] sm:$0xff] %v1097_v38  ;;  %1100 = vst [vmem:[%s6373_s24 + $0xf38] sm:$0xff] %v1099_v39  ;;  %v1103_v41 = vld [vmem:[%s6368_s23 + $0x3d08] sm:$0xff]  ;;  %v1105_v42 = vld [vmem:[%s6368_s23 + $0x3d10] sm:$0xff] }
 0x109   : > { %1102 = vst [vmem:[%s6373_s24 + $0xf40] sm:$0xff] %v1101_v40  ;;  %v1107_v43 = vld [vmem:[%s6368_s23 + $0x3d18] sm:$0xff]  ;;  %1104 = vst [vmem:[%s6373_s24 + $0xf48] sm:$0xff] %v1103_v41  ;;  %v1109_v44 = vld [vmem:[%s6368_s23 + $0x3d20] sm:$0xff] }
 0x10a   : > { %1106 = vst [vmem:[%s6373_s24 + $0xf50] sm:$0xff] %v1105_v42  ;;  %1108 = vst [vmem:[%s6373_s24 + $0xf58] sm:$0xff] %v1107_v43  ;;  %v1111_v45 = vld [vmem:[%s6368_s23 + $0x3d28] sm:$0xff]  ;;  %v1113_v46 = vld [vmem:[%s6368_s23 + $0x3d30] sm:$0xff] }
 0x10b   : > { %1110 = vst [vmem:[%s6373_s24 + $0xf60] sm:$0xff] %v1109_v44  ;;  %1112 = vst [vmem:[%s6373_s24 + $0xf68] sm:$0xff] %v1111_v45  ;;  %v1115_v47 = vld [vmem:[%s6368_s23 + $0x3d38] sm:$0xff]  ;;  %v1117_v48 = vld [vmem:[%s6368_s23 + $0x3e00] sm:$0xff] }
 0x10c   : > { %1114 = vst [vmem:[%s6373_s24 + $0xf70] sm:$0xff] %v1113_v46  ;;  %v1119_v49 = vld [vmem:[%s6368_s23 + $0x3e08] sm:$0xff]  ;;  %1116 = vst [vmem:[%s6373_s24 + $0xf78] sm:$0xff] %v1115_v47  ;;  %v1121_v50 = vld [vmem:[%s6368_s23 + $0x3e10] sm:$0xff] }
 0x10d   : > { %1118 = vst [vmem:[%s6373_s24 + $0xf80] sm:$0xff] %v1117_v48  ;;  %1120 = vst [vmem:[%s6373_s24 + $0xf88] sm:$0xff] %v1119_v49  ;;  %v1123_v51 = vld [vmem:[%s6368_s23 + $0x3e18] sm:$0xff]  ;;  %v1125_v52 = vld [vmem:[%s6368_s23 + $0x3e20] sm:$0xff] }
 0x10e   : > { %1122 = vst [vmem:[%s6373_s24 + $0xf90] sm:$0xff] %v1121_v50  ;;  %1124 = vst [vmem:[%s6373_s24 + $0xf98] sm:$0xff] %v1123_v51  ;;  %v1127_v53 = vld [vmem:[%s6368_s23 + $0x3e28] sm:$0xff]  ;;  %v1129_v54 = vld [vmem:[%s6368_s23 + $0x3e30] sm:$0xff] }
 0x10f   : > { %1126 = vst [vmem:[%s6373_s24 + $0xfa0] sm:$0xff] %v1125_v52  ;;  %v1131_v55 = vld [vmem:[%s6368_s23 + $0x3e38] sm:$0xff]  ;;  %1128 = vst [vmem:[%s6373_s24 + $0xfa8] sm:$0xff] %v1127_v53  ;;  %v1133_v56 = vld [vmem:[%s6368_s23 + $0x3f00] sm:$0xff] }
 0x110   : > { %1130 = vst [vmem:[%s6373_s24 + $0xfb0] sm:$0xff] %v1129_v54  ;;  %1132 = vst [vmem:[%s6373_s24 + $0xfb8] sm:$0xff] %v1131_v55  ;;  %v1135_v57 = vld [vmem:[%s6368_s23 + $0x3f08] sm:$0xff]  ;;  %v1137_v58 = vld [vmem:[%s6368_s23 + $0x3f10] sm:$0xff] }
 0x111   : > { %1134 = vst [vmem:[%s6373_s24 + $0xfc0] sm:$0xff] %v1133_v56  ;;  %1136 = vst [vmem:[%s6373_s24 + $0xfc8] sm:$0xff] %v1135_v57  ;;  %v1139_v59 = vld [vmem:[%s6368_s23 + $0x3f18] sm:$0xff]  ;;  %v1141_v60 = vld [vmem:[%s6368_s23 + $0x3f20] sm:$0xff] }
 0x112   : > { %1138 = vst [vmem:[%s6373_s24 + $0xfd0] sm:$0xff] %v1137_v58  ;;  %v1143_v61 = vld [vmem:[%s6368_s23 + $0x3f28] sm:$0xff]  ;;  %1140 = vst [vmem:[%s6373_s24 + $0xfd8] sm:$0xff] %v1139_v59  ;;  %v1145_v62 = vld [vmem:[%s6368_s23 + $0x3f30] sm:$0xff] }
 0x113   : > { %1142 = vst [vmem:[%s6373_s24 + $0xfe0] sm:$0xff] %v1141_v60  ;;  %1144 = vst [vmem:[%s6373_s24 + $0xfe8] sm:$0xff] %v1143_v61  ;;  %v1147_v63 = vld [vmem:[%s6368_s23 + $0x3f38] sm:$0xff] }
 0x114   : > { %1146 = vst [vmem:[%s6373_s24 + $0xff0] sm:$0xff] %v1145_v62  ;;  %1148 = vst [vmem:[%s6373_s24 + $0xff8] sm:$0xff] %v1147_v63 }
 0x115 PF: > { %p5617_p7 = scmp.ge.s32.totalorder %s6311_s11, 1  ;;  %p1153_p8 = scmp.lt.s32.totalorder %s6311_s11, 5 }
 0x117   : > { %p1154_p9 = pnand %p5617_p7, %p1153_p8 }
 0x118   : > { %s1160_s25 = sand.u32 (!%p1154_p9), 1, %s6303_s9   ;;  %v7404_v0 = vld [vmem:[%s8436_s1 + $0x4] ss:$16 sps:$4 sm:$0x3f] (!%p1154_p9)   ;;  %vm5286_vm0 = vcmask (!%p1154_p9), 1045504   ;;  %vm5399_vm1 = vcmask (!%p1154_p9), 1043456  }
 0x119   : > { %1157 = sbr.rel (%p1154_p9) target bundleno = 1062 (0x426), region = 47  ;;  %s5618_s26 = sshll.u32 (!%p1154_p9), %s1160_s25, 12  ;;  %4310 = vmatprep.mubr.bf16.mxu0 (!%p1154_p9), %v7404_v0  ;;  %4396 = vmatprep.mubr.bf16.mxu1 (!%p1154_p9), %v7404_v0  ;;  %vm5416_vm2 = vcmask (!%p1154_p9), 1046528  }
 0x11a   : > { %s7406_s29 = scalar_lea.vmem (!%p1154_p9), [#allocation2], %s5618_s26  ;;  %s7929_s21 = sshll.u32 (!%p1154_p9), %s1160_s25, 8 }
 0x11b   : > { %v1186_v1 = vld [vmem:[%s7406_s29] sm:$0xff] (!%p1154_p9)  ;;  %v1187_v3 = vld [vmem:[%s7406_s29 + $0x8] sm:$0xff] (!%p1154_p9)  ;;  %s7950_s9 = scalar_lea.vmem (!%p1154_p9), [#allocation3], %s7929_s21 }
 0x11c   : > { %v1194_v2 = vld [vmem:[%s7406_s29 + $0x40] sm:$0xff] (!%p1154_p9)  ;;  %v1195_v5 = vld [vmem:[%s7406_s29 + $0x48] sm:$0xff] (!%p1154_p9) }
 0x11d   : > { %v5625_v4 = vcombine.high (!%p1154_p9), %v1186_v1, %v1194_v2  ;;  %v5624_v6 = vcombine.low (!%p1154_p9), %v1186_v1, %v1194_v2  ;;  %v1202_v7 = vld [vmem:[%s7406_s29 + $0x80] sm:$0xff] (!%p1154_p9)  ;;  %v5627_v9 = vcombine.high (!%p1154_p9), %v1187_v3, %v1195_v5  ;;  %v5626_v10 = vcombine.low (!%p1154_p9), %v1187_v3, %v1195_v5  ;;  %v1203_v12 = vld [vmem:[%s7406_s29 + $0x88] sm:$0xff] (!%p1154_p9) }
 0x11e   : > { %v1210_v8 = vld [vmem:[%s7406_s29 + $0xc0] sm:$0xff] (!%p1154_p9)  ;;  %v1211_v13 = vld [vmem:[%s7406_s29 + $0xc8] sm:$0xff] (!%p1154_p9) }
 0x11f   : > { %v5641_v11 = vcombine.high (!%p1154_p9), %v1202_v7, %v1210_v8  ;;  %v1218_v14 = vld [vmem:[%s7406_s29 + $0x100] sm:$0xff] (!%p1154_p9)  ;;  %4278 = vmatprep.subr.bf16.mxu0 (!%p1154_p9), %v5625_v4  ;;  %v5643_v15 = vcombine.high (!%p1154_p9), %v1203_v12, %v1211_v13  ;;  %v1219_v17 = vld [vmem:[%s7406_s29 + $0x108] sm:$0xff] (!%p1154_p9)  ;;  %4364 = vmatprep.subr.bf16.mxu1 (!%p1154_p9), %v5627_v9  ;;  %v5640_v19 = vcombine.low (!%p1154_p9), %v1202_v7, %v1210_v8 }
 0x120   : > { %v1226_v16 = vld [vmem:[%s7406_s29 + $0x140] sm:$0xff]  ;;  %v1227_v18 = vld [vmem:[%s7406_s29 + $0x148] sm:$0xff]  ;;  %4279 = vmatpush1.bf16.msra.mxu0 %v5624_v6  ;;  %4365 = vmatpush1.bf16.msra.mxu1 %v5626_v10  ;;  %v5642_v20 = vcombine.low %v1203_v12, %v1211_v13  ;;  %s6158_s24 = sshll.u32 (%p6358_p5), %s5610_s12, 7 }
 0x121   : > { %4280 = vmatprep.subr.bf16.mxu0 %v5641_v11  ;;  %v5657_v21 = vcombine.high %v1218_v14, %v1226_v16  ;;  %4366 = vmatprep.subr.bf16.mxu1 %v5643_v15  ;;  %v5659_v22 = vcombine.high %v1219_v17, %v1227_v18  ;;  %v1234_v23 = vld [vmem:[%s7406_s29 + $0x180] sm:$0xff]  ;;  %v1235_v25 = vld [vmem:[%s7406_s29 + $0x188] sm:$0xff]  ;;  %v5656_v27 = vcombine.low %v1218_v14, %v1226_v16  ;;  %s8362_s17 = scalar_lea.vmem (%p6358_p5), %s8437_s2, %s6158_s24 }
 0x122   : > { %v1242_v24 = vld [vmem:[%s7406_s29 + $0x1c0] sm:$0xff]  ;;  %v1243_v26 = vld [vmem:[%s7406_s29 + $0x1c8] sm:$0xff]  ;;  %v5658_v28 = vcombine.low %v1219_v17, %v1227_v18 }
 0x123   : > { %v5673_v29 = vcombine.high %v1234_v23, %v1242_v24  ;;  %v5675_v30 = vcombine.high %v1235_v25, %v1243_v26  ;;  %v1250_v31 = vld [vmem:[%s7406_s29 + $0x200] sm:$0xff]  ;;  %v1251_v33 = vld [vmem:[%s7406_s29 + $0x208] sm:$0xff]  ;;  %v5672_v35 = vcombine.low %v1234_v23, %v1242_v24  ;;  %v5674_v36 = vcombine.low %v1235_v25, %v1243_v26 }
 0x124   : > { %4281 = vmatpush1.bf16.msra.mxu0 %v5640_v19  ;;  %4367 = vmatpush1.bf16.msra.mxu1 %v5642_v20  ;;  %v1258_v32 = vld [vmem:[%s7406_s29 + $0x240] sm:$0xff]  ;;  %v1259_v34 = vld [vmem:[%s7406_s29 + $0x248] sm:$0xff] }
 0x125   : > { %4282 = vmatprep.subr.bf16.mxu0 %v5657_v21  ;;  %4368 = vmatprep.subr.bf16.mxu1 %v5659_v22  ;;  %v5689_v37 = vcombine.high %v1250_v31, %v1258_v32  ;;  %v5691_v38 = vcombine.high %v1251_v33, %v1259_v34  ;;  %v1266_v39 = vld [vmem:[%s7406_s29 + $0x280] sm:$0xff]  ;;  %v1267_v41 = vld [vmem:[%s7406_s29 + $0x288] sm:$0xff]  ;;  %v5688_v43 = vcombine.low %v1250_v31, %v1258_v32 }
 0x126   : > { %v1274_v40 = vld [vmem:[%s7406_s29 + $0x2c0] sm:$0xff]  ;;  %v1275_v42 = vld [vmem:[%s7406_s29 + $0x2c8] sm:$0xff]  ;;  %v5690_v44 = vcombine.low %v1251_v33, %v1259_v34 }
 0x127   : > { %v5705_v45 = vcombine.high %v1266_v39, %v1274_v40  ;;  %v5707_v46 = vcombine.high %v1267_v41, %v1275_v42  ;;  %v1282_v47 = vld [vmem:[%s7406_s29 + $0x300] sm:$0xff]  ;;  %v1283_v49 = vld [vmem:[%s7406_s29 + $0x308] sm:$0xff]  ;;  %v5704_v51 = vcombine.low %v1266_v39, %v1274_v40  ;;  %v5706_v52 = vcombine.low %v1267_v41, %v1275_v42 }
 0x128   : > { %4283 = vmatpush1.bf16.msra.mxu0 %v5656_v27  ;;  %4369 = vmatpush1.bf16.msra.mxu1 %v5658_v28  ;;  %v1290_v48 = vld [vmem:[%s7406_s29 + $0x340] sm:$0xff]  ;;  %v1291_v50 = vld [vmem:[%s7406_s29 + $0x348] sm:$0xff] }
 0x129   : > { %4284 = vmatprep.subr.bf16.mxu0 %v5673_v29  ;;  %4370 = vmatprep.subr.bf16.mxu1 %v5675_v30  ;;  %v5721_v53 = vcombine.high %v1282_v47, %v1290_v48  ;;  %v5723_v54 = vcombine.high %v1283_v49, %v1291_v50  ;;  %v1298_v55 = vld [vmem:[%s7406_s29 + $0x380] sm:$0xff]  ;;  %v1299_v57 = vld [vmem:[%s7406_s29 + $0x388] sm:$0xff]  ;;  %v5720_v59 = vcombine.low %v1282_v47, %v1290_v48 }
 0x12a   : > { %v1306_v56 = vld [vmem:[%s7406_s29 + $0x3c0] sm:$0xff]  ;;  %v1307_v58 = vld [vmem:[%s7406_s29 + $0x3c8] sm:$0xff]  ;;  %v5722_v60 = vcombine.low %v1283_v49, %v1291_v50 }
 0x12b   : > { %v5737_v61 = vcombine.high %v1298_v55, %v1306_v56  ;;  %v5739_v62 = vcombine.high %v1299_v57, %v1307_v58  ;;  %v1314_v63 = vld [vmem:[%s7406_s29 + $0x400] sm:$0xff]  ;;  %v1315_v2 = vld [vmem:[%s7406_s29 + $0x408] sm:$0xff]  ;;  %v5736_v4 = vcombine.low %v1298_v55, %v1306_v56  ;;  %v5738_v5 = vcombine.low %v1299_v57, %v1307_v58 }
 0x12c   : > { %4285 = vmatpush1.bf16.msra.mxu0 %v5672_v35  ;;  %4371 = vmatpush1.bf16.msra.mxu1 %v5674_v36  ;;  %v1322_v1 = vld [vmem:[%s7406_s29 + $0x440] sm:$0xff]  ;;  %v1323_v3 = vld [vmem:[%s7406_s29 + $0x448] sm:$0xff] }
 0x12d   : > { %4286 = vmatprep.subr.bf16.mxu0 %v5689_v37  ;;  %4372 = vmatprep.subr.bf16.mxu1 %v5691_v38  ;;  %v5753_v6 = vcombine.high %v1314_v63, %v1322_v1  ;;  %v5755_v7 = vcombine.high %v1315_v2, %v1323_v3  ;;  %v1330_v8 = vld [vmem:[%s7406_s29 + $0x480] sm:$0xff]  ;;  %v1331_v10 = vld [vmem:[%s7406_s29 + $0x488] sm:$0xff]  ;;  %v5752_v12 = vcombine.low %v1314_v63, %v1322_v1 }
 0x12e   : > { %v1338_v9 = vld [vmem:[%s7406_s29 + $0x4c0] sm:$0xff]  ;;  %v1339_v11 = vld [vmem:[%s7406_s29 + $0x4c8] sm:$0xff]  ;;  %v5754_v13 = vcombine.low %v1315_v2, %v1323_v3 }
 0x12f   : > { %v5769_v14 = vcombine.high %v1330_v8, %v1338_v9  ;;  %v5771_v15 = vcombine.high %v1331_v10, %v1339_v11  ;;  %v1346_v16 = vld [vmem:[%s7406_s29 + $0x500] sm:$0xff]  ;;  %v1347_v18 = vld [vmem:[%s7406_s29 + $0x508] sm:$0xff]  ;;  %v5768_v20 = vcombine.low %v1330_v8, %v1338_v9  ;;  %v5770_v21 = vcombine.low %v1331_v10, %v1339_v11 }
 0x130   : > { %4287 = vmatpush1.bf16.msra.mxu0 %v5688_v43  ;;  %4373 = vmatpush1.bf16.msra.mxu1 %v5690_v44  ;;  %v1354_v17 = vld [vmem:[%s7406_s29 + $0x540] sm:$0xff]  ;;  %v1355_v19 = vld [vmem:[%s7406_s29 + $0x548] sm:$0xff] }
 0x131   : > { %4288 = vmatprep.subr.bf16.mxu0 %v5705_v45  ;;  %4374 = vmatprep.subr.bf16.mxu1 %v5707_v46  ;;  %v5785_v22 = vcombine.high %v1346_v16, %v1354_v17  ;;  %v5787_v23 = vcombine.high %v1347_v18, %v1355_v19  ;;  %v1362_v24 = vld [vmem:[%s7406_s29 + $0x580] sm:$0xff]  ;;  %v1363_v26 = vld [vmem:[%s7406_s29 + $0x588] sm:$0xff]  ;;  %v5784_v28 = vcombine.low %v1346_v16, %v1354_v17 }
 0x132   : > { %v1370_v25 = vld [vmem:[%s7406_s29 + $0x5c0] sm:$0xff]  ;;  %v1371_v27 = vld [vmem:[%s7406_s29 + $0x5c8] sm:$0xff]  ;;  %v5786_v29 = vcombine.low %v1347_v18, %v1355_v19 }
 0x133   : > { %v5801_v30 = vcombine.high %v1362_v24, %v1370_v25  ;;  %v5803_v31 = vcombine.high %v1363_v26, %v1371_v27  ;;  %v1378_v32 = vld [vmem:[%s7406_s29 + $0x600] sm:$0xff]  ;;  %v1379_v34 = vld [vmem:[%s7406_s29 + $0x608] sm:$0xff]  ;;  %v5800_v36 = vcombine.low %v1362_v24, %v1370_v25  ;;  %v5802_v37 = vcombine.low %v1363_v26, %v1371_v27 }
 0x134   : > { %4289 = vmatpush1.bf16.msra.mxu0 %v5704_v51  ;;  %4375 = vmatpush1.bf16.msra.mxu1 %v5706_v52  ;;  %v1386_v33 = vld [vmem:[%s7406_s29 + $0x640] sm:$0xff]  ;;  %v1387_v35 = vld [vmem:[%s7406_s29 + $0x648] sm:$0xff] }
 0x135   : > { %4290 = vmatprep.subr.bf16.mxu0 %v5721_v53  ;;  %4376 = vmatprep.subr.bf16.mxu1 %v5723_v54  ;;  %v5817_v38 = vcombine.high %v1378_v32, %v1386_v33  ;;  %v5819_v39 = vcombine.high %v1379_v34, %v1387_v35  ;;  %v1394_v40 = vld [vmem:[%s7406_s29 + $0x680] sm:$0xff]  ;;  %v1395_v42 = vld [vmem:[%s7406_s29 + $0x688] sm:$0xff]  ;;  %v5816_v44 = vcombine.low %v1378_v32, %v1386_v33 }
 0x136   : > { %v1402_v41 = vld [vmem:[%s7406_s29 + $0x6c0] sm:$0xff]  ;;  %v1403_v43 = vld [vmem:[%s7406_s29 + $0x6c8] sm:$0xff]  ;;  %v5818_v45 = vcombine.low %v1379_v34, %v1387_v35 }
 0x137   : > { %v5833_v46 = vcombine.high %v1394_v40, %v1402_v41  ;;  %v5835_v47 = vcombine.high %v1395_v42, %v1403_v43  ;;  %v1410_v48 = vld [vmem:[%s7406_s29 + $0x700] sm:$0xff]  ;;  %v1411_v50 = vld [vmem:[%s7406_s29 + $0x708] sm:$0xff]  ;;  %v5832_v52 = vcombine.low %v1394_v40, %v1402_v41  ;;  %v5834_v53 = vcombine.low %v1395_v42, %v1403_v43 }
 0x138   : > { %4291 = vmatpush1.bf16.msra.mxu0 %v5720_v59  ;;  %4377 = vmatpush1.bf16.msra.mxu1 %v5722_v60  ;;  %v1418_v49 = vld [vmem:[%s7406_s29 + $0x740] sm:$0xff]  ;;  %v1419_v51 = vld [vmem:[%s7406_s29 + $0x748] sm:$0xff] }
 0x139   : > { %4292 = vmatprep.subr.bf16.mxu0 %v5737_v61  ;;  %4378 = vmatprep.subr.bf16.mxu1 %v5739_v62  ;;  %v5849_v54 = vcombine.high %v1410_v48, %v1418_v49  ;;  %v5851_v55 = vcombine.high %v1411_v50, %v1419_v51  ;;  %v1426_v56 = vld [vmem:[%s7406_s29 + $0x780] sm:$0xff]  ;;  %v1427_v58 = vld [vmem:[%s7406_s29 + $0x788] sm:$0xff]  ;;  %v5848_v60 = vcombine.low %v1410_v48, %v1418_v49 }
 0x13a   : > { %v1434_v57 = vld [vmem:[%s7406_s29 + $0x7c0] sm:$0xff]  ;;  %v1435_v59 = vld [vmem:[%s7406_s29 + $0x7c8] sm:$0xff]  ;;  %v5850_v61 = vcombine.low %v1411_v50, %v1419_v51 }
 0x13b   : > { %v5865_v62 = vcombine.high %v1426_v56, %v1434_v57  ;;  %v5867_v63 = vcombine.high %v1427_v58, %v1435_v59  ;;  %v1442_v1 = vld [vmem:[%s7406_s29 + $0x800] sm:$0xff]  ;;  %v1443_v3 = vld [vmem:[%s7406_s29 + $0x808] sm:$0xff] }
 0x13c   : > { %4293 = vmatpush1.bf16.msra.mxu0 %v5736_v4  ;;  %4379 = vmatpush1.bf16.msra.mxu1 %v5738_v5  ;;  %v1450_v2 = vld [vmem:[%s7406_s29 + $0x840] sm:$0xff]  ;;  %v1451_v4 = vld [vmem:[%s7406_s29 + $0x848] sm:$0xff]  ;;  %v5864_v5 = vcombine.low %v1426_v56, %v1434_v57 }
 0x13d   : > { %4294 = vmatprep.subr.bf16.mxu0 %v5753_v6  ;;  %4380 = vmatprep.subr.bf16.mxu1 %v5755_v7  ;;  %v5866_v6 = vcombine.low %v1427_v58, %v1435_v59  ;;  %v5881_v7 = vcombine.high %v1442_v1, %v1450_v2  ;;  %v5883_v8 = vcombine.high %v1443_v3, %v1451_v4  ;;  %v1458_v9 = vld [vmem:[%s7406_s29 + $0x880] sm:$0xff]  ;;  %v7483_v11 = vld [vmem:[%s8436_s1] ss:$16 sps:$4 sm:$0x3f]  }
 0x13e   : > { %v1466_v10 = vld [vmem:[%s7406_s29 + $0x8c0] sm:$0xff] }
 0x13f   : > { %v5897_v16 = vcombine.high %v1458_v9, %v1466_v10  ;;  %v1474_v18 = vld [vmem:[%s7406_s29 + $0x900] sm:$0xff] }
 0x140   : > { %4295 = vmatpush1.bf16.msra.mxu0 %v5752_v12  ;;  %4381 = vmatpush1.bf16.msra.mxu1 %v5754_v13  ;;  %v1459_v12 = vld [vmem:[%s7406_s29 + $0x888] sm:$0xff]  ;;  %v1482_v19 = vld [vmem:[%s7406_s29 + $0x940] sm:$0xff] }
 0x141   : > { %4296 = vmatprep.subr.bf16.mxu0 %v5769_v14  ;;  %4382 = vmatprep.subr.bf16.mxu1 %v5771_v15  ;;  %v1467_v13 = vld [vmem:[%s7406_s29 + $0x8c8] sm:$0xff]  ;;  %v5880_v14 = vcombine.low %v1442_v1, %v1450_v2  ;;  %v5882_v15 = vcombine.low %v1443_v3, %v1451_v4  ;;  %v5913_v25 = vcombine.high %v1474_v18, %v1482_v19  ;;  %v1490_v27 = vld [vmem:[%s7406_s29 + $0x980] sm:$0xff] }
 0x142   : > { %v5899_v17 = vcombine.high %v1459_v12, %v1467_v13  ;;  %v5898_v24 = vcombine.low %v1459_v12, %v1467_v13  ;;  %v1506_v35 = vld [vmem:[%s7406_s29 + $0xa00] sm:$0xff] }
 0x143   : > { %v1522_v43 = vld [vmem:[%s7406_s29 + $0xa80] sm:$0xff] }
 0x144   : > { %4297 = vmatpush1.bf16.msra.mxu0 %v5768_v20  ;;  %4383 = vmatpush1.bf16.msra.mxu1 %v5770_v21  ;;  %v7492_v20 = vld [vmem:[%s8436_s1 + $0xc] ss:$16 sps:$4 sm:$0x3f]   ;;  %v1475_v21 = vld [vmem:[%s7406_s29 + $0x908] sm:$0xff] }
 0x145   : > { %4298 = vmatprep.subr.bf16.mxu0 %v5785_v22  ;;  %4384 = vmatprep.subr.bf16.mxu1 %v5787_v23  ;;  %v1483_v22 = vld [vmem:[%s7406_s29 + $0x948] sm:$0xff]  ;;  %v5896_v23 = vcombine.low %v1458_v9, %v1466_v10  ;;  %v1538_v51 = vld [vmem:[%s7406_s29 + $0xb00] sm:$0xff] }
 0x146   : > { %v5915_v26 = vcombine.high %v1475_v21, %v1483_v22  ;;  %v5914_v32 = vcombine.low %v1475_v21, %v1483_v22  ;;  %v1554_v59 = vld [vmem:[%s7406_s29 + $0xb80] sm:$0xff] }
 0x147   : > { %v1570_v4 = vld [vmem:[%s7406_s29 + $0xc00] sm:$0xff] }
 0x148   : > { %4299 = vmatpush1.bf16.msra.mxu0 %v5784_v28  ;;  %4385 = vmatpush1.bf16.msra.mxu1 %v5786_v29  ;;  %v1498_v28 = vld [vmem:[%s7406_s29 + $0x9c0] sm:$0xff]  ;;  %v1491_v29 = vld [vmem:[%s7406_s29 + $0x988] sm:$0xff] }
 0x149   : > { %4300 = vmatprep.subr.bf16.mxu0 %v5801_v30  ;;  %4386 = vmatprep.subr.bf16.mxu1 %v5803_v31  ;;  %v1499_v30 = vld [vmem:[%s7406_s29 + $0x9c8] sm:$0xff]  ;;  %v5912_v31 = vcombine.low %v1474_v18, %v1482_v19  ;;  %v5929_v33 = vcombine.high %v1490_v27, %v1498_v28  ;;  %v1586_v13 = vld [vmem:[%s7406_s29 + $0xc80] sm:$0xff] }
 0x14a   : > { %v5931_v34 = vcombine.high %v1491_v29, %v1499_v30  ;;  %v5930_v40 = vcombine.low %v1491_v29, %v1499_v30  ;;  %v1602_v22 = vld [vmem:[%s7406_s29 + $0xd00] sm:$0xff] }
 0x14b   : > { %v1618_v30 = vld [vmem:[%s7406_s29 + $0xd80] sm:$0xff] }
 0x14c   : > { %4301 = vmatpush1.bf16.msra.mxu0 %v5800_v36  ;;  %4387 = vmatpush1.bf16.msra.mxu1 %v5802_v37  ;;  %v1514_v36 = vld [vmem:[%s7406_s29 + $0xa40] sm:$0xff]  ;;  %v1507_v37 = vld [vmem:[%s7406_s29 + $0xa08] sm:$0xff] }
 0x14d   : > { %4302 = vmatprep.subr.bf16.mxu0 %v5817_v38  ;;  %4388 = vmatprep.subr.bf16.mxu1 %v5819_v39  ;;  %v1515_v38 = vld [vmem:[%s7406_s29 + $0xa48] sm:$0xff]  ;;  %v5928_v39 = vcombine.low %v1490_v27, %v1498_v28  ;;  %v5945_v41 = vcombine.high %v1506_v35, %v1514_v36 }
 0x14e   : > { %v5947_v42 = vcombine.high %v1507_v37, %v1515_v38  ;;  %v5946_v48 = vcombine.low %v1507_v37, %v1515_v38  ;;  %v1634_v38 = vld [vmem:[%s7406_s29 + $0xe00] sm:$0xff] }
 0x150   : > { %4303 = vmatpush1.bf16.msra.mxu0 %v5816_v44  ;;  %4389 = vmatpush1.bf16.msra.mxu1 %v5818_v45  ;;  %v1530_v44 = vld [vmem:[%s7406_s29 + $0xac0] sm:$0xff]  ;;  %v1523_v45 = vld [vmem:[%s7406_s29 + $0xa88] sm:$0xff] }
 0x151   : > { %4304 = vmatprep.subr.bf16.mxu0 %v5833_v46  ;;  %4390 = vmatprep.subr.bf16.mxu1 %v5835_v47  ;;  %v1531_v46 = vld [vmem:[%s7406_s29 + $0xac8] sm:$0xff]  ;;  %v5944_v47 = vcombine.low %v1506_v35, %v1514_v36  ;;  %v5961_v49 = vcombine.high %v1522_v43, %v1530_v44 }
 0x152   : > { %v5963_v50 = vcombine.high %v1523_v45, %v1531_v46  ;;  %v5962_v56 = vcombine.low %v1523_v45, %v1531_v46  ;;  %v1650_v46 = vld [vmem:[%s7406_s29 + $0xe80] sm:$0xff] }
 0x154   : > { %4305 = vmatpush1.bf16.msra.mxu0 %v5832_v52  ;;  %4391 = vmatpush1.bf16.msra.mxu1 %v5834_v53  ;;  %v1546_v52 = vld [vmem:[%s7406_s29 + $0xb40] sm:$0xff]  ;;  %v1539_v53 = vld [vmem:[%s7406_s29 + $0xb08] sm:$0xff] }
 0x155   : > { %4306 = vmatprep.subr.bf16.mxu0 %v5849_v54  ;;  %4392 = vmatprep.subr.bf16.mxu1 %v5851_v55  ;;  %v1547_v54 = vld [vmem:[%s7406_s29 + $0xb48] sm:$0xff]  ;;  %v5960_v55 = vcombine.low %v1522_v43, %v1530_v44  ;;  %v5977_v57 = vcombine.high %v1538_v51, %v1546_v52 }
 0x156   : > { %v5979_v58 = vcombine.high %v1539_v53, %v1547_v54  ;;  %v5978_v1 = vcombine.low %v1539_v53, %v1547_v54  ;;  %v1666_v54 = vld [vmem:[%s7406_s29 + $0xf00] sm:$0xff] }
 0x158   : > { %4307 = vmatpush1.bf16.msra.mxu0 %v5848_v60  ;;  %4393 = vmatpush1.bf16.msra.mxu1 %v5850_v61  ;;  %v1562_v60 = vld [vmem:[%s7406_s29 + $0xbc0] sm:$0xff]  ;;  %v1555_v61 = vld [vmem:[%s7406_s29 + $0xb88] sm:$0xff] }
 0x159   : > { %4308 = vmatprep.subr.bf16.mxu0 %v5865_v62  ;;  %4394 = vmatprep.subr.bf16.mxu1 %v5867_v63  ;;  %v1563_v62 = vld [vmem:[%s7406_s29 + $0xbc8] sm:$0xff]  ;;  %v5976_v63 = vcombine.low %v1538_v51, %v1546_v52  ;;  %v5993_v2 = vcombine.high %v1554_v59, %v1562_v60 }
 0x15a   : > { %v5995_v3 = vcombine.high %v1555_v61, %v1563_v62  ;;  %v5994_v9 = vcombine.low %v1555_v61, %v1563_v62  ;;  %v1682_v62 = vld [vmem:[%s7406_s29 + $0xf80] sm:$0xff] }
 0x15c   : > { %4309 = vmatpush1.bf16.msra.mxu0 %v5864_v5  ;;  %4395 = vmatpush1.bf16.msra.mxu1 %v5866_v6  ;;  %v1578_v5 = vld [vmem:[%s7406_s29 + $0xc40] sm:$0xff]  ;;  %v1571_v6 = vld [vmem:[%s7406_s29 + $0xc08] sm:$0xff] }
 0x15d   : > { %4321 = vmatprep.subr.bf16.mxu0 %v5881_v7  ;;  %4407 = vmatprep.subr.bf16.mxu1 %v5883_v8  ;;  %v1579_v7 = vld [vmem:[%s7406_s29 + $0xc48] sm:$0xff]  ;;  %v5992_v8 = vcombine.low %v1554_v59, %v1562_v60  ;;  %v6009_v10 = vcombine.high %v1570_v4, %v1578_v5 }
 0x15e   : > { %v6011_v12 = vcombine.high %v1571_v6, %v1579_v7  ;;  %v6010_v18 = vcombine.low %v1571_v6, %v1579_v7  ;;  %v1188_v7 = vld [vmem:[%s7406_s29 + $0x10] sm:$0xff] }
 0x15f   : > { %4311 = vmatmul.mubr.bf16.vlgmr.msra.gmra.mrb[0].mxu0 %v7483_v11  ;;  %4397 = vmatmul.mubr.bf16.vlgmr.msra.gmra.mrb[0].mxu1 %v7483_v11 }
 0x160   : > { %4322 = vmatpush1.bf16.msra.mxu0 %v5880_v14  ;;  %4408 = vmatpush1.bf16.msra.mxu1 %v5882_v15  ;;  %v1594_v14 = vld [vmem:[%s7406_s29 + $0xcc0] sm:$0xff]  ;;  %v1587_v15 = vld [vmem:[%s7406_s29 + $0xc88] sm:$0xff] }
 0x161   : > { %4323 = vmatprep.subr.bf16.mxu0 %v5897_v16  ;;  %4409 = vmatprep.subr.bf16.mxu1 %v5899_v17  ;;  %v1595_v16 = vld [vmem:[%s7406_s29 + $0xcc8] sm:$0xff]  ;;  %v6008_v17 = vcombine.low %v1570_v4, %v1578_v5  ;;  %v6025_v19 = vcombine.high %v1586_v13, %v1594_v14 }
 0x162   : > { %4353 = vmatprep.mubr.bf16.mxu0 %v7492_v20  ;;  %4439 = vmatprep.mubr.bf16.mxu1 %v7492_v20  ;;  %v6027_v21 = vcombine.high %v1587_v15, %v1595_v16  ;;  %v6026_v27 = vcombine.low %v1587_v15, %v1595_v16  ;;  %v1204_v16 = vld [vmem:[%s7406_s29 + $0x90] sm:$0xff] }
 0x164   : > { %4324 = vmatpush1.bf16.msra.mxu0 %v5896_v23  ;;  %4410 = vmatpush1.bf16.msra.mxu1 %v5898_v24  ;;  %v1610_v23 = vld [vmem:[%s7406_s29 + $0xd40] sm:$0xff]  ;;  %v1603_v24 = vld [vmem:[%s7406_s29 + $0xd08] sm:$0xff] }
 0x165   : > { %4325 = vmatprep.subr.bf16.mxu0 %v5913_v25  ;;  %4411 = vmatprep.subr.bf16.mxu1 %v5915_v26  ;;  %v1611_v25 = vld [vmem:[%s7406_s29 + $0xd48] sm:$0xff]  ;;  %v6024_v26 = vcombine.low %v1586_v13, %v1594_v14  ;;  %v6041_v28 = vcombine.high %v1602_v22, %v1610_v23 }
 0x166   : > { %v6043_v29 = vcombine.high %v1603_v24, %v1611_v25  ;;  %v6042_v35 = vcombine.low %v1603_v24, %v1611_v25 }
 0x168   : > { %4326 = vmatpush1.bf16.msra.mxu0 %v5912_v31  ;;  %4412 = vmatpush1.bf16.msra.mxu1 %v5914_v32  ;;  %v1626_v31 = vld [vmem:[%s7406_s29 + $0xdc0] sm:$0xff]  ;;  %v1619_v32 = vld [vmem:[%s7406_s29 + $0xd88] sm:$0xff] }
 0x169   : > { %4327 = vmatprep.subr.bf16.mxu0 %v5929_v33  ;;  %4413 = vmatprep.subr.bf16.mxu1 %v5931_v34  ;;  %v1627_v33 = vld [vmem:[%s7406_s29 + $0xdc8] sm:$0xff]  ;;  %v6040_v34 = vcombine.low %v1602_v22, %v1610_v23  ;;  %v6057_v36 = vcombine.high %v1618_v30, %v1626_v31 }
 0x16a   : > { %v6059_v37 = vcombine.high %v1619_v32, %v1627_v33  ;;  %v6058_v43 = vcombine.low %v1619_v32, %v1627_v33 }
 0x16c   : > { %4328 = vmatpush1.bf16.msra.mxu0 %v5928_v39  ;;  %4414 = vmatpush1.bf16.msra.mxu1 %v5930_v40  ;;  %v1642_v39 = vld [vmem:[%s7406_s29 + $0xe40] sm:$0xff]  ;;  %v1635_v40 = vld [vmem:[%s7406_s29 + $0xe08] sm:$0xff] }
 0x16d   : > { %4329 = vmatprep.subr.bf16.mxu0 %v5945_v41  ;;  %4415 = vmatprep.subr.bf16.mxu1 %v5947_v42  ;;  %v1643_v41 = vld [vmem:[%s7406_s29 + $0xe48] sm:$0xff]  ;;  %v6056_v42 = vcombine.low %v1618_v30, %v1626_v31  ;;  %v6073_v44 = vcombine.high %v1634_v38, %v1642_v39 }
 0x16e   : > { %v6075_v45 = vcombine.high %v1635_v40, %v1643_v41  ;;  %v6074_v51 = vcombine.low %v1635_v40, %v1643_v41 }
 0x170   : > { %4330 = vmatpush1.bf16.msra.mxu0 %v5944_v47  ;;  %4416 = vmatpush1.bf16.msra.mxu1 %v5946_v48  ;;  %v1658_v47 = vld [vmem:[%s7406_s29 + $0xec0] sm:$0xff]  ;;  %v1651_v48 = vld [vmem:[%s7406_s29 + $0xe88] sm:$0xff] }
 0x171   : > { %4331 = vmatprep.subr.bf16.mxu0 %v5961_v49  ;;  %4417 = vmatprep.subr.bf16.mxu1 %v5963_v50  ;;  %v1659_v49 = vld [vmem:[%s7406_s29 + $0xec8] sm:$0xff]  ;;  %v6072_v50 = vcombine.low %v1634_v38, %v1642_v39  ;;  %v6089_v52 = vcombine.high %v1650_v46, %v1658_v47 }
 0x172   : > { %v6091_v53 = vcombine.high %v1651_v48, %v1659_v49  ;;  %v6090_v59 = vcombine.low %v1651_v48, %v1659_v49  ;;  %v1268_v49 = vld [vmem:[%s7406_s29 + $0x290] sm:$0xff] }
 0x174   : > { %4332 = vmatpush1.bf16.msra.mxu0 %v5960_v55  ;;  %4418 = vmatpush1.bf16.msra.mxu1 %v5962_v56  ;;  %v1674_v55 = vld [vmem:[%s7406_s29 + $0xf40] sm:$0xff]  ;;  %v1667_v56 = vld [vmem:[%s7406_s29 + $0xf08] sm:$0xff] }
 0x175   : > { %4333 = vmatprep.subr.bf16.mxu0 %v5977_v57  ;;  %4419 = vmatprep.subr.bf16.mxu1 %v5979_v58  ;;  %v1675_v57 = vld [vmem:[%s7406_s29 + $0xf48] sm:$0xff]  ;;  %v6088_v58 = vcombine.low %v1650_v46, %v1658_v47  ;;  %v6105_v60 = vcombine.high %v1666_v54, %v1674_v55 }
 0x176   : > { %v6107_v61 = vcombine.high %v1667_v56, %v1675_v57  ;;  %v6106_v4 = vcombine.low %v1667_v56, %v1675_v57  ;;  %v1284_v57 = vld [vmem:[%s7406_s29 + $0x310] sm:$0xff] }
 0x178   : > { %4334 = vmatpush1.bf16.msra.mxu0 %v5976_v63  ;;  %4420 = vmatpush1.bf16.msra.mxu1 %v5978_v1  ;;  %v1690_v63 = vld [vmem:[%s7406_s29 + $0xfc0] sm:$0xff]  ;;  %v1683_v1 = vld [vmem:[%s7406_s29 + $0xf88] sm:$0xff] }
 0x179   : > { %4335 = vmatprep.subr.bf16.mxu0 %v5993_v2  ;;  %4421 = vmatprep.subr.bf16.mxu1 %v5995_v3  ;;  %v1691_v2 = vld [vmem:[%s7406_s29 + $0xfc8] sm:$0xff]  ;;  %v6104_v3 = vcombine.low %v1666_v54, %v1674_v55  ;;  %v6121_v5 = vcombine.high %v1682_v62, %v1690_v63 }
 0x17a   : > { %v6123_v6 = vcombine.high %v1683_v1, %v1691_v2  ;;  %v6122_v13 = vcombine.low %v1683_v1, %v1691_v2  ;;  %v1300_v2 = vld [vmem:[%s7406_s29 + $0x390] sm:$0xff] }
 0x17c   : > { %4336 = vmatpush1.bf16.msra.mxu0 %v5992_v8  ;;  %4422 = vmatpush1.bf16.msra.mxu1 %v5994_v9  ;;  %v1196_v8 = vld [vmem:[%s7406_s29 + $0x50] sm:$0xff]  ;;  %v1189_v9 = vld [vmem:[%s7406_s29 + $0x18] sm:$0xff] }
 0x17d   : > { %4337 = vmatprep.subr.bf16.mxu0 %v6009_v10  ;;  %4423 = vmatprep.subr.bf16.mxu1 %v6011_v12  ;;  %v1197_v10 = vld [vmem:[%s7406_s29 + $0x58] sm:$0xff]  ;;  %v6120_v12 = vcombine.low %v1682_v62, %v1690_v63  ;;  %v5629_v14 = vcombine.high %v1188_v7, %v1196_v8  ;;  %v5628_v22 = vcombine.low %v1188_v7, %v1196_v8 }
 0x17e   : > { %v5631_v15 = vcombine.high %v1189_v9, %v1197_v10  ;;  %v5630_v23 = vcombine.low %v1189_v9, %v1197_v10  ;;  %v1316_v10 = vld [vmem:[%s7406_s29 + $0x410] sm:$0xff] }
 0x180   : > { %4338 = vmatpush1.bf16.msra.mxu0 %v6008_v17  ;;  %4424 = vmatpush1.bf16.msra.mxu1 %v6010_v18  ;;  %v1212_v17 = vld [vmem:[%s7406_s29 + $0xd0] sm:$0xff] }
 0x181   : > { %4339 = vmatprep.subr.bf16.mxu0 %v6025_v19  ;;  %4425 = vmatprep.subr.bf16.mxu1 %v6027_v21  ;;  %v7561_v18 = vld [vmem:[%s8436_s1 + $0x8] ss:$16 sps:$4 sm:$0x3f]   ;;  %v1205_v19 = vld [vmem:[%s7406_s29 + $0x98] sm:$0xff]  ;;  %v5645_v24 = vcombine.high %v1204_v16, %v1212_v17  ;;  %v5644_v30 = vcombine.low %v1204_v16, %v1212_v17 }
 0x182   : > { %v1213_v21 = vld [vmem:[%s7406_s29 + $0xd8] sm:$0xff] }
 0x183   : > { %v5647_v25 = vcombine.high %v1205_v19, %v1213_v21  ;;  %v5646_v31 = vcombine.low %v1205_v19, %v1213_v21  ;;  %v1332_v21 = vld [vmem:[%s7406_s29 + $0x490] sm:$0xff] }
 0x184   : > { %4340 = vmatpush1.bf16.msra.mxu0 %v6024_v26  ;;  %4426 = vmatpush1.bf16.msra.mxu1 %v6026_v27  ;;  %v1220_v26 = vld [vmem:[%s7406_s29 + $0x110] sm:$0xff] }
 0x185   : > { %4341 = vmatprep.subr.bf16.mxu0 %v6041_v28  ;;  %4427 = vmatprep.subr.bf16.mxu1 %v6043_v29  ;;  %v1228_v27 = vld [vmem:[%s7406_s29 + $0x150] sm:$0xff]  ;;  %v1221_v28 = vld [vmem:[%s7406_s29 + $0x118] sm:$0xff] }
 0x186   : > { %v1229_v29 = vld [vmem:[%s7406_s29 + $0x158] sm:$0xff]  ;;  %v5661_v32 = vcombine.high %v1220_v26, %v1228_v27  ;;  %v5660_v38 = vcombine.low %v1220_v26, %v1228_v27 }
 0x187   : > { %v5663_v33 = vcombine.high %v1221_v28, %v1229_v29  ;;  %v5662_v39 = vcombine.low %v1221_v28, %v1229_v29  ;;  %v1348_v29 = vld [vmem:[%s7406_s29 + $0x510] sm:$0xff] }
 0x188   : > { %4342 = vmatpush1.bf16.msra.mxu0 %v6040_v34  ;;  %4428 = vmatpush1.bf16.msra.mxu1 %v6042_v35  ;;  %v1236_v34 = vld [vmem:[%s7406_s29 + $0x190] sm:$0xff] }
 0x189   : > { %4343 = vmatprep.subr.bf16.mxu0 %v6057_v36  ;;  %4429 = vmatprep.subr.bf16.mxu1 %v6059_v37  ;;  %v1244_v35 = vld [vmem:[%s7406_s29 + $0x1d0] sm:$0xff]  ;;  %v1237_v36 = vld [vmem:[%s7406_s29 + $0x198] sm:$0xff] }
 0x18a   : > { %v1245_v37 = vld [vmem:[%s7406_s29 + $0x1d8] sm:$0xff]  ;;  %v5677_v40 = vcombine.high %v1236_v34, %v1244_v35  ;;  %v5676_v46 = vcombine.low %v1236_v34, %v1244_v35 }
 0x18b   : > { %v5679_v41 = vcombine.high %v1237_v36, %v1245_v37 }
 0x18c   : > { %4344 = vmatpush1.bf16.msra.mxu0 %v6056_v42  ;;  %4430 = vmatpush1.bf16.msra.mxu1 %v6058_v43  ;;  %v1252_v42 = vld [vmem:[%s7406_s29 + $0x210] sm:$0xff] }
 0x18d   : > { %4345 = vmatprep.subr.bf16.mxu0 %v6073_v44  ;;  %4431 = vmatprep.subr.bf16.mxu1 %v6075_v45  ;;  %v1260_v43 = vld [vmem:[%s7406_s29 + $0x250] sm:$0xff]  ;;  %v1253_v44 = vld [vmem:[%s7406_s29 + $0x218] sm:$0xff] }
 0x18e   : > { %v1261_v45 = vld [vmem:[%s7406_s29 + $0x258] sm:$0xff]  ;;  %v5693_v47 = vcombine.high %v1252_v42, %v1260_v43 }
 0x18f   : > { %v5695_v48 = vcombine.high %v1253_v44, %v1261_v45  ;;  %v5694_v54 = vcombine.low %v1253_v44, %v1261_v45  ;;  %v1380_v45 = vld [vmem:[%s7406_s29 + $0x610] sm:$0xff] }
 0x190   : > { %4346 = vmatpush1.bf16.msra.mxu0 %v6072_v50  ;;  %4432 = vmatpush1.bf16.msra.mxu1 %v6074_v51  ;;  %v1276_v50 = vld [vmem:[%s7406_s29 + $0x2d0] sm:$0xff]  ;;  %v1269_v51 = vld [vmem:[%s7406_s29 + $0x298] sm:$0xff] }
 0x191   : > { %4347 = vmatprep.subr.bf16.mxu0 %v6089_v52  ;;  %4433 = vmatprep.subr.bf16.mxu1 %v6091_v53  ;;  %v1277_v52 = vld [vmem:[%s7406_s29 + $0x2d8] sm:$0xff]  ;;  %v5692_v53 = vcombine.low %v1252_v42, %v1260_v43  ;;  %v5709_v55 = vcombine.high %v1268_v49, %v1276_v50 }
 0x192   : > { %v5711_v56 = vcombine.high %v1269_v51, %v1277_v52  ;;  %v5710_v62 = vcombine.low %v1269_v51, %v1277_v52  ;;  %v1396_v52 = vld [vmem:[%s7406_s29 + $0x690] sm:$0xff] }
 0x194   : > { %4348 = vmatpush1.bf16.msra.mxu0 %v6088_v58  ;;  %4434 = vmatpush1.bf16.msra.mxu1 %v6090_v59  ;;  %v1292_v58 = vld [vmem:[%s7406_s29 + $0x350] sm:$0xff]  ;;  %v1285_v59 = vld [vmem:[%s7406_s29 + $0x318] sm:$0xff] }
 0x195   : > { %4349 = vmatprep.subr.bf16.mxu0 %v6105_v60  ;;  %4435 = vmatprep.subr.bf16.mxu1 %v6107_v61  ;;  %v1293_v60 = vld [vmem:[%s7406_s29 + $0x358] sm:$0xff]  ;;  %v5708_v61 = vcombine.low %v1268_v49, %v1276_v50  ;;  %v5725_v63 = vcombine.high %v1284_v57, %v1292_v58 }
 0x196   : > { %v5727_v1 = vcombine.high %v1285_v59, %v1293_v60  ;;  %v5726_v7 = vcombine.low %v1285_v59, %v1293_v60  ;;  %v1412_v60 = vld [vmem:[%s7406_s29 + $0x710] sm:$0xff] }
 0x198   : > { %4350 = vmatpush1.bf16.msra.mxu0 %v6104_v3  ;;  %4436 = vmatpush1.bf16.msra.mxu1 %v6106_v4  ;;  %v1308_v3 = vld [vmem:[%s7406_s29 + $0x3d0] sm:$0xff]  ;;  %v1301_v4 = vld [vmem:[%s7406_s29 + $0x398] sm:$0xff] }
 0x199   : > { %4351 = vmatprep.subr.bf16.mxu0 %v6121_v5  ;;  %4437 = vmatprep.subr.bf16.mxu1 %v6123_v6  ;;  %v1309_v5 = vld [vmem:[%s7406_s29 + $0x3d8] sm:$0xff]  ;;  %v5724_v6 = vcombine.low %v1284_v57, %v1292_v58  ;;  %v5741_v8 = vcombine.high %v1300_v2, %v1308_v3 }
 0x19a   : > { %v5743_v9 = vcombine.high %v1301_v4, %v1309_v5  ;;  %v5742_v16 = vcombine.low %v1301_v4, %v1309_v5  ;;  %v1428_v5 = vld [vmem:[%s7406_s29 + $0x790] sm:$0xff] }
 0x19c   : > { %4352 = vmatpush1.bf16.msra.mxu0 %v6120_v12  ;;  %4438 = vmatpush1.bf16.msra.mxu1 %v6122_v13  ;;  %v1324_v12 = vld [vmem:[%s7406_s29 + $0x450] sm:$0xff]  ;;  %v1317_v13 = vld [vmem:[%s7406_s29 + $0x418] sm:$0xff] }
 0x19d   : > { %4450 = vmatprep.subr.bf16.mxu0 %v5629_v14  ;;  %4536 = vmatprep.subr.bf16.mxu1 %v5631_v15  ;;  %v1325_v14 = vld [vmem:[%s7406_s29 + $0x458] sm:$0xff]  ;;  %v5740_v15 = vcombine.low %v1300_v2, %v1308_v3  ;;  %v5757_v17 = vcombine.high %v1316_v10, %v1324_v12 }
 0x19e   : > { %v5759_v19 = vcombine.high %v1317_v13, %v1325_v14  ;;  %v5758_v26 = vcombine.low %v1317_v13, %v1325_v14  ;;  %v1444_v14 = vld [vmem:[%s7406_s29 + $0x810] sm:$0xff] }
 0x19f   : > { %4354 = vmatmul.mubr.bf16.vlgmr.msra.gmra.mrb[0].mxu0 %v7561_v18  ;;  %4440 = vmatmul.mubr.bf16.vlgmr.msra.gmra.mrb[0].mxu1 %v7561_v18 }
 0x1a0   : > { %4451 = vmatpush1.bf16.msra.mxu0 %v5628_v22  ;;  %4537 = vmatpush1.bf16.msra.mxu1 %v5630_v23  ;;  %v1340_v22 = vld [vmem:[%s7406_s29 + $0x4d0] sm:$0xff]  ;;  %v1333_v23 = vld [vmem:[%s7406_s29 + $0x498] sm:$0xff] }
 0x1a1   : > { %4452 = vmatprep.subr.bf16.mxu0 %v5645_v24  ;;  %4538 = vmatprep.subr.bf16.mxu1 %v5647_v25  ;;  %v1341_v24 = vld [vmem:[%s7406_s29 + $0x4d8] sm:$0xff]  ;;  %v5756_v25 = vcombine.low %v1316_v10, %v1324_v12  ;;  %v5773_v27 = vcombine.high %v1332_v21, %v1340_v22 }
 0x1a2   : > { %4482 = vmatprep.mubr.bf16.mxu0 %v7404_v0  ;;  %4568 = vmatprep.mubr.bf16.mxu1 %v7404_v0  ;;  %v5678_v0 = vcombine.low %v1237_v36, %v1245_v37  ;;  %v5775_v28 = vcombine.high %v1333_v23, %v1341_v24  ;;  %v5774_v34 = vcombine.low %v1333_v23, %v1341_v24  ;;  %v1364_v37 = vld [vmem:[%s7406_s29 + $0x590] sm:$0xff] }
 0x1a3   : > { %v1460_v24 = vld [vmem:[%s7406_s29 + $0x890] sm:$0xff] }
 0x1a4   : > { %4453 = vmatpush1.bf16.msra.mxu0 %v5644_v30  ;;  %4539 = vmatpush1.bf16.msra.mxu1 %v5646_v31  ;;  %v1356_v30 = vld [vmem:[%s7406_s29 + $0x550] sm:$0xff]  ;;  %v1349_v31 = vld [vmem:[%s7406_s29 + $0x518] sm:$0xff] }
 0x1a5   : > { %4454 = vmatprep.subr.bf16.mxu0 %v5661_v32  ;;  %4540 = vmatprep.subr.bf16.mxu1 %v5663_v33  ;;  %v1357_v32 = vld [vmem:[%s7406_s29 + $0x558] sm:$0xff]  ;;  %v5772_v33 = vcombine.low %v1332_v21, %v1340_v22  ;;  %v5789_v35 = vcombine.high %v1348_v29, %v1356_v30 }
 0x1a6   : > { %v5791_v36 = vcombine.high %v1349_v31, %v1357_v32  ;;  %v5790_v42 = vcombine.low %v1349_v31, %v1357_v32  ;;  %v1476_v32 = vld [vmem:[%s7406_s29 + $0x910] sm:$0xff] }
 0x1a8   : > { %4455 = vmatpush1.bf16.msra.mxu0 %v5660_v38  ;;  %4541 = vmatpush1.bf16.msra.mxu1 %v5662_v39  ;;  %v1372_v38 = vld [vmem:[%s7406_s29 + $0x5d0] sm:$0xff]  ;;  %v1365_v39 = vld [vmem:[%s7406_s29 + $0x598] sm:$0xff] }
 0x1a9   : > { %4456 = vmatprep.subr.bf16.mxu0 %v5677_v40  ;;  %4542 = vmatprep.subr.bf16.mxu1 %v5679_v41  ;;  %v1373_v40 = vld [vmem:[%s7406_s29 + $0x5d8] sm:$0xff]  ;;  %v5788_v41 = vcombine.low %v1348_v29, %v1356_v30  ;;  %v5805_v43 = vcombine.high %v1364_v37, %v1372_v38 }
 0x1aa   : > { %v5807_v44 = vcombine.high %v1365_v39, %v1373_v40  ;;  %v5806_v49 = vcombine.low %v1365_v39, %v1373_v40  ;;  %v1492_v40 = vld [vmem:[%s7406_s29 + $0x990] sm:$0xff] }
 0x1ac   : > { %4457 = vmatpush1.bf16.msra.mxu0 %v5676_v46  ;;  %4543 = vmatpush1.bf16.msra.mxu1 %v5678_v0  ;;  %v1388_v46 = vld [vmem:[%s7406_s29 + $0x650] sm:$0xff]  ;;  %v1381_v0 = vld [vmem:[%s7406_s29 + $0x618] sm:$0xff] }
 0x1ad   : > { %4458 = vmatprep.subr.bf16.mxu0 %v5693_v47  ;;  %4544 = vmatprep.subr.bf16.mxu1 %v5695_v48  ;;  %v1389_v47 = vld [vmem:[%s7406_s29 + $0x658] sm:$0xff]  ;;  %v5804_v48 = vcombine.low %v1364_v37, %v1372_v38  ;;  %v5821_v50 = vcombine.high %v1380_v45, %v1388_v46 }
 0x1ae   : > { %v5823_v51 = vcombine.high %v1381_v0, %v1389_v47  ;;  %v5822_v57 = vcombine.low %v1381_v0, %v1389_v47  ;;  %v1508_v0 = vld [vmem:[%s7406_s29 + $0xa10] sm:$0xff] }
 0x1af   : > { %v1516_v47 = vld [vmem:[%s7406_s29 + $0xa50] sm:$0xff] }
 0x1b0   : > { %4459 = vmatpush1.bf16.msra.mxu0 %v5692_v53  ;;  %4545 = vmatpush1.bf16.msra.mxu1 %v5694_v54  ;;  %v1404_v53 = vld [vmem:[%s7406_s29 + $0x6d0] sm:$0xff]  ;;  %v1397_v54 = vld [vmem:[%s7406_s29 + $0x698] sm:$0xff] }
 0x1b1   : > { %4460 = vmatprep.subr.bf16.mxu0 %v5709_v55  ;;  %4546 = vmatprep.subr.bf16.mxu1 %v5711_v56  ;;  %v1405_v55 = vld [vmem:[%s7406_s29 + $0x6d8] sm:$0xff]  ;;  %v5820_v56 = vcombine.low %v1380_v45, %v1388_v46  ;;  %v5837_v58 = vcombine.high %v1396_v52, %v1404_v53 }
 0x1b2   : > { %v5839_v59 = vcombine.high %v1397_v54, %v1405_v55  ;;  %v5838_v2 = vcombine.low %v1397_v54, %v1405_v55  ;;  %v1532_v54 = vld [vmem:[%s7406_s29 + $0xad0] sm:$0xff]  ;;  %v1525_v55 = vld [vmem:[%s7406_s29 + $0xa98] sm:$0xff] }
 0x1b4   : > { %4461 = vmatpush1.bf16.msra.mxu0 %v5708_v61  ;;  %4547 = vmatpush1.bf16.msra.mxu1 %v5710_v62  ;;  %v1420_v61 = vld [vmem:[%s7406_s29 + $0x750] sm:$0xff]  ;;  %v1413_v62 = vld [vmem:[%s7406_s29 + $0x718] sm:$0xff] }
 0x1b5   : > { %4462 = vmatprep.subr.bf16.mxu0 %v5725_v63  ;;  %4548 = vmatprep.subr.bf16.mxu1 %v5727_v1  ;;  %v1421_v63 = vld [vmem:[%s7406_s29 + $0x758] sm:$0xff]  ;;  %v5836_v1 = vcombine.low %v1396_v52, %v1404_v53  ;;  %v5853_v3 = vcombine.high %v1412_v60, %v1420_v61  ;;  %v1524_v53 = vld [vmem:[%s7406_s29 + $0xa90] sm:$0xff] }
 0x1b6   : > { %v5855_v4 = vcombine.high %v1413_v62, %v1421_v63  ;;  %v5854_v10 = vcombine.low %v1413_v62, %v1421_v63  ;;  %v1548_v62 = vld [vmem:[%s7406_s29 + $0xb50] sm:$0xff]  ;;  %v1541_v63 = vld [vmem:[%s7406_s29 + $0xb18] sm:$0xff] }
 0x1b8   : > { %4463 = vmatpush1.bf16.msra.mxu0 %v5724_v6  ;;  %4549 = vmatpush1.bf16.msra.mxu1 %v5726_v7  ;;  %v1436_v6 = vld [vmem:[%s7406_s29 + $0x7d0] sm:$0xff]  ;;  %v1429_v7 = vld [vmem:[%s7406_s29 + $0x798] sm:$0xff] }
 0x1b9   : > { %4464 = vmatprep.subr.bf16.mxu0 %v5741_v8  ;;  %4550 = vmatprep.subr.bf16.mxu1 %v5743_v9  ;;  %v1437_v8 = vld [vmem:[%s7406_s29 + $0x7d8] sm:$0xff]  ;;  %v5852_v9 = vcombine.low %v1412_v60, %v1420_v61  ;;  %v5869_v12 = vcombine.high %v1428_v5, %v1436_v6  ;;  %v1540_v61 = vld [vmem:[%s7406_s29 + $0xb10] sm:$0xff] }
 0x1ba   : > { %v5871_v13 = vcombine.high %v1429_v7, %v1437_v8  ;;  %v5870_v21 = vcombine.low %v1429_v7, %v1437_v8  ;;  %v1564_v7 = vld [vmem:[%s7406_s29 + $0xbd0] sm:$0xff]  ;;  %v1557_v8 = vld [vmem:[%s7406_s29 + $0xb98] sm:$0xff] }
 0x1bc   : > { %4465 = vmatpush1.bf16.msra.mxu0 %v5740_v15  ;;  %4551 = vmatpush1.bf16.msra.mxu1 %v5742_v16  ;;  %v1452_v15 = vld [vmem:[%s7406_s29 + $0x850] sm:$0xff]  ;;  %v1445_v16 = vld [vmem:[%s7406_s29 + $0x818] sm:$0xff] }
 0x1bd   : > { %4466 = vmatprep.subr.bf16.mxu0 %v5757_v17  ;;  %4552 = vmatprep.subr.bf16.mxu1 %v5759_v19  ;;  %v1453_v17 = vld [vmem:[%s7406_s29 + $0x858] sm:$0xff]  ;;  %v5868_v19 = vcombine.low %v1428_v5, %v1436_v6  ;;  %v5885_v22 = vcombine.high %v1444_v14, %v1452_v15  ;;  %v1556_v6 = vld [vmem:[%s7406_s29 + $0xb90] sm:$0xff] }
 0x1be   : > { %v5887_v23 = vcombine.high %v1445_v16, %v1453_v17  ;;  %v5886_v29 = vcombine.low %v1445_v16, %v1453_v17  ;;  %v1580_v16 = vld [vmem:[%s7406_s29 + $0xc50] sm:$0xff]  ;;  %v1573_v17 = vld [vmem:[%s7406_s29 + $0xc18] sm:$0xff] }
 0x1c0   : > { %4467 = vmatpush1.bf16.msra.mxu0 %v5756_v25  ;;  %4553 = vmatpush1.bf16.msra.mxu1 %v5758_v26  ;;  %v1468_v25 = vld [vmem:[%s7406_s29 + $0x8d0] sm:$0xff]  ;;  %v1461_v26 = vld [vmem:[%s7406_s29 + $0x898] sm:$0xff] }
 0x1c1   : > { %4468 = vmatprep.subr.bf16.mxu0 %v5773_v27  ;;  %4554 = vmatprep.subr.bf16.mxu1 %v5775_v28  ;;  %v1469_v27 = vld [vmem:[%s7406_s29 + $0x8d8] sm:$0xff]  ;;  %v5884_v28 = vcombine.low %v1444_v14, %v1452_v15  ;;  %v5901_v30 = vcombine.high %v1460_v24, %v1468_v25  ;;  %v1572_v15 = vld [vmem:[%s7406_s29 + $0xc10] sm:$0xff] }
 0x1c2   : > { %v5903_v31 = vcombine.high %v1461_v26, %v1469_v27  ;;  %v5902_v37 = vcombine.low %v1461_v26, %v1469_v27  ;;  %v1596_v26 = vld [vmem:[%s7406_s29 + $0xcd0] sm:$0xff]  ;;  %v1589_v27 = vld [vmem:[%s7406_s29 + $0xc98] sm:$0xff] }
 0x1c4   : > { %4469 = vmatpush1.bf16.msra.mxu0 %v5772_v33  ;;  %4555 = vmatpush1.bf16.msra.mxu1 %v5774_v34  ;;  %v1484_v33 = vld [vmem:[%s7406_s29 + $0x950] sm:$0xff]  ;;  %v1477_v34 = vld [vmem:[%s7406_s29 + $0x918] sm:$0xff] }
 0x1c5   : > { %4470 = vmatprep.subr.bf16.mxu0 %v5789_v35  ;;  %4556 = vmatprep.subr.bf16.mxu1 %v5791_v36  ;;  %v1485_v35 = vld [vmem:[%s7406_s29 + $0x958] sm:$0xff]  ;;  %v5900_v36 = vcombine.low %v1460_v24, %v1468_v25  ;;  %v5917_v38 = vcombine.high %v1476_v32, %v1484_v33  ;;  %v1588_v25 = vld [vmem:[%s7406_s29 + $0xc90] sm:$0xff] }
 0x1c6   : > { %v5919_v39 = vcombine.high %v1477_v34, %v1485_v35 }
 0x1c8   : > { %4471 = vmatpush1.bf16.msra.mxu0 %v5788_v41  ;;  %4557 = vmatpush1.bf16.msra.mxu1 %v5790_v42  ;;  %v1500_v41 = vld [vmem:[%s7406_s29 + $0x9d0] sm:$0xff]  ;;  %v1493_v42 = vld [vmem:[%s7406_s29 + $0x998] sm:$0xff] }
 0x1c9   : > { %4472 = vmatprep.subr.bf16.mxu0 %v5805_v43  ;;  %4558 = vmatprep.subr.bf16.mxu1 %v5807_v44  ;;  %v1501_v43 = vld [vmem:[%s7406_s29 + $0x9d8] sm:$0xff]  ;;  %v5918_v44 = vcombine.low %v1477_v34, %v1485_v35  ;;  %v5933_v45 = vcombine.high %v1492_v40, %v1500_v41  ;;  %v1612_v34 = vld [vmem:[%s7406_s29 + $0xd50] sm:$0xff] }
 0x1ca   : > { %v5935_v46 = vcombine.high %v1493_v42, %v1501_v43  ;;  %v1605_v35 = vld [vmem:[%s7406_s29 + $0xd18] sm:$0xff] }
 0x1cc   : > { %4473 = vmatpush1.bf16.msra.mxu0 %v5804_v48  ;;  %4559 = vmatpush1.bf16.msra.mxu1 %v5806_v49  ;;  %v1509_v48 = vld [vmem:[%s7406_s29 + $0xa18] sm:$0xff] }
 0x1cd   : > { %4474 = vmatprep.subr.bf16.mxu0 %v5821_v50  ;;  %4560 = vmatprep.subr.bf16.mxu1 %v5823_v51  ;;  %v1517_v49 = vld [vmem:[%s7406_s29 + $0xa58] sm:$0xff]  ;;  %v5932_v50 = vcombine.low %v1492_v40, %v1500_v41  ;;  %v5949_v51 = vcombine.high %v1508_v0, %v1516_v47  ;;  %v1620_v41 = vld [vmem:[%s7406_s29 + $0xd90] sm:$0xff] }
 0x1ce   : > { %v5951_v52 = vcombine.high %v1509_v48, %v1517_v49 }
 0x1d0   : > { %4475 = vmatpush1.bf16.msra.mxu0 %v5820_v56  ;;  %4561 = vmatpush1.bf16.msra.mxu1 %v5822_v57  ;;  %v1533_v56 = vld [vmem:[%s7406_s29 + $0xad8] sm:$0xff]  ;;  %v5948_v57 = vcombine.low %v1508_v0, %v1516_v47  ;;  %v1636_v47 = vld [vmem:[%s7406_s29 + $0xe10] sm:$0xff] }
 0x1d1   : > { %4476 = vmatprep.subr.bf16.mxu0 %v5837_v58  ;;  %4562 = vmatprep.subr.bf16.mxu1 %v5839_v59  ;;  %v5950_v58 = vcombine.low %v1509_v48, %v1517_v49  ;;  %v5965_v59 = vcombine.high %v1524_v53, %v1532_v54  ;;  %v5967_v60 = vcombine.high %v1525_v55, %v1533_v56  ;;  %v1644_v48 = vld [vmem:[%s7406_s29 + $0xe50] sm:$0xff]  ;;  %v1637_v49 = vld [vmem:[%s7406_s29 + $0xe18] sm:$0xff] }
 0x1d4   : > { %4477 = vmatpush1.bf16.msra.mxu0 %v5836_v1  ;;  %4563 = vmatpush1.bf16.msra.mxu1 %v5838_v2  ;;  %v1549_v1 = vld [vmem:[%s7406_s29 + $0xb58] sm:$0xff]  ;;  %v5964_v2 = vcombine.low %v1524_v53, %v1532_v54  ;;  %v1652_v54 = vld [vmem:[%s7406_s29 + $0xe90] sm:$0xff] }
 0x1d5   : > { %4478 = vmatprep.subr.bf16.mxu0 %v5853_v3  ;;  %4564 = vmatprep.subr.bf16.mxu1 %v5855_v4  ;;  %v5966_v3 = vcombine.low %v1525_v55, %v1533_v56  ;;  %v5981_v4 = vcombine.high %v1540_v61, %v1548_v62  ;;  %v5983_v5 = vcombine.high %v1541_v63, %v1549_v1  ;;  %v1660_v55 = vld [vmem:[%s7406_s29 + $0xed0] sm:$0xff]  ;;  %v1653_v56 = vld [vmem:[%s7406_s29 + $0xe98] sm:$0xff] }
 0x1d8   : > { %4479 = vmatpush1.bf16.msra.mxu0 %v5852_v9  ;;  %4565 = vmatpush1.bf16.msra.mxu1 %v5854_v10  ;;  %v1565_v9 = vld [vmem:[%s7406_s29 + $0xbd8] sm:$0xff]  ;;  %v5980_v10 = vcombine.low %v1540_v61, %v1548_v62  ;;  %v1668_v62 = vld [vmem:[%s7406_s29 + $0xf10] sm:$0xff] }
 0x1d9   : > { %4480 = vmatprep.subr.bf16.mxu0 %v5869_v12  ;;  %4566 = vmatprep.subr.bf16.mxu1 %v5871_v13  ;;  %v5982_v12 = vcombine.low %v1541_v63, %v1549_v1  ;;  %v5997_v13 = vcombine.high %v1556_v6, %v1564_v7  ;;  %v5999_v14 = vcombine.high %v1557_v8, %v1565_v9  ;;  %v1676_v63 = vld [vmem:[%s7406_s29 + $0xf50] sm:$0xff]  ;;  %v1669_v1 = vld [vmem:[%s7406_s29 + $0xf18] sm:$0xff] }
 0x1dc   : > { %4481 = vmatpush1.bf16.msra.mxu0 %v5868_v19  ;;  %4567 = vmatpush1.bf16.msra.mxu1 %v5870_v21  ;;  %v1581_v19 = vld [vmem:[%s7406_s29 + $0xc58] sm:$0xff]  ;;  %v5996_v21 = vcombine.low %v1556_v6, %v1564_v7  ;;  %v1684_v7 = vld [vmem:[%s7406_s29 + $0xf90] sm:$0xff] }
 0x1dd   : > { %4493 = vmatprep.subr.bf16.mxu0 %v5885_v22  ;;  %4579 = vmatprep.subr.bf16.mxu1 %v5887_v23  ;;  %v5998_v22 = vcombine.low %v1557_v8, %v1565_v9  ;;  %v6013_v23 = vcombine.high %v1572_v15, %v1580_v16  ;;  %v6015_v24 = vcombine.high %v1573_v17, %v1581_v19  ;;  %v1692_v8 = vld [vmem:[%s7406_s29 + $0xfd0] sm:$0xff]  ;;  %v1685_v9 = vld [vmem:[%s7406_s29 + $0xf98] sm:$0xff] }
 0x1df   : > { %4483 = vmatmul.mubr.bf16.vlgmr.msra.gmra.mrb[4].mxu0 %v7483_v11  ;;  %4569 = vmatmul.mubr.bf16.vlgmr.msra.gmra.mrb[4].mxu1 %v7483_v11  ;;  %v5916_v11 = vcombine.low %v1476_v32, %v1484_v33  ;;  %v1604_v33 = vld [vmem:[%s7406_s29 + $0xd10] sm:$0xff] }
 0x1e0   : > { %4494 = vmatpush1.bf16.msra.mxu0 %v5884_v28  ;;  %4580 = vmatpush1.bf16.msra.mxu1 %v5886_v29  ;;  %v1597_v28 = vld [vmem:[%s7406_s29 + $0xcd8] sm:$0xff]  ;;  %v6012_v29 = vcombine.low %v1572_v15, %v1580_v16  ;;  %v1190_v16 = vld [vmem:[%s7406_s29 + $0x20] sm:$0xff] }
 0x1e1   : > { %4495 = vmatprep.subr.bf16.mxu0 %v5901_v30  ;;  %4581 = vmatprep.subr.bf16.mxu1 %v5903_v31  ;;  %v6014_v30 = vcombine.low %v1573_v17, %v1581_v19  ;;  %v6029_v31 = vcombine.high %v1588_v25, %v1596_v26  ;;  %v6031_v32 = vcombine.high %v1589_v27, %v1597_v28  ;;  %v1198_v17 = vld [vmem:[%s7406_s29 + $0x60] sm:$0xff]  ;;  %v1191_v19 = vld [vmem:[%s7406_s29 + $0x28] sm:$0xff] }
 0x1e2   : > { %4525 = vmatprep.mubr.bf16.mxu0 %v7492_v20  ;;  %4611 = vmatprep.mubr.bf16.mxu1 %v7492_v20  ;;  %v5934_v20 = vcombine.low %v1493_v42, %v1501_v43  ;;  %v1628_v42 = vld [vmem:[%s7406_s29 + $0xdd0] sm:$0xff]  ;;  %v1621_v43 = vld [vmem:[%s7406_s29 + $0xd98] sm:$0xff] }
 0x1e4   : > { %4496 = vmatpush1.bf16.msra.mxu0 %v5900_v36  ;;  %4582 = vmatpush1.bf16.msra.mxu1 %v5902_v37  ;;  %v1613_v36 = vld [vmem:[%s7406_s29 + $0xd58] sm:$0xff]  ;;  %v6028_v37 = vcombine.low %v1588_v25, %v1596_v26  ;;  %v1206_v26 = vld [vmem:[%s7406_s29 + $0xa0] sm:$0xff] }
 0x1e5   : > { %4497 = vmatprep.subr.bf16.mxu0 %v5917_v38  ;;  %4583 = vmatprep.subr.bf16.mxu1 %v5919_v39  ;;  %v6030_v38 = vcombine.low %v1589_v27, %v1597_v28  ;;  %v6045_v39 = vcombine.high %v1604_v33, %v1612_v34  ;;  %v6047_v40 = vcombine.high %v1605_v35, %v1613_v36  ;;  %v1214_v27 = vld [vmem:[%s7406_s29 + $0xe0] sm:$0xff]  ;;  %v1207_v28 = vld [vmem:[%s7406_s29 + $0xa8] sm:$0xff] }
 0x1e8   : > { %4498 = vmatpush1.bf16.msra.mxu0 %v5916_v11  ;;  %4584 = vmatpush1.bf16.msra.mxu1 %v5918_v44  ;;  %v1629_v11 = vld [vmem:[%s7406_s29 + $0xdd8] sm:$0xff]  ;;  %v6044_v44 = vcombine.low %v1604_v33, %v1612_v34  ;;  %v1222_v34 = vld [vmem:[%s7406_s29 + $0x120] sm:$0xff] }
 0x1e9   : > { %4499 = vmatprep.subr.bf16.mxu0 %v5933_v45  ;;  %4585 = vmatprep.subr.bf16.mxu1 %v5935_v46  ;;  %v6046_v45 = vcombine.low %v1605_v35, %v1613_v36  ;;  %v6061_v46 = vcombine.high %v1620_v41, %v1628_v42  ;;  %v6063_v0 = vcombine.high %v1621_v43, %v1629_v11  ;;  %v1230_v35 = vld [vmem:[%s7406_s29 + $0x160] sm:$0xff]  ;;  %v1223_v36 = vld [vmem:[%s7406_s29 + $0x128] sm:$0xff] }
 0x1ec   : > { %4500 = vmatpush1.bf16.msra.mxu0 %v5932_v50  ;;  %4586 = vmatpush1.bf16.msra.mxu1 %v5934_v20  ;;  %v1645_v50 = vld [vmem:[%s7406_s29 + $0xe58] sm:$0xff]  ;;  %v6060_v20 = vcombine.low %v1620_v41, %v1628_v42  ;;  %v1238_v42 = vld [vmem:[%s7406_s29 + $0x1a0] sm:$0xff] }
 0x1ed   : > { %4501 = vmatprep.subr.bf16.mxu0 %v5949_v51  ;;  %4587 = vmatprep.subr.bf16.mxu1 %v5951_v52  ;;  %v6062_v51 = vcombine.low %v1621_v43, %v1629_v11  ;;  %v6077_v52 = vcombine.high %v1636_v47, %v1644_v48  ;;  %v6079_v53 = vcombine.high %v1637_v49, %v1645_v50  ;;  %v1246_v43 = vld [vmem:[%s7406_s29 + $0x1e0] sm:$0xff]  ;;  %v7712_v11 = vld [vmem:[%s8436_s1 + $0x4] ss:$16 sps:$4 sm:$0x3f]  }
 0x1f0   : > { %4502 = vmatpush1.bf16.msra.mxu0 %v5948_v57  ;;  %4588 = vmatpush1.bf16.msra.mxu1 %v5950_v58  ;;  %v1661_v57 = vld [vmem:[%s7406_s29 + $0xed8] sm:$0xff]  ;;  %v6076_v58 = vcombine.low %v1636_v47, %v1644_v48  ;;  %v1254_v48 = vld [vmem:[%s7406_s29 + $0x220] sm:$0xff] }
 0x1f1   : > { %4503 = vmatprep.subr.bf16.mxu0 %v5965_v59  ;;  %4589 = vmatprep.subr.bf16.mxu1 %v5967_v60  ;;  %v6078_v59 = vcombine.low %v1637_v49, %v1645_v50  ;;  %v6093_v60 = vcombine.high %v1652_v54, %v1660_v55  ;;  %v6095_v61 = vcombine.high %v1653_v56, %v1661_v57  ;;  %v1262_v49 = vld [vmem:[%s7406_s29 + $0x260] sm:$0xff]  ;;  %v1255_v50 = vld [vmem:[%s7406_s29 + $0x228] sm:$0xff] }
 0x1f4   : > { %4504 = vmatpush1.bf16.msra.mxu0 %v5964_v2  ;;  %4590 = vmatpush1.bf16.msra.mxu1 %v5966_v3  ;;  %v1677_v2 = vld [vmem:[%s7406_s29 + $0xf58] sm:$0xff]  ;;  %v6092_v3 = vcombine.low %v1652_v54, %v1660_v55  ;;  %v1270_v55 = vld [vmem:[%s7406_s29 + $0x2a0] sm:$0xff] }
 0x1f5   : > { %4505 = vmatprep.subr.bf16.mxu0 %v5981_v4  ;;  %4591 = vmatprep.subr.bf16.mxu1 %v5983_v5  ;;  %v6094_v4 = vcombine.low %v1653_v56, %v1661_v57  ;;  %v6109_v5 = vcombine.high %v1668_v62, %v1676_v63  ;;  %v6111_v6 = vcombine.high %v1669_v1, %v1677_v2  ;;  %v1278_v56 = vld [vmem:[%s7406_s29 + $0x2e0] sm:$0xff]  ;;  %v1271_v57 = vld [vmem:[%s7406_s29 + $0x2a8] sm:$0xff] }
 0x1f8   : > { %4506 = vmatpush1.bf16.msra.mxu0 %v5980_v10  ;;  %4592 = vmatpush1.bf16.msra.mxu1 %v5982_v12  ;;  %v1693_v10 = vld [vmem:[%s7406_s29 + $0xfd8] sm:$0xff]  ;;  %v6108_v12 = vcombine.low %v1668_v62, %v1676_v63  ;;  %v1286_v63 = vld [vmem:[%s7406_s29 + $0x320] sm:$0xff] }
 0x1f9   : > { %4507 = vmatprep.subr.bf16.mxu0 %v5997_v13  ;;  %4593 = vmatprep.subr.bf16.mxu1 %v5999_v14  ;;  %v6110_v13 = vcombine.low %v1669_v1, %v1677_v2  ;;  %v6125_v14 = vcombine.high %v1684_v7, %v1692_v8  ;;  %v6127_v15 = vcombine.high %v1685_v9, %v1693_v10  ;;  %v1294_v1 = vld [vmem:[%s7406_s29 + $0x360] sm:$0xff]  ;;  %v1287_v2 = vld [vmem:[%s7406_s29 + $0x328] sm:$0xff] }
 0x1fc   : > { %4508 = vmatpush1.bf16.msra.mxu0 %v5996_v21  ;;  %4594 = vmatpush1.bf16.msra.mxu1 %v5998_v22  ;;  %v1199_v21 = vld [vmem:[%s7406_s29 + $0x68] sm:$0xff]  ;;  %v6124_v22 = vcombine.low %v1684_v7, %v1692_v8  ;;  %v1302_v8 = vld [vmem:[%s7406_s29 + $0x3a0] sm:$0xff] }
 0x1fd   : > { %4509 = vmatprep.subr.bf16.mxu0 %v6013_v23  ;;  %4595 = vmatprep.subr.bf16.mxu1 %v6015_v24  ;;  %v6126_v23 = vcombine.low %v1685_v9, %v1693_v10  ;;  %v5633_v24 = vcombine.high %v1190_v16, %v1198_v17  ;;  %v5635_v25 = vcombine.high %v1191_v19, %v1199_v21  ;;  %v1310_v9 = vld [vmem:[%s7406_s29 + $0x3e0] sm:$0xff]  ;;  %v1303_v10 = vld [vmem:[%s7406_s29 + $0x3a8] sm:$0xff] }
 0x200   : > { %4510 = vmatpush1.bf16.msra.mxu0 %v6012_v29  ;;  %4596 = vmatpush1.bf16.msra.mxu1 %v6014_v30  ;;  %v1215_v29 = vld [vmem:[%s7406_s29 + $0xe8] sm:$0xff]  ;;  %v5632_v30 = vcombine.low %v1190_v16, %v1198_v17  ;;  %v1318_v17 = vld [vmem:[%s7406_s29 + $0x420] sm:$0xff] }
 0x201   : > { %4511 = vmatprep.subr.bf16.mxu0 %v6029_v31  ;;  %4597 = vmatprep.subr.bf16.mxu1 %v6031_v32  ;;  %v5634_v31 = vcombine.low %v1191_v19, %v1199_v21  ;;  %v5649_v32 = vcombine.high %v1206_v26, %v1214_v27  ;;  %v5651_v33 = vcombine.high %v1207_v28, %v1215_v29  ;;  %v1326_v19 = vld [vmem:[%s7406_s29 + $0x460] sm:$0xff]  ;;  %v1319_v21 = vld [vmem:[%s7406_s29 + $0x428] sm:$0xff] }
 0x204   : > { %4512 = vmatpush1.bf16.msra.mxu0 %v6028_v37  ;;  %4598 = vmatpush1.bf16.msra.mxu1 %v6030_v38  ;;  %v1231_v37 = vld [vmem:[%s7406_s29 + $0x168] sm:$0xff]  ;;  %v5648_v38 = vcombine.low %v1206_v26, %v1214_v27  ;;  %v1334_v27 = vld [vmem:[%s7406_s29 + $0x4a0] sm:$0xff] }
 0x205   : > { %4513 = vmatprep.subr.bf16.mxu0 %v6045_v39  ;;  %4599 = vmatprep.subr.bf16.mxu1 %v6047_v40  ;;  %v5650_v39 = vcombine.low %v1207_v28, %v1215_v29  ;;  %v5665_v40 = vcombine.high %v1222_v34, %v1230_v35  ;;  %v5667_v41 = vcombine.high %v1223_v36, %v1231_v37  ;;  %v1342_v28 = vld [vmem:[%s7406_s29 + $0x4e0] sm:$0xff]  ;;  %v1335_v29 = vld [vmem:[%s7406_s29 + $0x4a8] sm:$0xff] }
 0x208   : > { %4514 = vmatpush1.bf16.msra.mxu0 %v6044_v44  ;;  %4600 = vmatpush1.bf16.msra.mxu1 %v6046_v45  ;;  %v1247_v44 = vld [vmem:[%s7406_s29 + $0x1e8] sm:$0xff]  ;;  %v5664_v45 = vcombine.low %v1222_v34, %v1230_v35  ;;  %v1350_v35 = vld [vmem:[%s7406_s29 + $0x520] sm:$0xff] }
 0x209   : > { %4515 = vmatprep.subr.bf16.mxu0 %v6061_v46  ;;  %4601 = vmatprep.subr.bf16.mxu1 %v6063_v0  ;;  %v5666_v46 = vcombine.low %v1223_v36, %v1231_v37  ;;  %v5681_v0 = vcombine.high %v1238_v42, %v1246_v43  ;;  %v1358_v36 = vld [vmem:[%s7406_s29 + $0x560] sm:$0xff]  ;;  %v1351_v37 = vld [vmem:[%s7406_s29 + $0x528] sm:$0xff] }
 0x20c   : > { %4516 = vmatpush1.bf16.msra.mxu0 %v6060_v20  ;;  %4602 = vmatpush1.bf16.msra.mxu1 %v6062_v51  ;;  %v1263_v20 = vld [vmem:[%s7406_s29 + $0x268] sm:$0xff]  ;;  %v5680_v51 = vcombine.low %v1238_v42, %v1246_v43  ;;  %v1366_v43 = vld [vmem:[%s7406_s29 + $0x5a0] sm:$0xff] }
 0x20d   : > { %4517 = vmatprep.subr.bf16.mxu0 %v6077_v52  ;;  %4603 = vmatprep.subr.bf16.mxu1 %v6079_v53  ;;  %v5697_v53 = vcombine.high %v1254_v48, %v1262_v49  ;;  %v5699_v54 = vcombine.high %v1255_v50, %v1263_v20 }
 0x210   : > { %4518 = vmatpush1.bf16.msra.mxu0 %v6076_v58  ;;  %4604 = vmatpush1.bf16.msra.mxu1 %v6078_v59  ;;  %v1279_v58 = vld [vmem:[%s7406_s29 + $0x2e8] sm:$0xff]  ;;  %v5696_v59 = vcombine.low %v1254_v48, %v1262_v49  ;;  %v1382_v49 = vld [vmem:[%s7406_s29 + $0x620] sm:$0xff] }
 0x211   : > { %4519 = vmatprep.subr.bf16.mxu0 %v6093_v60  ;;  %4605 = vmatprep.subr.bf16.mxu1 %v6095_v61  ;;  %v5698_v60 = vcombine.low %v1255_v50, %v1263_v20  ;;  %v5713_v61 = vcombine.high %v1270_v55, %v1278_v56  ;;  %v5715_v62 = vcombine.high %v1271_v57, %v1279_v58  ;;  %v1390_v50 = vld [vmem:[%s7406_s29 + $0x660] sm:$0xff]  ;;  %v1383_v20 = vld [vmem:[%s7406_s29 + $0x628] sm:$0xff] }
 0x214   : > { %4520 = vmatpush1.bf16.msra.mxu0 %v6092_v3  ;;  %4606 = vmatpush1.bf16.msra.mxu1 %v6094_v4  ;;  %v1295_v3 = vld [vmem:[%s7406_s29 + $0x368] sm:$0xff]  ;;  %v5712_v4 = vcombine.low %v1270_v55, %v1278_v56  ;;  %v1398_v56 = vld [vmem:[%s7406_s29 + $0x6a0] sm:$0xff] }
 0x215   : > { %4521 = vmatprep.subr.bf16.mxu0 %v6109_v5  ;;  %4607 = vmatprep.subr.bf16.mxu1 %v6111_v6  ;;  %v5714_v5 = vcombine.low %v1271_v57, %v1279_v58  ;;  %v5729_v6 = vcombine.high %v1286_v63, %v1294_v1  ;;  %v5731_v7 = vcombine.high %v1287_v2, %v1295_v3  ;;  %v1406_v57 = vld [vmem:[%s7406_s29 + $0x6e0] sm:$0xff]  ;;  %v1399_v58 = vld [vmem:[%s7406_s29 + $0x6a8] sm:$0xff] }
 0x218   : > { %4522 = vmatpush1.bf16.msra.mxu0 %v6108_v12  ;;  %4608 = vmatpush1.bf16.msra.mxu1 %v6110_v13  ;;  %v1311_v12 = vld [vmem:[%s7406_s29 + $0x3e8] sm:$0xff]  ;;  %v5728_v13 = vcombine.low %v1286_v63, %v1294_v1  ;;  %v1414_v1 = vld [vmem:[%s7406_s29 + $0x720] sm:$0xff] }
 0x219   : > { %4523 = vmatprep.subr.bf16.mxu0 %v6125_v14  ;;  %4609 = vmatprep.subr.bf16.mxu1 %v6127_v15  ;;  %v5730_v14 = vcombine.low %v1287_v2, %v1295_v3  ;;  %v5745_v15 = vcombine.high %v1302_v8, %v1310_v9  ;;  %v5747_v16 = vcombine.high %v1303_v10, %v1311_v12  ;;  %v1422_v2 = vld [vmem:[%s7406_s29 + $0x760] sm:$0xff]  ;;  %v1415_v3 = vld [vmem:[%s7406_s29 + $0x728] sm:$0xff] }
 0x21c   : > { %4524 = vmatpush1.bf16.msra.mxu0 %v6124_v22  ;;  %4610 = vmatpush1.bf16.msra.mxu1 %v6126_v23  ;;  %v1327_v22 = vld [vmem:[%s7406_s29 + $0x468] sm:$0xff]  ;;  %v5744_v23 = vcombine.low %v1302_v8, %v1310_v9  ;;  %v1430_v9 = vld [vmem:[%s7406_s29 + $0x7a0] sm:$0xff] }
 0x21d   : > { %4622 = vmatprep.subr.bf16.mxu0 %v5633_v24  ;;  %4708 = vmatprep.subr.bf16.mxu1 %v5635_v25  ;;  %v5746_v24 = vcombine.low %v1303_v10, %v1311_v12  ;;  %v5761_v25 = vcombine.high %v1318_v17, %v1326_v19  ;;  %v5763_v26 = vcombine.high %v1319_v21, %v1327_v22  ;;  %v1438_v10 = vld [vmem:[%s7406_s29 + $0x7e0] sm:$0xff]  ;;  %v1431_v12 = vld [vmem:[%s7406_s29 + $0x7a8] sm:$0xff] }
 0x21f   : > { %4526 = vmatmul.mubr.bf16.vlgmr.msra.gmra.mrb[4].mxu0 %v7561_v18  ;;  %4612 = vmatmul.mubr.bf16.vlgmr.msra.gmra.mrb[4].mxu1 %v7561_v18  ;;  %v1239_v18 = vld [vmem:[%s7406_s29 + $0x1a8] sm:$0xff] }
 0x220   : > { %4623 = vmatpush1.bf16.msra.mxu0 %v5632_v30  ;;  %4709 = vmatpush1.bf16.msra.mxu1 %v5634_v31  ;;  %v5683_v47 = vcombine.high %v1239_v18, %v1247_v44  ;;  %v5682_v52 = vcombine.low %v1239_v18, %v1247_v44  ;;  %v1343_v30 = vld [vmem:[%s7406_s29 + $0x4e8] sm:$0xff]  ;;  %v5760_v31 = vcombine.low %v1318_v17, %v1326_v19  ;;  %v1374_v18 = vld [vmem:[%s7406_s29 + $0x5e0] sm:$0xff] }
 0x221   : > { %4624 = vmatprep.subr.bf16.mxu0 %v5649_v32  ;;  %4710 = vmatprep.subr.bf16.mxu1 %v5651_v33  ;;  %v5762_v32 = vcombine.low %v1319_v21, %v1327_v22  ;;  %v5777_v33 = vcombine.high %v1334_v27, %v1342_v28  ;;  %v5779_v34 = vcombine.high %v1335_v29, %v1343_v30  ;;  %v1367_v44 = vld [vmem:[%s7406_s29 + $0x5a8] sm:$0xff]  ;;  %v1446_v19 = vld [vmem:[%s7406_s29 + $0x820] sm:$0xff] }
 0x222   : > { %4654 = vmatprep.mubr.bf16.mxu0 %v7712_v11  ;;  %4740 = vmatprep.mubr.bf16.mxu1 %v7712_v11  ;;  %v1454_v21 = vld [vmem:[%s7406_s29 + $0x860] sm:$0xff]  ;;  %v1447_v22 = vld [vmem:[%s7406_s29 + $0x828] sm:$0xff] }
 0x224   : > { %4625 = vmatpush1.bf16.msra.mxu0 %v5648_v38  ;;  %4711 = vmatpush1.bf16.msra.mxu1 %v5650_v39  ;;  %v1359_v38 = vld [vmem:[%s7406_s29 + $0x568] sm:$0xff]  ;;  %v5776_v39 = vcombine.low %v1334_v27, %v1342_v28  ;;  %v1462_v28 = vld [vmem:[%s7406_s29 + $0x8a0] sm:$0xff] }
 0x225   : > { %4626 = vmatprep.subr.bf16.mxu0 %v5665_v40  ;;  %4712 = vmatprep.subr.bf16.mxu1 %v5667_v41  ;;  %v5778_v40 = vcombine.low %v1335_v29, %v1343_v30  ;;  %v5793_v41 = vcombine.high %v1350_v35, %v1358_v36  ;;  %v5795_v42 = vcombine.high %v1351_v37, %v1359_v38  ;;  %v1470_v29 = vld [vmem:[%s7406_s29 + $0x8e0] sm:$0xff]  ;;  %v1463_v30 = vld [vmem:[%s7406_s29 + $0x8a8] sm:$0xff] }
 0x228   : > { %4627 = vmatpush1.bf16.msra.mxu0 %v5664_v45  ;;  %4713 = vmatpush1.bf16.msra.mxu1 %v5666_v46  ;;  %v1375_v45 = vld [vmem:[%s7406_s29 + $0x5e8] sm:$0xff]  ;;  %v5792_v46 = vcombine.low %v1350_v35, %v1358_v36  ;;  %v1478_v36 = vld [vmem:[%s7406_s29 + $0x920] sm:$0xff] }
 0x229   : > { %4628 = vmatprep.subr.bf16.mxu0 %v5681_v0  ;;  %4714 = vmatprep.subr.bf16.mxu1 %v5683_v47  ;;  %v5794_v0 = vcombine.low %v1351_v37, %v1359_v38  ;;  %v5809_v47 = vcombine.high %v1366_v43, %v1374_v18  ;;  %v5811_v48 = vcombine.high %v1367_v44, %v1375_v45  ;;  %v1486_v37 = vld [vmem:[%s7406_s29 + $0x960] sm:$0xff]  ;;  %v7779_v38 = vld [vmem:[%s8436_s1] ss:$16 sps:$4 sm:$0x3f]  }
 0x22c   : > { %4629 = vmatpush1.bf16.msra.mxu0 %v5680_v51  ;;  %4715 = vmatpush1.bf16.msra.mxu1 %v5682_v52  ;;  %v1391_v51 = vld [vmem:[%s7406_s29 + $0x668] sm:$0xff]  ;;  %v5808_v52 = vcombine.low %v1366_v43, %v1374_v18  ;;  %v5921_v43 = vcombine.high %v1478_v36, %v1486_v37 }
 0x22d   : > { %4630 = vmatprep.subr.bf16.mxu0 %v5697_v53  ;;  %4716 = vmatprep.subr.bf16.mxu1 %v5699_v54  ;;  %v5810_v53 = vcombine.low %v1367_v44, %v1375_v45  ;;  %v5825_v54 = vcombine.high %v1382_v49, %v1390_v50  ;;  %v5827_v55 = vcombine.high %v1383_v20, %v1391_v51  ;;  %v1494_v44 = vld [vmem:[%s7406_s29 + $0x9a0] sm:$0xff] }
 0x22e   : > { %v1502_v45 = vld [vmem:[%s7406_s29 + $0x9e0] sm:$0xff] }
 0x230   : > { %4631 = vmatpush1.bf16.msra.mxu0 %v5696_v59  ;;  %4717 = vmatpush1.bf16.msra.mxu1 %v5698_v60  ;;  %v1407_v59 = vld [vmem:[%s7406_s29 + $0x6e8] sm:$0xff]  ;;  %v5824_v60 = vcombine.low %v1382_v49, %v1390_v50  ;;  %v5937_v50 = vcombine.high %v1494_v44, %v1502_v45 }
 0x231   : > { %4632 = vmatprep.subr.bf16.mxu0 %v5713_v61  ;;  %4718 = vmatprep.subr.bf16.mxu1 %v5715_v62  ;;  %v5826_v61 = vcombine.low %v1383_v20, %v1391_v51  ;;  %v5841_v62 = vcombine.high %v1398_v56, %v1406_v57  ;;  %v5843_v63 = vcombine.high %v1399_v58, %v1407_v59  ;;  %v1510_v51 = vld [vmem:[%s7406_s29 + $0xa20] sm:$0xff] }
 0x234   : > { %4633 = vmatpush1.bf16.msra.mxu0 %v5712_v4  ;;  %4719 = vmatpush1.bf16.msra.mxu1 %v5714_v5  ;;  %v1423_v4 = vld [vmem:[%s7406_s29 + $0x768] sm:$0xff]  ;;  %v5840_v5 = vcombine.low %v1398_v56, %v1406_v57 }
 0x235   : > { %4634 = vmatprep.subr.bf16.mxu0 %v5729_v6  ;;  %4720 = vmatprep.subr.bf16.mxu1 %v5731_v7  ;;  %v5842_v6 = vcombine.low %v1399_v58, %v1407_v59  ;;  %v5857_v7 = vcombine.high %v1414_v1, %v1422_v2  ;;  %v5859_v8 = vcombine.high %v1415_v3, %v1423_v4  ;;  %v1526_v59 = vld [vmem:[%s7406_s29 + $0xaa0] sm:$0xff] }
 0x238   : > { %4635 = vmatpush1.bf16.msra.mxu0 %v5728_v13  ;;  %4721 = vmatpush1.bf16.msra.mxu1 %v5730_v14  ;;  %v1439_v13 = vld [vmem:[%s7406_s29 + $0x7e8] sm:$0xff]  ;;  %v5856_v14 = vcombine.low %v1414_v1, %v1422_v2 }
 0x239   : > { %4636 = vmatprep.subr.bf16.mxu0 %v5745_v15  ;;  %4722 = vmatprep.subr.bf16.mxu1 %v5747_v16  ;;  %v5858_v15 = vcombine.low %v1415_v3, %v1423_v4  ;;  %v5873_v16 = vcombine.high %v1430_v9, %v1438_v10  ;;  %v5875_v17 = vcombine.high %v1431_v12, %v1439_v13  ;;  %v1542_v4 = vld [vmem:[%s7406_s29 + $0xb20] sm:$0xff] }
 0x23c   : > { %4637 = vmatpush1.bf16.msra.mxu0 %v5744_v23  ;;  %4723 = vmatpush1.bf16.msra.mxu1 %v5746_v24  ;;  %v1455_v23 = vld [vmem:[%s7406_s29 + $0x868] sm:$0xff]  ;;  %v5872_v24 = vcombine.low %v1430_v9, %v1438_v10 }
 0x23d   : > { %4638 = vmatprep.subr.bf16.mxu0 %v5761_v25  ;;  %4724 = vmatprep.subr.bf16.mxu1 %v5763_v26  ;;  %v5874_v25 = vcombine.low %v1431_v12, %v1439_v13  ;;  %v5889_v26 = vcombine.high %v1446_v19, %v1454_v21  ;;  %v5891_v27 = vcombine.high %v1447_v22, %v1455_v23 }
 0x240   : > { %4639 = vmatpush1.bf16.msra.mxu0 %v5760_v31  ;;  %4725 = vmatpush1.bf16.msra.mxu1 %v5762_v32  ;;  %v1471_v31 = vld [vmem:[%s7406_s29 + $0x8e8] sm:$0xff]  ;;  %v5888_v32 = vcombine.low %v1446_v19, %v1454_v21 }
 0x241   : > { %4640 = vmatprep.subr.bf16.mxu0 %v5777_v33  ;;  %4726 = vmatprep.subr.bf16.mxu1 %v5779_v34  ;;  %v5890_v33 = vcombine.low %v1447_v22, %v1455_v23  ;;  %v5905_v34 = vcombine.high %v1462_v28, %v1470_v29  ;;  %v5907_v35 = vcombine.high %v1463_v30, %v1471_v31  ;;  %v1559_v21 = vld [vmem:[%s7406_s29 + $0xba8] sm:$0xff] }
 0x242   : > { %v1567_v22 = vld [vmem:[%s7406_s29 + $0xbe8] sm:$0xff] }
 0x244   : > { %4641 = vmatpush1.bf16.msra.mxu0 %v5776_v39  ;;  %4727 = vmatpush1.bf16.msra.mxu1 %v5778_v40  ;;  %v1479_v39 = vld [vmem:[%s7406_s29 + $0x928] sm:$0xff] }
 0x245   : > { %4642 = vmatprep.subr.bf16.mxu0 %v5793_v41  ;;  %4728 = vmatprep.subr.bf16.mxu1 %v5795_v42  ;;  %v1487_v40 = vld [vmem:[%s7406_s29 + $0x968] sm:$0xff]  ;;  %v5904_v41 = vcombine.low %v1462_v28, %v1470_v29  ;;  %v5906_v42 = vcombine.low %v1463_v30, %v1471_v31 }
 0x246   : > { %v5923_v18 = vcombine.high %v1479_v39, %v1487_v40  ;;  %v5922_v49 = vcombine.low %v1479_v39, %v1487_v40  ;;  %v1583_v39 = vld [vmem:[%s7406_s29 + $0xc68] sm:$0xff] }
 0x248   : > { %4643 = vmatpush1.bf16.msra.mxu0 %v5792_v46  ;;  %4729 = vmatpush1.bf16.msra.mxu1 %v5794_v0  ;;  %v7790_v46 = vld [vmem:[%s8436_s1 + $0xc] ss:$16 sps:$4 sm:$0x3f]   ;;  %v1495_v0 = vld [vmem:[%s7406_s29 + $0x9a8] sm:$0xff] }
 0x249   : > { %4644 = vmatprep.subr.bf16.mxu0 %v5809_v47  ;;  %4730 = vmatprep.subr.bf16.mxu1 %v5811_v48  ;;  %v1503_v47 = vld [vmem:[%s7406_s29 + $0x9e8] sm:$0xff]  ;;  %v5920_v48 = vcombine.low %v1478_v36, %v1486_v37 }
 0x24a   : > { %v5939_v20 = vcombine.high %v1495_v0, %v1503_v47  ;;  %v5938_v56 = vcombine.low %v1495_v0, %v1503_v47  ;;  %v1575_v37 = vld [vmem:[%s7406_s29 + $0xc28] sm:$0xff] }
 0x24b   : > { %v1599_v0 = vld [vmem:[%s7406_s29 + $0xce8] sm:$0xff] }
 0x24c   : > { %4645 = vmatpush1.bf16.msra.mxu0 %v5808_v52  ;;  %4731 = vmatpush1.bf16.msra.mxu1 %v5810_v53  ;;  %v1518_v52 = vld [vmem:[%s7406_s29 + $0xa60] sm:$0xff]  ;;  %v1511_v53 = vld [vmem:[%s7406_s29 + $0xa28] sm:$0xff] }
 0x24d   : > { %4646 = vmatprep.subr.bf16.mxu0 %v5825_v54  ;;  %4732 = vmatprep.subr.bf16.mxu1 %v5827_v55  ;;  %v1519_v54 = vld [vmem:[%s7406_s29 + $0xa68] sm:$0xff]  ;;  %v5936_v55 = vcombine.low %v1494_v44, %v1502_v45  ;;  %v5953_v57 = vcombine.high %v1510_v51, %v1518_v52  ;;  %v1598_v44 = vld [vmem:[%s7406_s29 + $0xce0] sm:$0xff] }
 0x24e   : > { %v5955_v58 = vcombine.high %v1511_v53, %v1519_v54  ;;  %v5954_v1 = vcombine.low %v1511_v53, %v1519_v54  ;;  %v1591_v45 = vld [vmem:[%s7406_s29 + $0xca8] sm:$0xff] }
 0x24f   : > { %v1607_v53 = vld [vmem:[%s7406_s29 + $0xd28] sm:$0xff] }
 0x250   : > { %4647 = vmatpush1.bf16.msra.mxu0 %v5824_v60  ;;  %4733 = vmatpush1.bf16.msra.mxu1 %v5826_v61  ;;  %v1534_v60 = vld [vmem:[%s7406_s29 + $0xae0] sm:$0xff]  ;;  %v1527_v61 = vld [vmem:[%s7406_s29 + $0xaa8] sm:$0xff] }
 0x251   : > { %4648 = vmatprep.subr.bf16.mxu0 %v5841_v62  ;;  %4734 = vmatprep.subr.bf16.mxu1 %v5843_v63  ;;  %v1535_v62 = vld [vmem:[%s7406_s29 + $0xae8] sm:$0xff]  ;;  %v5952_v63 = vcombine.low %v1510_v51, %v1518_v52  ;;  %v5969_v2 = vcombine.high %v1526_v59, %v1534_v60  ;;  %v1614_v51 = vld [vmem:[%s7406_s29 + $0xd60] sm:$0xff] }
 0x252   : > { %v5971_v3 = vcombine.high %v1527_v61, %v1535_v62  ;;  %v5970_v9 = vcombine.low %v1527_v61, %v1535_v62  ;;  %v1615_v54 = vld [vmem:[%s7406_s29 + $0xd68] sm:$0xff]  ;;  %v6034_v61 = vcombine.low %v1591_v45, %v1599_v0 }
 0x254   : > { %4649 = vmatpush1.bf16.msra.mxu0 %v5840_v5  ;;  %4735 = vmatpush1.bf16.msra.mxu1 %v5842_v6  ;;  %v1550_v5 = vld [vmem:[%s7406_s29 + $0xb60] sm:$0xff]  ;;  %v1543_v6 = vld [vmem:[%s7406_s29 + $0xb28] sm:$0xff] }
 0x255   : > { %4650 = vmatprep.subr.bf16.mxu0 %v5857_v7  ;;  %4736 = vmatprep.subr.bf16.mxu1 %v5859_v8  ;;  %v1551_v7 = vld [vmem:[%s7406_s29 + $0xb68] sm:$0xff]  ;;  %v5968_v8 = vcombine.low %v1526_v59, %v1534_v60  ;;  %v5985_v10 = vcombine.high %v1542_v4, %v1550_v5 }
 0x256   : > { %v5987_v13 = vcombine.high %v1543_v6, %v1551_v7  ;;  %v5986_v28 = vcombine.low %v1543_v6, %v1551_v7  ;;  %v1623_v6 = vld [vmem:[%s7406_s29 + $0xda8] sm:$0xff] }
 0x257   : > { %v1631_v7 = vld [vmem:[%s7406_s29 + $0xde8] sm:$0xff] }
 0x258   : > { %4651 = vmatpush1.bf16.msra.mxu0 %v5856_v14  ;;  %4737 = vmatpush1.bf16.msra.mxu1 %v5858_v15  ;;  %v1558_v14 = vld [vmem:[%s7406_s29 + $0xba0] sm:$0xff] }
 0x259   : > { %4652 = vmatprep.subr.bf16.mxu0 %v5873_v16  ;;  %4738 = vmatprep.subr.bf16.mxu1 %v5875_v17  ;;  %v1566_v15 = vld [vmem:[%s7406_s29 + $0xbe0] sm:$0xff] }
 0x25a   : > { %v6001_v29 = vcombine.high %v1558_v14, %v1566_v15  ;;  %v6000_v40 = vcombine.low %v1558_v14, %v1566_v15  ;;  %v7849_v14 = vld [vmem:[%s7406_s29 + $0xe20] sm:$0xff] }
 0x25b   : > { %v7852_v15 = vld [vmem:[%s7406_s29 + $0xe60] sm:$0xff] }
 0x25c   : > { %4653 = vmatpush1.bf16.msra.mxu0 %v5872_v24  ;;  %4739 = vmatpush1.bf16.msra.mxu1 %v5874_v25  ;;  %v5984_v25 = vcombine.low %v1542_v4, %v1550_v5  ;;  %v1630_v4 = vld [vmem:[%s7406_s29 + $0xde0] sm:$0xff] }
 0x25d   : > { %4665 = vmatprep.subr.bf16.mxu0 %v5889_v26  ;;  %4751 = vmatprep.subr.bf16.mxu1 %v5891_v27 }
 0x25f   : > { %4655 = vmatmul.mubr.bf16.vlgmr.msra.gmra.mrb[8].mxu0 %v7779_v38  ;;  %4741 = vmatmul.mubr.bf16.vlgmr.msra.gmra.mrb[8].mxu1 %v7779_v38 }
 0x260   : > { %4666 = vmatpush1.bf16.msra.mxu0 %v5888_v32  ;;  %4752 = vmatpush1.bf16.msra.mxu1 %v5890_v33  ;;  %v6003_v33 = vcombine.high %v1559_v21, %v1567_v22 }
 0x261   : > { %4667 = vmatprep.subr.bf16.mxu0 %v5905_v34  ;;  %4753 = vmatprep.subr.bf16.mxu1 %v5907_v35  ;;  %v1574_v34 = vld [vmem:[%s7406_s29 + $0xc20] sm:$0xff] }
 0x262   : > { %4697 = vmatprep.mubr.bf16.mxu0 %v7790_v46  ;;  %4783 = vmatprep.mubr.bf16.mxu1 %v7790_v46  ;;  %v1582_v35 = vld [vmem:[%s7406_s29 + $0xc60] sm:$0xff] }
 0x263   : > { %v6016_v47 = vcombine.low %v1574_v34, %v1582_v35 }
 0x264   : > { %4668 = vmatpush1.bf16.msra.mxu0 %v5904_v41  ;;  %4754 = vmatpush1.bf16.msra.mxu1 %v5906_v42  ;;  %v6002_v41 = vcombine.low %v1559_v21, %v1567_v22  ;;  %v6017_v42 = vcombine.high %v1574_v34, %v1582_v35  ;;  %v7855_v21 = vld [vmem:[%s7406_s29 + $0xe28] sm:$0xff]  ;;  %v7877_v34 = vld [vmem:[%s7406_s29 + $0xf20] sm:$0xff] }
 0x265   : > { %4669 = vmatprep.subr.bf16.mxu0 %v5921_v43  ;;  %4755 = vmatprep.subr.bf16.mxu1 %v5923_v18  ;;  %v6019_v43 = vcombine.high %v1575_v37, %v1583_v39  ;;  %v1590_v18 = vld [vmem:[%s7406_s29 + $0xca0] sm:$0xff]  ;;  %v7858_v22 = vld [vmem:[%s7406_s29 + $0xe68] sm:$0xff] }
 0x266   : > { %v7880_v35 = vld [vmem:[%s7406_s29 + $0xf60] sm:$0xff] }
 0x268   : > { %4670 = vmatpush1.bf16.msra.mxu0 %v5920_v48  ;;  %4756 = vmatpush1.bf16.msra.mxu1 %v5922_v49  ;;  %v6018_v48 = vcombine.low %v1575_v37, %v1583_v39  ;;  %v6033_v49 = vcombine.high %v1590_v18, %v1598_v44  ;;  %v7883_v37 = vld [vmem:[%s7406_s29 + $0xf28] sm:$0xff]  ;;  %v6066_v39 = vcombine.low %v1623_v6, %v1631_v7 }
 0x269   : > { %4671 = vmatprep.subr.bf16.mxu0 %v5937_v50  ;;  %4757 = vmatprep.subr.bf16.mxu1 %v5939_v20  ;;  %v6035_v50 = vcombine.high %v1591_v45, %v1599_v0  ;;  %v1606_v20 = vld [vmem:[%s7406_s29 + $0xd20] sm:$0xff]  ;;  %v6083_v45 = vcombine.high %v7855_v21, %v7858_v22 }
 0x26a   : > { %v6049_v62 = vcombine.high %v1606_v20, %v1614_v51 }
 0x26c   : > { %4672 = vmatpush1.bf16.msra.mxu0 %v5936_v55  ;;  %4758 = vmatpush1.bf16.msra.mxu1 %v5938_v56 }
 0x26d   : > { %4673 = vmatprep.subr.bf16.mxu0 %v5953_v57  ;;  %4759 = vmatprep.subr.bf16.mxu1 %v5955_v58  ;;  %v5078_v57 = vlaneseq  ;;  %v6032_v58 = vcombine.low %v1590_v18, %v1598_v44  ;;  %v6080_v18 = vcombine.low %v7849_v14, %v7852_v15  ;;  %v6082_v44 = vcombine.low %v7855_v21, %v7858_v22 }
 0x270   : > { %4674 = vmatpush1.bf16.msra.mxu0 %v5952_v63  ;;  %4760 = vmatpush1.bf16.msra.mxu1 %v5954_v1 }
 0x271   : > { %4675 = vmatprep.subr.bf16.mxu0 %v5969_v2  ;;  %4761 = vmatprep.subr.bf16.mxu1 %v5971_v3  ;;  %v6051_v2 = vcombine.high %v1607_v53, %v1615_v54  ;;  %v1622_v3 = vld [vmem:[%s7406_s29 + $0xda0] sm:$0xff] }
 0x272   : > { %v7808_v12 = vpop.f32.mrb[0].mxu0  ;;  %v7813_v17 = vpop.f32.mrb[0].mxu1 }
 0x273   : > { %v6136_v16 = vmul.f32 -1.442695, %v7808_v12  ;;  %v7815_v19 = vpop.f32.mrb[1].mxu0  ;;  %v6138_v23 = vmul.f32 -1.442695, %v7813_v17  ;;  %v7821_v26 = vpop.f32.mrb[1].mxu1 }
 0x274   : > { %v6137_v24 = vmul.f32 -1.442695, %v7815_v19  ;;  %4676 = vmatpush1.bf16.msra.mxu0 %v5968_v8  ;;  %v7823_v27 = vpop.f32.mrb[2].mxu0  ;;  %4762 = vmatpush1.bf16.msra.mxu1 %v5970_v9  ;;  %v6139_v30 = vmul.f32 -1.442695, %v7821_v26  ;;  %v7826_v31 = vpop.f32.mrb[2].mxu1  ;;  %v6048_v9 = vcombine.low %v1606_v20, %v1614_v51  ;;  %v6112_v51 = vcombine.low %v7877_v34, %v7880_v35 }
 0x275   : > { %6221 = vpow2.f32 %v6136_v16  ;;  %4677 = vmatprep.subr.bf16.mxu0 %v5985_v10  ;;  %v7828_v32 = vpop.f32.mrb[3].mxu0  ;;  %4763 = vmatprep.subr.bf16.mxu1 %v5987_v13  ;;  %v7832_v36 = vpop.f32.mrb[3].mxu1  ;;  %v5079_v8 = vshrl.u32 %v5078_v57, 7  ;;  %v6050_v10 = vcombine.low %v1607_v53, %v1615_v54  ;;  %v6065_v13 = vcombine.high %v1622_v3, %v1630_v4 }
 0x276   : > { %6223 = vpow2.f32 %v6138_v23  ;;  %v6067_v16 = vcombine.high %v1623_v6, %v1631_v7  ;;  %v7861_v23 = vld [vmem:[%s7406_s29 + $0xea0] sm:$0xff]  ;;  %v6113_v53 = vcombine.high %v7877_v34, %v7880_v35 }
 0x277   : > { %6225 = vpow2.f32 %v6137_v24  ;;  %v7864_v24 = vld [vmem:[%s7406_s29 + $0xee0] sm:$0xff] }
 0x278   : > { %6227 = vpow2.f32 %v6139_v30  ;;  %4678 = vmatpush1.bf16.msra.mxu0 %v5984_v25  ;;  %4764 = vmatpush1.bf16.msra.mxu1 %v5986_v28  ;;  %v7867_v25 = vld [vmem:[%s7406_s29 + $0xea8] sm:$0xff]  ;;  %v7874_v30 = vsub.s32 5, %v5079_v8  ;;  %v6097_v0 = vcombine.high %v7861_v23, %v7864_v24 }
 0x279   : > { %4679 = vmatprep.subr.bf16.mxu0 %v6001_v29  ;;  %4765 = vmatprep.subr.bf16.mxu1 %v6003_v33  ;;  %v7870_v28 = vld [vmem:[%s7406_s29 + $0xee8] sm:$0xff]  ;;  %v7872_v29 = vsub.s32 4, %v5079_v8  ;;  %v6064_v33 = vcombine.low %v1622_v3, %v1630_v4 }
 0x27a   : > { %v6099_v20 = vcombine.high %v7867_v25, %v7870_v28 }
 0x27c   : > { %4680 = vmatpush1.bf16.msra.mxu0 %v6000_v40  ;;  %4766 = vmatpush1.bf16.msra.mxu1 %v6002_v41  ;;  %v6081_v40 = vcombine.high %v7849_v14, %v7852_v15  ;;  %v7888_v41 = vld [vmem:[%s7406_s29 + $0xf68] sm:$0xff] }
 0x27d   : > { %4681 = vmatprep.subr.bf16.mxu0 %v6017_v42  ;;  %4767 = vmatprep.subr.bf16.mxu1 %v6019_v43  ;;  %v7891_v42 = vld [vmem:[%s7406_s29 + $0xfa0] sm:$0xff]  ;;  %v6114_v54 = vcombine.low %v7883_v37, %v7888_v41 }
 0x27e   : > { %v7894_v43 = vld [vmem:[%s7406_s29 + $0xfe0] sm:$0xff] }
 0x27f   : > { %v6222_v52 = vpop.eup %6221 }
 0x280   : > { %v6224_v55 = vpop.eup %6223  ;;  %v5030_v56 = vadd.f32 1.0, %v6222_v52  ;;  %4682 = vmatpush1.bf16.msra.mxu0 %v6016_v47  ;;  %4768 = vmatpush1.bf16.msra.mxu1 %v6018_v48  ;;  %v7905_v47 = vld [vmem:[%s7406_s29 + $0xfa8] sm:$0xff] }
 0x281   : > { %v6226_v59 = vpop.eup %6225  ;;  %v5032_v60 = vadd.f32 1.0, %v6224_v55  ;;  %4683 = vmatprep.subr.bf16.mxu0 %v6033_v49  ;;  %4769 = vmatprep.subr.bf16.mxu1 %v6035_v50  ;;  %v7908_v48 = vld [vmem:[%s7406_s29 + $0xfe8] sm:$0xff]  ;;  %v6096_v49 = vcombine.low %v7861_v23, %v7864_v24  ;;  %v6098_v50 = vcombine.low %v7867_v25, %v7870_v28  ;;  %v6115_v55 = vcombine.high %v7883_v37, %v7888_v41  ;;  %v1217_v37 = vld [vmem:[%s7406_s29 + $0xf8] sm:$0xff] }
 0x282   : > { %v6228_v63 = vpop.eup %6227  ;;  %6229 = vrcp.f32 %v5030_v56  ;;  %v5031_v1 = vadd.f32 1.0, %v6226_v59  ;;  %v6129_v56 = vcombine.high %v7891_v42, %v7894_v43 }
 0x283   : > { %6231 = vrcp.f32 %v5032_v60  ;;  %v5033_v5 = vadd.f32 1.0, %v6228_v63  ;;  %v6131_v60 = vcombine.high %v7905_v47, %v7908_v48  ;;  %v4968_v63 = vmax.f32 %v7813_v17, 0.0 }
 0x284   : > { %6233 = vrcp.f32 %v5031_v1  ;;  %4684 = vmatpush1.bf16.msra.mxu0 %v6032_v58  ;;  %4770 = vmatpush1.bf16.msra.mxu1 %v6034_v61 }
 0x285   : > { %6235 = vrcp.f32 %v5033_v5  ;;  %4685 = vmatprep.subr.bf16.mxu0 %v6049_v62  ;;  %4771 = vmatprep.subr.bf16.mxu1 %v6051_v2  ;;  %v4966_v62 = vmax.f32 %v7808_v12, 0.0 }
 0x288   : > { %4686 = vmatpush1.bf16.msra.mxu0 %v6048_v9  ;;  %4772 = vmatpush1.bf16.msra.mxu1 %v6050_v10 }
 0x289   : > { %4687 = vmatprep.subr.bf16.mxu0 %v6065_v13  ;;  %4773 = vmatprep.subr.bf16.mxu1 %v6067_v16 }
 0x28c   : > { %v6230_v52 = vpop.eup %6229  ;;  %4688 = vmatpush1.bf16.msra.mxu0 %v6064_v33  ;;  %4774 = vmatpush1.bf16.msra.mxu1 %v6066_v39 }
 0x28d   : > { %v6232_v57 = vpop.eup %6231  ;;  %v5081_v58 = vrot.slane %v6230_v52, %v7872_v29  ;;  %v5177_v59 = vrot.slane %v6230_v52, %v7874_v30  ;;  %4689 = vmatprep.subr.bf16.mxu0 %v6081_v40  ;;  %4775 = vmatprep.subr.bf16.mxu1 %v6083_v45 }
 0x28e   : > { %v6234_v61 = vpop.eup %6233  ;;  %v5089_v1 = vrot.slane %v6232_v57, %v7872_v29  ;;  %v5185_v2 = vrot.slane %v6232_v57, %v7874_v30 }
 0x28f   : > { %v6236_v3 = vpop.eup %6235  ;;  %v5142_v4 = vmul.f32 %v5081_v58, %v7808_v12  ;;  %v5085_v5 = vrot.slane %v6234_v61, %v7872_v29  ;;  %v5158_v6 = vmul.f32 %v5081_v58, %v7823_v27  ;;  %v5238_v7 = vmul.f32 %v5177_v59, %v7823_v27  ;;  %v1192_v58 = vld [vmem:[%s7406_s29 + $0x30] sm:$0xff] }
 0x290   : > { %v5144_v8 = vmul.f32 %v5089_v1, %v7813_v17  ;;  %v5093_v9 = vrot.slane %v6236_v3, %v7872_v29  ;;  %v5160_v10 = vmul.f32 %v5089_v1, %v7826_v31  ;;  %v5240_v13 = vmul.f32 %v5185_v2, %v7826_v31  ;;  %4690 = vmatpush1.bf16.msra.mxu0 %v6080_v18  ;;  %v1200_v59 = vld [vmem:[%s7406_s29 + $0x70] sm:$0xff] }
 0x291   : > { %v5287_v14 = vrot.slane %v5142_v4, 2  ;;  %v5143_v15 = vmul.f32 %v5085_v5, %v7815_v19  ;;  %v5288_v12 = vrot.slane %v5158_v6, 2  ;;  %v5367_v16 = vrot.slane %v5238_v7, 2  ;;  %4776 = vmatpush1.bf16.msra.mxu1 %v6082_v44  ;;  %4691 = vmatprep.subr.bf16.mxu0 %v6097_v0  ;;  %v1216_v4 = vld [vmem:[%s7406_s29 + $0xf0] sm:$0xff]  ;;  %v1225_v6 = vld [vmem:[%s7406_s29 + $0x138] sm:$0xff] }
 0x292   : > { %v5293_v21 = vrot.slane %v5144_v8, 2  ;;  %v5145_v27 = vmul.f32 %v5093_v9, %v7821_v26  ;;  %v5294_v22 = vrot.slane %v5160_v10, 2  ;;  %v5369_v17 = vrot.slane %v5240_v13, 2  ;;  %4777 = vmatprep.subr.bf16.mxu1 %v6099_v20  ;;  %v1233_v7 = vld [vmem:[%s7406_s29 + $0x178] sm:$0xff] }
 0x293   : > { %v5290_v23 = vrot.slane %v5143_v15, 2  ;;  %v5289_v24 = vsel %vm5286_vm0, %v5287_v14, %v5288_v12  ;;  %5449 = vst [vmem:[%s7950_s9 + $0x80] sm:$0x3] %v5367_v16  ;;  %v5159_v31 = vmul.f32 %v5085_v5, %v7828_v32  ;;  %v5181_v25 = vrot.slane %v6234_v61, %v7874_v30  ;;  %v1209_v5 = vld [vmem:[%s7406_s29 + $0xb8] sm:$0xff]  ;;  %v1240_v14 = vld [vmem:[%s7406_s29 + $0x1b0] sm:$0xff] }
 0x294   : > { %v5296_v28 = vrot.slane %v5145_v27, 2  ;;  %v5400_v33 = vsel %vm5399_vm1, %v4966_v62, %v5289_v24  ;;  %v5295_v39 = vsel %vm5286_vm0, %v5293_v21, %v5294_v22  ;;  %5451 = vst [vmem:[%s7950_s9 + $0x90] sm:$0x3] %v5369_v17  ;;  %v5161_v40 = vmul.f32 %v5093_v9, %v7832_v36  ;;  %4692 = vmatpush1.bf16.msra.mxu0 %v6096_v49  ;;  %v1201_v62 = vld [vmem:[%s7406_s29 + $0x78] sm:$0xff]  ;;  %v1248_v15 = vld [vmem:[%s7406_s29 + $0x1f0] sm:$0xff] }
 0x295   : > { %v5417_v18 = vsel %vm5416_vm2, %v5400_v33, %v5367_v16  ;;  %v5402_v44 = vsel %vm5399_vm1, %v4968_v63, %v5295_v39  ;;  %v5239_v45 = vmul.f32 %v5181_v25, %v7828_v32  ;;  %v5291_v0 = vrot.slane %v5159_v31, 2  ;;  %4778 = vmatpush1.bf16.msra.mxu1 %v6098_v50  ;;  %4693 = vmatprep.subr.bf16.mxu0 %v6113_v53  ;;  %v1193_v53 = vld [vmem:[%s7406_s29 + $0x38] sm:$0xff]  ;;  %v1264_v24 = vld [vmem:[%s7406_s29 + $0x270] sm:$0xff] }
 0x296   : > { %v4967_v20 = vmax.f32 %v7815_v19, 0.0  ;;  %5433 = vst [vmem:[%s7950_s9] sm:$0xff] %v5417_v18  ;;  %v5419_v52 = vsel %vm5416_vm2, %v5402_v44, %v5369_v17  ;;  %v5189_v57 = vrot.slane %v6236_v3, %v7874_v30  ;;  %v5297_v49 = vrot.slane %v5161_v40, 2  ;;  %4779 = vmatprep.subr.bf16.mxu1 %v6115_v55  ;;  %v1241_v12 = vld [vmem:[%s7406_s29 + $0x1b8] sm:$0xff]  ;;  %v1272_v40 = vld [vmem:[%s7406_s29 + $0x2b0] sm:$0xff] }
 0x297   : > { %v4969_v61 = vmax.f32 %v7821_v26, 0.0  ;;  %5435 = vst [vmem:[%s7950_s9 + $0x10] sm:$0xff] %v5419_v52  ;;  %v5292_v32 = vsel %vm5286_vm0, %v5290_v23, %v5291_v0  ;;  %v5368_v50 = vrot.slane %v5239_v45, 2  ;;  %v6128_v19 = vcombine.low %v7891_v42, %v7894_v43  ;;  %v1249_v16 = vld [vmem:[%s7406_s29 + $0x1f8] sm:$0xff]  ;;  %v1256_v23 = vld [vmem:[%s7406_s29 + $0x230] sm:$0xff] }
 0x298   : > { %v5401_v63 = vsel %vm5399_vm1, %v4967_v20, %v5292_v32  ;;  %v5241_v55 = vmul.f32 %v5189_v57, %v7832_v36  ;;  %v5298_v1 = vsel %vm5286_vm0, %v5296_v28, %v5297_v49  ;;  %4694 = vmatpush1.bf16.msra.mxu0 %v6112_v51  ;;  %v6130_v26 = vcombine.low %v7905_v47, %v7908_v48  ;;  %v1208_v51 = vld [vmem:[%s7406_s29 + $0xb0] sm:$0xff]  ;;  %v1257_v31 = vld [vmem:[%s7406_s29 + $0x238] sm:$0xff] }
 0x299   : > { %v5418_v2 = vsel %vm5416_vm2, %v5401_v63, %v5368_v50  ;;  %5450 = vst [vmem:[%s7950_s9 + $0x88] sm:$0x3] %v5368_v50  ;;  %v5403_v3 = vsel %vm5399_vm1, %v4969_v61, %v5298_v1  ;;  %4780 = vmatpush1.bf16.msra.mxu1 %v6114_v54  ;;  %4695 = vmatprep.subr.bf16.mxu0 %v6129_v56  ;;  %v1224_v54 = vld [vmem:[%s7406_s29 + $0x130] sm:$0xff]  ;;  %v1265_v25 = vld [vmem:[%s7406_s29 + $0x278] sm:$0xff] }
 0x29a   : > { %v5637_v36 = vcombine.high %v1192_v58, %v1200_v59  ;;  %5434 = vst [vmem:[%s7950_s9 + $0x8] sm:$0xff] %v5418_v2  ;;  %v5370_v34 = vrot.slane %v5241_v55, 2  ;;  %4781 = vmatprep.subr.bf16.mxu1 %v6131_v60  ;;  %v5639_v35 = vcombine.high %v1193_v53, %v1201_v62  ;;  %v5636_v42 = vcombine.low %v1192_v58, %v1200_v59  ;;  %v1232_v56 = vld [vmem:[%s7406_s29 + $0x170] sm:$0xff]  ;;  %v1273_v44 = vld [vmem:[%s7406_s29 + $0x2b8] sm:$0xff] }
 0x29b   : > { %v5638_v43 = vcombine.low %v1193_v53, %v1201_v62  ;;  %v5653_v47 = vcombine.high %v1208_v51, %v1216_v4  ;;  %v5655_v48 = vcombine.high %v1209_v5, %v1217_v37  ;;  %v8008_v60 = vld [vmem:[%s8436_s1 + $0x8] ss:$16 sps:$4 sm:$0x3f]   ;;  %v5652_v8 = vcombine.low %v1208_v51, %v1216_v4  ;;  %v1281_v45 = vld [vmem:[%s7406_s29 + $0x2f8] sm:$0xff] }
 0x29c   : > { %v5420_v41 = vsel %vm5416_vm2, %v5403_v3, %v5370_v34  ;;  %5452 = vst [vmem:[%s7950_s9 + $0x98] sm:$0x3] %v5370_v34  ;;  %4696 = vmatpush1.bf16.msra.mxu0 %v6128_v19  ;;  %v5654_v9 = vcombine.low %v1209_v5, %v1217_v37  ;;  %v5669_v10 = vcombine.high %v1224_v54, %v1232_v56  ;;  %v1280_v18 = vld [vmem:[%s7406_s29 + $0x2f0] sm:$0xff]  ;;  %v1289_v59 = vld [vmem:[%s7406_s29 + $0x338] sm:$0xff] }
 0x29d   : > { %5436 = vst [vmem:[%s7950_s9 + $0x18] sm:$0xff] %v5420_v41  ;;  %4782 = vmatpush1.bf16.msra.mxu1 %v6130_v26  ;;  %4794 = vmatprep.subr.bf16.mxu0 %v5637_v36  ;;  %v5671_v13 = vcombine.high %v1225_v6, %v1233_v7  ;;  %v5668_v21 = vcombine.low %v1224_v54, %v1232_v56  ;;  %v1288_v49 = vld [vmem:[%s7406_s29 + $0x330] sm:$0xff]  ;;  %v1297_v61 = vld [vmem:[%s7406_s29 + $0x378] sm:$0xff] }
 0x29e   : > { %4880 = vmatprep.subr.bf16.mxu1 %v5639_v35  ;;  %v5670_v27 = vcombine.low %v1225_v6, %v1233_v7  ;;  %v5685_v22 = vcombine.high %v1240_v14, %v1248_v15  ;;  %v5687_v17 = vcombine.high %v1241_v12, %v1249_v16  ;;  %v5684_v28 = vcombine.low %v1240_v14, %v1248_v15  ;;  %v1296_v58 = vld [vmem:[%s7406_s29 + $0x370] sm:$0xff]  ;;  %v1305_v55 = vld [vmem:[%s7406_s29 + $0x3b8] sm:$0xff] }
 0x29f   : > { %4698 = vmatmul.mubr.bf16.vlgmr.msra.gmra.mrb[8].mxu0 %v8008_v60  ;;  %v5701_v33 = vcombine.high %v1256_v23, %v1264_v24  ;;  %v5703_v39 = vcombine.high %v1257_v31, %v1265_v25  ;;  %v5700_v0 = vcombine.low %v1256_v23, %v1264_v24  ;;  %v5702_v20 = vcombine.low %v1257_v31, %v1265_v25  ;;  %v1304_v62 = vld [vmem:[%s7406_s29 + $0x3b0] sm:$0xff]  ;;  %v1313_v1 = vld [vmem:[%s7406_s29 + $0x3f8] sm:$0xff] }
 0x2a0   : > { %4784 = vmatmul.mubr.bf16.vlgmr.msra.gmra.mrb[8].mxu1 %v8008_v60  ;;  %4795 = vmatpush1.bf16.msra.mxu0 %v5636_v42  ;;  %v5717_v52 = vcombine.high %v1272_v40, %v1280_v18  ;;  %v5719_v57 = vcombine.high %v1273_v44, %v1281_v45  ;;  %v5716_v32 = vcombine.low %v1272_v40, %v1280_v18  ;;  %v1312_v63 = vld [vmem:[%s7406_s29 + $0x3f0] sm:$0xff]  ;;  %v1321_v51 = vld [vmem:[%s7406_s29 + $0x438] sm:$0xff] }
 0x2a1   : > { %4881 = vmatpush1.bf16.msra.mxu1 %v5638_v43  ;;  %4796 = vmatprep.subr.bf16.mxu0 %v5653_v47  ;;  %v5718_v50 = vcombine.low %v1273_v44, %v1281_v45  ;;  %v5733_v19 = vcombine.high %v1288_v49, %v1296_v58  ;;  %v5735_v53 = vcombine.high %v1289_v59, %v1297_v61  ;;  %v1320_v34 = vld [vmem:[%s7406_s29 + $0x430] sm:$0xff]  ;;  %v1329_v4 = vld [vmem:[%s7406_s29 + $0x478] sm:$0xff] }
 0x2a2   : > { %4882 = vmatprep.subr.bf16.mxu1 %v5655_v48  ;;  %4826 = vmatprep.mubr.bf16.mxu0 %v7712_v11  ;;  %v5732_v26 = vcombine.low %v1288_v49, %v1296_v58  ;;  %v5734_v2 = vcombine.low %v1289_v59, %v1297_v61  ;;  %v5749_v3 = vcombine.high %v1304_v62, %v1312_v63  ;;  %v1328_v35 = vld [vmem:[%s7406_s29 + $0x470] sm:$0xff]  ;;  %v1337_v48 = vld [vmem:[%s7406_s29 + $0x4b8] sm:$0xff] }
 0x2a3   : > { %4912 = vmatprep.mubr.bf16.mxu1 %v7712_v11  ;;  %v5686_v11 = vcombine.low %v1241_v12, %v1249_v16  ;;  %v5751_v36 = vcombine.high %v1305_v55, %v1313_v1  ;;  %v5748_v5 = vcombine.low %v1304_v62, %v1312_v63  ;;  %v5750_v37 = vcombine.low %v1305_v55, %v1313_v1  ;;  %v1336_v43 = vld [vmem:[%s7406_s29 + $0x4b0] sm:$0xff]  ;;  %v1345_v54 = vld [vmem:[%s7406_s29 + $0x4f8] sm:$0xff] }
 0x2a4   : > { %4797 = vmatpush1.bf16.msra.mxu0 %v5652_v8  ;;  %v5765_v41 = vcombine.high %v1320_v34, %v1328_v35  ;;  %v5767_v42 = vcombine.high %v1321_v51, %v1329_v4  ;;  %v1344_v47 = vld [vmem:[%s7406_s29 + $0x4f0] sm:$0xff]  ;;  %v5764_v56 = vcombine.low %v1320_v34, %v1328_v35  ;;  %v5766_v6 = vcombine.low %v1321_v51, %v1329_v4  ;;  %v1361_v14 = vld [vmem:[%s7406_s29 + $0x578] sm:$0xff] }
 0x2a5   : > { %4883 = vmatpush1.bf16.msra.mxu1 %v5654_v9  ;;  %4798 = vmatprep.subr.bf16.mxu0 %v5669_v10  ;;  %v5781_v7 = vcombine.high %v1336_v43, %v1344_v47  ;;  %v5783_v8 = vcombine.high %v1337_v48, %v1345_v54  ;;  %v1352_v9 = vld [vmem:[%s7406_s29 + $0x530] sm:$0xff]  ;;  %v5780_v15 = vcombine.low %v1336_v43, %v1344_v47  ;;  %v1377_v23 = vld [vmem:[%s7406_s29 + $0x5f8] sm:$0xff] }
 0x2a6   : > { %4884 = vmatprep.subr.bf16.mxu1 %v5671_v13  ;;  %v1360_v10 = vld [vmem:[%s7406_s29 + $0x570] sm:$0xff]  ;;  %v1353_v13 = vld [vmem:[%s7406_s29 + $0x538] sm:$0xff]  ;;  %v5782_v12 = vcombine.low %v1337_v48, %v1345_v54 }
 0x2a7   : > { %v5797_v16 = vcombine.high %v1352_v9, %v1360_v10  ;;  %v5796_v24 = vcombine.low %v1352_v9, %v1360_v10  ;;  %v5798_v31 = vcombine.low %v1353_v13, %v1361_v14  ;;  %v1393_v40 = vld [vmem:[%s7406_s29 + $0x678] sm:$0xff] }
 0x2a8   : > { %4799 = vmatpush1.bf16.msra.mxu0 %v5668_v21  ;;  %v5799_v21 = vcombine.high %v1353_v13, %v1361_v14  ;;  %v1409_v49 = vld [vmem:[%s7406_s29 + $0x6f8] sm:$0xff] }
 0x2a9   : > { %4885 = vmatpush1.bf16.msra.mxu1 %v5670_v27  ;;  %4800 = vmatprep.subr.bf16.mxu0 %v5685_v22  ;;  %v1368_v27 = vld [vmem:[%s7406_s29 + $0x5b0] sm:$0xff]  ;;  %v1425_v62 = vld [vmem:[%s7406_s29 + $0x778] sm:$0xff] }
 0x2aa   : > { %4886 = vmatprep.subr.bf16.mxu1 %v5687_v17  ;;  %v1376_v22 = vld [vmem:[%s7406_s29 + $0x5f0] sm:$0xff]  ;;  %v1369_v17 = vld [vmem:[%s7406_s29 + $0x5b8] sm:$0xff] }
 0x2ab   : > { %v5813_v25 = vcombine.high %v1368_v27, %v1376_v22  ;;  %v5812_v18 = vcombine.low %v1368_v27, %v1376_v22  ;;  %v5814_v44 = vcombine.low %v1369_v17, %v1377_v23  ;;  %v1441_v34 = vld [vmem:[%s7406_s29 + $0x7f8] sm:$0xff] }
 0x2ac   : > { %4801 = vmatpush1.bf16.msra.mxu0 %v5684_v28  ;;  %v5815_v28 = vcombine.high %v1369_v17, %v1377_v23  ;;  %v1457_v43 = vld [vmem:[%s7406_s29 + $0x878] sm:$0xff] }
 0x2ad   : > { %4887 = vmatpush1.bf16.msra.mxu1 %v5686_v11  ;;  %4802 = vmatprep.subr.bf16.mxu0 %v5701_v33  ;;  %v1384_v11 = vld [vmem:[%s7406_s29 + $0x630] sm:$0xff]  ;;  %v1473_v9 = vld [vmem:[%s7406_s29 + $0x8f8] sm:$0xff] }
 0x2ae   : > { %4888 = vmatprep.subr.bf16.mxu1 %v5703_v39  ;;  %v1392_v33 = vld [vmem:[%s7406_s29 + $0x670] sm:$0xff]  ;;  %v1385_v39 = vld [vmem:[%s7406_s29 + $0x638] sm:$0xff] }
 0x2af   : > { %v5829_v45 = vcombine.high %v1384_v11, %v1392_v33  ;;  %v5828_v58 = vcombine.low %v1384_v11, %v1392_v33  ;;  %v5830_v59 = vcombine.low %v1385_v39, %v1393_v40  ;;  %v1489_v27 = vld [vmem:[%s7406_s29 + $0x978] sm:$0xff] }
 0x2b0   : > { %4803 = vmatpush1.bf16.msra.mxu0 %v5700_v0  ;;  %v5831_v0 = vcombine.high %v1385_v39, %v1393_v40  ;;  %v1505_v11 = vld [vmem:[%s7406_s29 + $0x9f8] sm:$0xff] }
 0x2b1   : > { %4889 = vmatpush1.bf16.msra.mxu1 %v5702_v20  ;;  %4804 = vmatprep.subr.bf16.mxu0 %v5717_v52  ;;  %v1400_v20 = vld [vmem:[%s7406_s29 + $0x6b0] sm:$0xff] }
 0x2b2   : > { %4890 = vmatprep.subr.bf16.mxu1 %v5719_v57  ;;  %v1408_v52 = vld [vmem:[%s7406_s29 + $0x6f0] sm:$0xff]  ;;  %v1401_v57 = vld [vmem:[%s7406_s29 + $0x6b8] sm:$0xff] }
 0x2b3   : > { %v5845_v61 = vcombine.high %v1400_v20, %v1408_v52  ;;  %v5844_v63 = vcombine.low %v1400_v20, %v1408_v52  ;;  %v5846_v55 = vcombine.low %v1401_v57, %v1409_v49 }
 0x2b4   : > { %4805 = vmatpush1.bf16.msra.mxu0 %v5716_v32  ;;  %v5847_v32 = vcombine.high %v1401_v57, %v1409_v49  ;;  %v1528_v49 = vld [vmem:[%s7406_s29 + $0xab0] sm:$0xff] }
 0x2b5   : > { %4891 = vmatpush1.bf16.msra.mxu1 %v5718_v50  ;;  %4806 = vmatprep.subr.bf16.mxu0 %v5733_v19  ;;  %v1416_v50 = vld [vmem:[%s7406_s29 + $0x730] sm:$0xff] }
 0x2b6   : > { %4892 = vmatprep.subr.bf16.mxu1 %v5735_v53  ;;  %v1424_v19 = vld [vmem:[%s7406_s29 + $0x770] sm:$0xff]  ;;  %v1417_v53 = vld [vmem:[%s7406_s29 + $0x738] sm:$0xff] }
 0x2b7   : > { %v5861_v1 = vcombine.high %v1416_v50, %v1424_v19  ;;  %v5860_v35 = vcombine.low %v1416_v50, %v1424_v19  ;;  %v5862_v51 = vcombine.low %v1417_v53, %v1425_v62 }
 0x2b8   : > { %4807 = vmatpush1.bf16.msra.mxu0 %v5732_v26  ;;  %v5863_v26 = vcombine.high %v1417_v53, %v1425_v62  ;;  %v1544_v62 = vld [vmem:[%s7406_s29 + $0xb30] sm:$0xff] }
 0x2b9   : > { %4893 = vmatpush1.bf16.msra.mxu1 %v5734_v2  ;;  %4808 = vmatprep.subr.bf16.mxu0 %v5749_v3  ;;  %v1432_v2 = vld [vmem:[%s7406_s29 + $0x7b0] sm:$0xff] }
 0x2ba   : > { %4894 = vmatprep.subr.bf16.mxu1 %v5751_v36  ;;  %v1440_v3 = vld [vmem:[%s7406_s29 + $0x7f0] sm:$0xff]  ;;  %v1433_v36 = vld [vmem:[%s7406_s29 + $0x7b8] sm:$0xff] }
 0x2bb   : > { %v5877_v4 = vcombine.high %v1432_v2, %v1440_v3  ;;  %v5876_v47 = vcombine.low %v1432_v2, %v1440_v3  ;;  %v5878_v48 = vcombine.low %v1433_v36, %v1441_v34 }
 0x2bc   : > { %4809 = vmatpush1.bf16.msra.mxu0 %v5748_v5  ;;  %v5879_v5 = vcombine.high %v1433_v36, %v1441_v34 }
 0x2bd   : > { %4895 = vmatpush1.bf16.msra.mxu1 %v5750_v37  ;;  %4810 = vmatprep.subr.bf16.mxu0 %v5765_v41  ;;  %v1448_v37 = vld [vmem:[%s7406_s29 + $0x830] sm:$0xff] }
 0x2be   : > { %4896 = vmatprep.subr.bf16.mxu1 %v5767_v42  ;;  %v1456_v41 = vld [vmem:[%s7406_s29 + $0x870] sm:$0xff]  ;;  %v1449_v42 = vld [vmem:[%s7406_s29 + $0x838] sm:$0xff] }
 0x2bf   : > { %v5893_v54 = vcombine.high %v1448_v37, %v1456_v41  ;;  %v5892_v10 = vcombine.low %v1448_v37, %v1456_v41  ;;  %v5894_v13 = vcombine.low %v1449_v42, %v1457_v43  ;;  %v1561_v41 = vld [vmem:[%s7406_s29 + $0xbb8] sm:$0xff] }
 0x2c0   : > { %4811 = vmatpush1.bf16.msra.mxu0 %v5764_v56  ;;  %v5895_v56 = vcombine.high %v1449_v42, %v1457_v43  ;;  %v1569_v42 = vld [vmem:[%s7406_s29 + $0xbf8] sm:$0xff] }
 0x2c1   : > { %4897 = vmatpush1.bf16.msra.mxu1 %v5766_v6  ;;  %4812 = vmatprep.subr.bf16.mxu0 %v5781_v7  ;;  %v1464_v6 = vld [vmem:[%s7406_s29 + $0x8b0] sm:$0xff] }
 0x2c2   : > { %4898 = vmatprep.subr.bf16.mxu1 %v5783_v8  ;;  %v1472_v7 = vld [vmem:[%s7406_s29 + $0x8f0] sm:$0xff]  ;;  %v1465_v8 = vld [vmem:[%s7406_s29 + $0x8b8] sm:$0xff] }
 0x2c3   : > { %v5909_v14 = vcombine.high %v1464_v6, %v1472_v7  ;;  %v5908_v22 = vcombine.low %v1464_v6, %v1472_v7  ;;  %v5910_v17 = vcombine.low %v1465_v8, %v1473_v9 }
 0x2c4   : > { %4813 = vmatpush1.bf16.msra.mxu0 %v5780_v15  ;;  %v5911_v15 = vcombine.high %v1465_v8, %v1473_v9 }
 0x2c5   : > { %4899 = vmatpush1.bf16.msra.mxu1 %v5782_v12  ;;  %4814 = vmatprep.subr.bf16.mxu0 %v5797_v16  ;;  %v1480_v12 = vld [vmem:[%s7406_s29 + $0x930] sm:$0xff] }
 0x2c6   : > { %4900 = vmatprep.subr.bf16.mxu1 %v5799_v21  ;;  %v1488_v16 = vld [vmem:[%s7406_s29 + $0x970] sm:$0xff]  ;;  %v1481_v21 = vld [vmem:[%s7406_s29 + $0x938] sm:$0xff] }
 0x2c7   : > { %v5925_v23 = vcombine.high %v1480_v12, %v1488_v16  ;;  %v5926_v33 = vcombine.low %v1481_v21, %v1489_v27 }
 0x2c8   : > { %4815 = vmatpush1.bf16.msra.mxu0 %v5796_v24  ;;  %v5927_v24 = vcombine.high %v1481_v21, %v1489_v27  ;;  %v1585_v21 = vld [vmem:[%s7406_s29 + $0xc78] sm:$0xff] }
 0x2c9   : > { %4901 = vmatpush1.bf16.msra.mxu1 %v5798_v31  ;;  %4816 = vmatprep.subr.bf16.mxu0 %v5813_v25  ;;  %v1496_v31 = vld [vmem:[%s7406_s29 + $0x9b0] sm:$0xff] }
 0x2ca   : > { %4902 = vmatprep.subr.bf16.mxu1 %v5815_v28  ;;  %v1504_v25 = vld [vmem:[%s7406_s29 + $0x9f0] sm:$0xff]  ;;  %v1497_v28 = vld [vmem:[%s7406_s29 + $0x9b8] sm:$0xff] }
 0x2cb   : > { %v5941_v39 = vcombine.high %v1496_v31, %v1504_v25  ;;  %v5943_v40 = vcombine.high %v1497_v28, %v1505_v11  ;;  %v5940_v20 = vcombine.low %v1496_v31, %v1504_v25  ;;  %v1600_v31 = vld [vmem:[%s7406_s29 + $0xcf0] sm:$0xff]  ;;  %v1593_v25 = vld [vmem:[%s7406_s29 + $0xcb8] sm:$0xff] }
 0x2cc   : > { %4817 = vmatpush1.bf16.msra.mxu0 %v5812_v18  ;;  %v1512_v18 = vld [vmem:[%s7406_s29 + $0xa30] sm:$0xff] }
 0x2cd   : > { %4903 = vmatpush1.bf16.msra.mxu1 %v5814_v44  ;;  %4818 = vmatprep.subr.bf16.mxu0 %v5829_v45  ;;  %v1520_v44 = vld [vmem:[%s7406_s29 + $0xa70] sm:$0xff]  ;;  %v1513_v45 = vld [vmem:[%s7406_s29 + $0xa38] sm:$0xff] }
 0x2ce   : > { %4904 = vmatprep.subr.bf16.mxu1 %v5831_v0  ;;  %v1521_v0 = vld [vmem:[%s7406_s29 + $0xa78] sm:$0xff]  ;;  %v5957_v52 = vcombine.high %v1512_v18, %v1520_v44 }
 0x2cf   : > { %v5959_v57 = vcombine.high %v1513_v45, %v1521_v0  ;;  %v5958_v50 = vcombine.low %v1513_v45, %v1521_v0  ;;  %v1609_v45 = vld [vmem:[%s7406_s29 + $0xd38] sm:$0xff] }
 0x2d0   : > { %4819 = vmatpush1.bf16.msra.mxu0 %v5828_v58  ;;  %v1536_v58 = vld [vmem:[%s7406_s29 + $0xaf0] sm:$0xff]  ;;  %v1617_v0 = vld [vmem:[%s7406_s29 + $0xd78] sm:$0xff] }
 0x2d1   : > { %4905 = vmatpush1.bf16.msra.mxu1 %v5830_v59  ;;  %4820 = vmatprep.subr.bf16.mxu0 %v5845_v61  ;;  %v1529_v59 = vld [vmem:[%s7406_s29 + $0xab8] sm:$0xff]  ;;  %v5973_v19 = vcombine.high %v1528_v49, %v1536_v58 }
 0x2d2   : > { %4906 = vmatprep.subr.bf16.mxu1 %v5847_v32  ;;  %v1537_v61 = vld [vmem:[%s7406_s29 + $0xaf8] sm:$0xff]  ;;  %v5956_v32 = vcombine.low %v1512_v18, %v1520_v44  ;;  %v1616_v18 = vld [vmem:[%s7406_s29 + $0xd70] sm:$0xff] }
 0x2d3   : > { %v5975_v53 = vcombine.high %v1529_v59, %v1537_v61  ;;  %v5974_v2 = vcombine.low %v1529_v59, %v1537_v61 }
 0x2d4   : > { %4821 = vmatpush1.bf16.msra.mxu0 %v5844_v63  ;;  %v1552_v63 = vld [vmem:[%s7406_s29 + $0xb70] sm:$0xff] }
 0x2d5   : > { %4907 = vmatpush1.bf16.msra.mxu1 %v5846_v55  ;;  %4822 = vmatprep.subr.bf16.mxu0 %v5861_v1  ;;  %v1545_v55 = vld [vmem:[%s7406_s29 + $0xb38] sm:$0xff]  ;;  %v5989_v3 = vcombine.high %v1544_v62, %v1552_v63 }
 0x2d6   : > { %4908 = vmatprep.subr.bf16.mxu1 %v5863_v26  ;;  %v1553_v1 = vld [vmem:[%s7406_s29 + $0xb78] sm:$0xff]  ;;  %v5972_v26 = vcombine.low %v1528_v49, %v1536_v58 }
 0x2d7   : > { %v5991_v34 = vcombine.high %v1545_v55, %v1553_v1  ;;  %v5990_v6 = vcombine.low %v1545_v55, %v1553_v1  ;;  %v1633_v55 = vld [vmem:[%s7406_s29 + $0xdf8] sm:$0xff] }
 0x2d8   : > { %4823 = vmatpush1.bf16.msra.mxu0 %v5860_v35  ;;  %v1560_v35 = vld [vmem:[%s7406_s29 + $0xbb0] sm:$0xff] }
 0x2d9   : > { %4909 = vmatpush1.bf16.msra.mxu1 %v5862_v51  ;;  %4824 = vmatprep.subr.bf16.mxu0 %v5877_v4  ;;  %v1568_v51 = vld [vmem:[%s7406_s29 + $0xbf0] sm:$0xff] }
 0x2da   : > { %4910 = vmatprep.subr.bf16.mxu1 %v5879_v5  ;;  %v6005_v7 = vcombine.high %v1560_v35, %v1568_v51  ;;  %v6004_v27 = vcombine.low %v1560_v35, %v1568_v51  ;;  %v1641_v51 = vld [vmem:[%s7406_s29 + $0xe38] sm:$0xff] }
 0x2dc   : > { %4825 = vmatpush1.bf16.msra.mxu0 %v5876_v47 }
 0x2dd   : > { %4911 = vmatpush1.bf16.msra.mxu1 %v5878_v48  ;;  %4837 = vmatprep.subr.bf16.mxu0 %v5893_v54  ;;  %v5988_v48 = vcombine.low %v1544_v62, %v1552_v63  ;;  %v1625_v63 = vld [vmem:[%s7406_s29 + $0xdb8] sm:$0xff] }
 0x2de   : > { %4923 = vmatprep.subr.bf16.mxu1 %v5895_v56  ;;  %v6071_v35 = vcombine.high %v1625_v63, %v1633_v55 }
 0x2df   : > { %4827 = vmatmul.mubr.bf16.vlgmr.msra.gmra.mrb[12].mxu0 %v7779_v38 }
 0x2e0   : > { %4838 = vmatpush1.bf16.msra.mxu0 %v5892_v10  ;;  %4913 = vmatmul.mubr.bf16.vlgmr.msra.gmra.mrb[12].mxu1 %v7779_v38  ;;  %v5924_v38 = vcombine.low %v1480_v12, %v1488_v16  ;;  %v1577_v16 = vld [vmem:[%s7406_s29 + $0xc38] sm:$0xff] }
 0x2e1   : > { %4924 = vmatpush1.bf16.msra.mxu1 %v5894_v13  ;;  %4839 = vmatprep.subr.bf16.mxu0 %v5909_v14  ;;  %v6007_v13 = vcombine.high %v1561_v41, %v1569_v42  ;;  %v1576_v14 = vld [vmem:[%s7406_s29 + $0xc30] sm:$0xff] }
 0x2e2   : > { %4925 = vmatprep.subr.bf16.mxu1 %v5911_v15  ;;  %4869 = vmatprep.mubr.bf16.mxu0 %v7790_v46  ;;  %v1584_v15 = vld [vmem:[%s7406_s29 + $0xc70] sm:$0xff] }
 0x2e3   : > { %4955 = vmatprep.mubr.bf16.mxu1 %v7790_v46  ;;  %v5942_v46 = vcombine.low %v1497_v28, %v1505_v11  ;;  %v1601_v28 = vld [vmem:[%s7406_s29 + $0xcf8] sm:$0xff]  ;;  %v6020_v11 = vcombine.low %v1576_v14, %v1584_v15 }
 0x2e4   : > { %4840 = vmatpush1.bf16.msra.mxu0 %v5908_v22  ;;  %v6006_v22 = vcombine.low %v1561_v41, %v1569_v42  ;;  %v6038_v58 = vcombine.low %v1593_v25, %v1601_v28  ;;  %v8145_v41 = vld [vmem:[%s7406_s29 + $0xeb0] sm:$0xff] }
 0x2e5   : > { %4926 = vmatpush1.bf16.msra.mxu1 %v5910_v17  ;;  %4841 = vmatprep.subr.bf16.mxu0 %v5925_v23  ;;  %v6021_v17 = vcombine.high %v1576_v14, %v1584_v15  ;;  %v6023_v23 = vcombine.high %v1577_v16, %v1585_v21  ;;  %v8148_v42 = vld [vmem:[%s7406_s29 + $0xef0] sm:$0xff]  ;;  %v8166_v15 = vld [vmem:[%s7406_s29 + $0xf78] sm:$0xff] }
 0x2e6   : > { %4927 = vmatprep.subr.bf16.mxu1 %v5927_v24  ;;  %v1592_v24 = vld [vmem:[%s7406_s29 + $0xcb0] sm:$0xff] }
 0x2e8   : > { %4842 = vmatpush1.bf16.msra.mxu0 %v5924_v38  ;;  %v6022_v38 = vcombine.low %v1577_v16, %v1585_v21  ;;  %v8169_v16 = vld [vmem:[%s7406_s29 + $0xfb0] sm:$0xff] }
 0x2e9   : > { %4928 = vmatpush1.bf16.msra.mxu1 %v5926_v33  ;;  %4843 = vmatprep.subr.bf16.mxu0 %v5941_v39  ;;  %v6037_v33 = vcombine.high %v1592_v24, %v1600_v31  ;;  %v6039_v39 = vcombine.high %v1593_v25, %v1601_v28  ;;  %v8172_v21 = vld [vmem:[%s7406_s29 + $0xff0] sm:$0xff]  ;;  %v6101_v25 = vcombine.high %v8145_v41, %v8148_v42 }
 0x2ea   : > { %4929 = vmatprep.subr.bf16.mxu1 %v5943_v40  ;;  %v1608_v40 = vld [vmem:[%s7406_s29 + $0xd30] sm:$0xff] }
 0x2eb   : > { %v6053_v59 = vcombine.high %v1608_v40, %v1616_v18  ;;  %v6052_v1 = vcombine.low %v1608_v40, %v1616_v18 }
 0x2ec   : > { %4844 = vmatpush1.bf16.msra.mxu0 %v5940_v20 }
 0x2ed   : > { %4930 = vmatpush1.bf16.msra.mxu1 %v5942_v46  ;;  %4845 = vmatprep.subr.bf16.mxu0 %v5957_v52  ;;  %v6036_v52 = vcombine.low %v1592_v24, %v1600_v31  ;;  %v8177_v24 = vld [vmem:[%s7406_s29 + $0xfb8] sm:$0xff] }
 0x2ee   : > { %4931 = vmatprep.subr.bf16.mxu1 %v5959_v57  ;;  %v8180_v31 = vld [vmem:[%s7406_s29 + $0xff8] sm:$0xff] }
 0x2f0   : > { %4846 = vmatpush1.bf16.msra.mxu0 %v5956_v32 }
 0x2f1   : > { %4932 = vmatpush1.bf16.msra.mxu1 %v5958_v50  ;;  %4847 = vmatprep.subr.bf16.mxu0 %v5973_v19  ;;  %v6055_v50 = vcombine.high %v1609_v45, %v1617_v0  ;;  %v1624_v19 = vld [vmem:[%s7406_s29 + $0xdb0] sm:$0xff] }
 0x2f2   : > { %v8100_v36 = vpop.f32.mrb[4].mxu0  ;;  %4933 = vmatprep.subr.bf16.mxu1 %v5975_v53  ;;  %v8105_v5 = vpop.f32.mrb[4].mxu1  ;;  %v1632_v53 = vld [vmem:[%s7406_s29 + $0xdf0] sm:$0xff] }
 0x2f3   : > { %v6140_v4 = vmul.f32 -1.442695, %v8100_v36  ;;  %v8107_v37 = vpop.f32.mrb[5].mxu0  ;;  %v6142_v43 = vmul.f32 -1.442695, %v8105_v5  ;;  %v8113_v54 = vpop.f32.mrb[5].mxu1 }
 0x2f4   : > { %v6141_v47 = vmul.f32 -1.442695, %v8107_v37  ;;  %4848 = vmatpush1.bf16.msra.mxu0 %v5972_v26  ;;  %v8115_v56 = vpop.f32.mrb[6].mxu0  ;;  %v6143_v8 = vmul.f32 -1.442695, %v8113_v54  ;;  %v8118_v9 = vpop.f32.mrb[6].mxu1  ;;  %v6054_v26 = vcombine.low %v1609_v45, %v1617_v0 }
 0x2f5   : > { %6237 = vpow2.f32 %v6140_v4  ;;  %4934 = vmatpush1.bf16.msra.mxu1 %v5974_v2  ;;  %4849 = vmatprep.subr.bf16.mxu0 %v5989_v3  ;;  %v8120_v10 = vpop.f32.mrb[7].mxu0  ;;  %v8124_v12 = vpop.f32.mrb[7].mxu1  ;;  %v6069_v2 = vcombine.high %v1624_v19, %v1632_v53  ;;  %v1640_v3 = vld [vmem:[%s7406_s29 + $0xe30] sm:$0xff]  ;;  %v1649_v4 = vld [vmem:[%s7406_s29 + $0xe78] sm:$0xff] }
 0x2f6   : > { %6239 = vpow2.f32 %v6142_v43  ;;  %4935 = vmatprep.subr.bf16.mxu1 %v5991_v34  ;;  %v1648_v34 = vld [vmem:[%s7406_s29 + $0xe70] sm:$0xff]  ;;  %v8151_v43 = vld [vmem:[%s7406_s29 + $0xeb8] sm:$0xff] }
 0x2f7   : > { %6241 = vpow2.f32 %v6141_v47  ;;  %v8154_v47 = vld [vmem:[%s7406_s29 + $0xef8] sm:$0xff]  ;;  %v6085_v14 = vcombine.high %v1640_v3, %v1648_v34 }
 0x2f8   : > { %6243 = vpow2.f32 %v6143_v8  ;;  %4850 = vmatpush1.bf16.msra.mxu0 %v5988_v48  ;;  %v6068_v48 = vcombine.low %v1624_v19, %v1632_v53  ;;  %v8163_v8 = vld [vmem:[%s7406_s29 + $0xf38] sm:$0xff]  ;;  %v6102_v28 = vcombine.low %v8151_v43, %v8154_v47 }
 0x2f9   : > { %4936 = vmatpush1.bf16.msra.mxu1 %v5990_v6  ;;  %4851 = vmatprep.subr.bf16.mxu0 %v6005_v7  ;;  %v8157_v6 = vld [vmem:[%s7406_s29 + $0xf30] sm:$0xff]  ;;  %v6118_v40 = vcombine.low %v8163_v8, %v8166_v15  ;;  %v6119_v18 = vcombine.high %v8163_v8, %v8166_v15 }
 0x2fa   : > { %4937 = vmatprep.subr.bf16.mxu1 %v6007_v13  ;;  %v8160_v7 = vld [vmem:[%s7406_s29 + $0xf70] sm:$0xff]  ;;  %v6070_v13 = vcombine.low %v1625_v63, %v1633_v55 }
 0x2fc   : > { %4852 = vmatpush1.bf16.msra.mxu0 %v6004_v27  ;;  %v6084_v27 = vcombine.low %v1640_v3, %v1648_v34 }
 0x2fd   : > { %4938 = vmatpush1.bf16.msra.mxu1 %v6006_v22  ;;  %4853 = vmatprep.subr.bf16.mxu0 %v6021_v17  ;;  %v6086_v22 = vcombine.low %v1641_v51, %v1649_v4  ;;  %v6087_v17 = vcombine.high %v1641_v51, %v1649_v4 }
 0x2fe   : > { %4939 = vmatprep.subr.bf16.mxu1 %v6023_v23  ;;  %v6100_v23 = vcombine.low %v8145_v41, %v8148_v42 }
 0x2ff   : > { %v6238_v44 = vpop.eup %6237 }
 0x300   : > { %v6240_v20 = vpop.eup %6239  ;;  %v5034_v46 = vadd.f32 1.0, %v6238_v44  ;;  %4854 = vmatpush1.bf16.msra.mxu0 %v6020_v11  ;;  %v6103_v11 = vcombine.high %v8151_v43, %v8154_v47  ;;  %v6133_v44 = vcombine.high %v8169_v16, %v8172_v21 }
 0x301   : > { %v6242_v57 = vpop.eup %6241  ;;  %v5036_v49 = vadd.f32 1.0, %v6240_v20  ;;  %4940 = vmatpush1.bf16.msra.mxu1 %v6022_v38  ;;  %4855 = vmatprep.subr.bf16.mxu0 %v6037_v33  ;;  %v6116_v38 = vcombine.low %v8157_v6, %v8160_v7 }
 0x302   : > { %v6244_v61 = vpop.eup %6243  ;;  %6245 = vrcp.f32 %v5034_v46  ;;  %v5035_v32 = vadd.f32 1.0, %v6242_v57  ;;  %4941 = vmatprep.subr.bf16.mxu1 %v6039_v39  ;;  %v6117_v39 = vcombine.high %v8157_v6, %v8160_v7  ;;  %v6135_v46 = vcombine.high %v8177_v24, %v8180_v31 }
 0x303   : > { %6247 = vrcp.f32 %v5036_v49  ;;  %v5037_v62 = vadd.f32 1.0, %v6244_v61  ;;  %v4970_v57 = vmax.f32 %v8100_v36, 0.0  ;;  %v4972_v49 = vmax.f32 %v8105_v5, 0.0 }
 0x304   : > { %6249 = vrcp.f32 %v5035_v32  ;;  %4856 = vmatpush1.bf16.msra.mxu0 %v6036_v52 }
 0x305   : > { %6251 = vrcp.f32 %v5037_v62  ;;  %4942 = vmatpush1.bf16.msra.mxu1 %v6038_v58  ;;  %4857 = vmatprep.subr.bf16.mxu0 %v6053_v59 }
 0x306   : > { %4943 = vmatprep.subr.bf16.mxu1 %v6055_v50 }
 0x308   : > { %4858 = vmatpush1.bf16.msra.mxu0 %v6052_v1 }
 0x309   : > { %4944 = vmatpush1.bf16.msra.mxu1 %v6054_v26  ;;  %4859 = vmatprep.subr.bf16.mxu0 %v6069_v2 }
 0x30a   : > { %4945 = vmatprep.subr.bf16.mxu1 %v6071_v35 }
 0x30c   : > { %v6246_v33 = vpop.eup %6245  ;;  %4860 = vmatpush1.bf16.msra.mxu0 %v6068_v48 }
 0x30d   : > { %v6248_v45 = vpop.eup %6247  ;;  %v5097_v0 = vrot.slane %v6246_v33, %v7872_v29  ;;  %v5193_v20 = vrot.slane %v6246_v33, %v7874_v30  ;;  %4946 = vmatpush1.bf16.msra.mxu1 %v6070_v13  ;;  %4861 = vmatprep.subr.bf16.mxu0 %v6085_v14 }
 0x30e   : > { %v6250_v52 = vpop.eup %6249  ;;  %v5105_v58 = vrot.slane %v6248_v45, %v7872_v29  ;;  %v5201_v59 = vrot.slane %v6248_v45, %v7874_v30  ;;  %4947 = vmatprep.subr.bf16.mxu1 %v6087_v17  ;;  %v4971_v17 = vmax.f32 %v8107_v37, 0.0 }
 0x30f   : > { %v6252_v61 = vpop.eup %6251  ;;  %v5146_v32 = vmul.f32 %v5097_v0, %v8100_v36  ;;  %v5101_v50 = vrot.slane %v6250_v52, %v7872_v29  ;;  %v5162_v19 = vmul.f32 %v5097_v0, %v8115_v56  ;;  %v5242_v53 = vmul.f32 %v5193_v20, %v8115_v56 }
 0x310   : > { %v5148_v62 = vmul.f32 %v5105_v58, %v8105_v5  ;;  %v5109_v63 = vrot.slane %v6252_v61, %v7872_v29  ;;  %v5164_v55 = vmul.f32 %v5105_v58, %v8118_v9  ;;  %v5244_v1 = vmul.f32 %v5201_v59, %v8118_v9  ;;  %4862 = vmatpush1.bf16.msra.mxu0 %v6084_v27 }
 0x311   : > { %v5299_v26 = vrot.slane %v5146_v32, 2  ;;  %v5147_v2 = vmul.f32 %v5101_v50, %v8107_v37  ;;  %v5300_v36 = vrot.slane %v5162_v19, 2  ;;  %v5371_v3 = vrot.slane %v5242_v53, 2  ;;  %4948 = vmatpush1.bf16.msra.mxu1 %v6086_v22  ;;  %4863 = vmatprep.subr.bf16.mxu0 %v6101_v25 }
 0x312   : > { %v5305_v34 = vrot.slane %v5148_v62, 2  ;;  %v5149_v56 = vmul.f32 %v5109_v63, %v8113_v54  ;;  %v5306_v5 = vrot.slane %v5164_v55, 2  ;;  %v5373_v35 = vrot.slane %v5244_v1, 2  ;;  %4949 = vmatprep.subr.bf16.mxu1 %v6103_v11 }
 0x313   : > { %v5302_v51 = vrot.slane %v5147_v2, 2  ;;  %v5301_v4 = vsel %vm5286_vm0, %v5299_v26, %v5300_v36  ;;  %5453 = vst [vmem:[%s7950_s9 + $0xa0] sm:$0x3] %v5371_v3  ;;  %v5163_v9 = vmul.f32 %v5101_v50, %v8120_v10  ;;  %v5197_v41 = vrot.slane %v6250_v52, %v7874_v30 }
 0x314   : > { %v5308_v42 = vrot.slane %v5149_v56, 2  ;;  %v5404_v43 = vsel %vm5399_vm1, %v4970_v57, %v5301_v4  ;;  %v5307_v47 = vsel %vm5286_vm0, %v5305_v34, %v5306_v5  ;;  %5455 = vst [vmem:[%s7950_s9 + $0xb0] sm:$0x3] %v5373_v35  ;;  %v5165_v48 = vmul.f32 %v5109_v63, %v8124_v12  ;;  %4864 = vmatpush1.bf16.msra.mxu0 %v6100_v23 }
 0x315   : > { %v5421_v13 = vsel %vm5416_vm2, %v5404_v43, %v5371_v3  ;;  %v5406_v14 = vsel %vm5399_vm1, %v4972_v49, %v5307_v47  ;;  %v5243_v27 = vmul.f32 %v5197_v41, %v8120_v10  ;;  %v5303_v22 = vrot.slane %v5163_v9, 2  ;;  %4950 = vmatpush1.bf16.msra.mxu1 %v6102_v28  ;;  %4865 = vmatprep.subr.bf16.mxu0 %v6117_v39 }
 0x316   : > { %5437 = vst [vmem:[%s7950_s9 + $0x20] sm:$0xff] %v5421_v13  ;;  %v5423_v25 = vsel %vm5416_vm2, %v5406_v14, %v5373_v35  ;;  %v5205_v11 = vrot.slane %v6252_v61, %v7874_v30  ;;  %v5309_v33 = vrot.slane %v5165_v48, 2  ;;  %4951 = vmatprep.subr.bf16.mxu1 %v6119_v18  ;;  %v4973_v23 = vmax.f32 %v8113_v54, 0.0 }
 0x317   : > { %5439 = vst [vmem:[%s7950_s9 + $0x30] sm:$0xff] %v5423_v25  ;;  %v5304_v45 = vsel %vm5286_vm0, %v5302_v51, %v5303_v22  ;;  %v5372_v10 = vrot.slane %v5243_v27, 2  ;;  %v6132_v18 = vcombine.low %v8169_v16, %v8172_v21 }
 0x318   : > { %v5405_v28 = vsel %vm5399_vm1, %v4971_v17, %v5304_v45  ;;  %v5245_v37 = vmul.f32 %v5205_v11, %v8124_v12  ;;  %v5310_v39 = vsel %vm5286_vm0, %v5308_v42, %v5309_v33  ;;  %4866 = vmatpush1.bf16.msra.mxu0 %v6116_v38  ;;  %v6134_v12 = vcombine.low %v8177_v24, %v8180_v31 }
 0x319   : > { %v5422_v54 = vsel %vm5416_vm2, %v5405_v28, %v5372_v10  ;;  %5454 = vst [vmem:[%s7950_s9 + $0xa8] sm:$0x3] %v5372_v10  ;;  %v5407_v0 = vsel %vm5399_vm1, %v4973_v23, %v5310_v39  ;;  %4952 = vmatpush1.bf16.msra.mxu1 %v6118_v40  ;;  %4867 = vmatprep.subr.bf16.mxu0 %v6133_v44 }
 0x31a   : > { %5438 = vst [vmem:[%s7950_s9 + $0x28] sm:$0xff] %v5422_v54  ;;  %v5374_v6 = vrot.slane %v5245_v37, 2  ;;  %4953 = vmatprep.subr.bf16.mxu1 %v6135_v46 }
 0x31c   : > { %v5424_v7 = vsel %vm5416_vm2, %v5407_v0, %v5374_v6  ;;  %5456 = vst [vmem:[%s7950_s9 + $0xb8] sm:$0x3] %v5374_v6  ;;  %4868 = vmatpush1.bf16.msra.mxu0 %v6132_v18 }
 0x31d   : > { %5440 = vst [vmem:[%s7950_s9 + $0x38] sm:$0xff] %v5424_v7  ;;  %4954 = vmatpush1.bf16.msra.mxu1 %v6134_v12 }
 0x31f   : > { %4870 = vmatmul.mubr.bf16.vlgmr.msra.gmra.mrb[12].mxu0 %v8008_v60 }
 0x320   : > { %4956 = vmatmul.mubr.bf16.vlgmr.msra.gmra.mrb[12].mxu1 %v8008_v60 }
 0x372   : > { %v4699_v8 = vpop.f32.mrb[8].mxu0 }
 0x373   : > { %v6144_v15 = vmul.f32 -1.442695, %v4699_v8  ;;  %v8262_v16 = vpop.f32.mrb[8].mxu1  ;;  %v8264_v21 = vpop.f32.mrb[9].mxu0  ;;  %v4974_v1 = vmax.f32 %v4699_v8, 0.0 }
 0x374   : > { %v6146_v38 = vmul.f32 -1.442695, %v8262_v16  ;;  %v6145_v24 = vmul.f32 -1.442695, %v8264_v21  ;;  %v8268_v31 = vpop.f32.mrb[9].mxu1  ;;  %v4703_v40 = vpop.f32.mrb[10].mxu0 }
 0x375   : > { %6253 = vpow2.f32 %v6144_v15  ;;  %v6147_v44 = vmul.f32 -1.442695, %v8268_v31  ;;  %v4789_v20 = vpop.f32.mrb[10].mxu1  ;;  %v4705_v46 = vpop.f32.mrb[11].mxu0  ;;  %v4976_v26 = vmax.f32 %v8262_v16, 0.0  ;;  %v4975_v0 = vmax.f32 %v8264_v21, 0.0 }
 0x376   : > { %6255 = vpow2.f32 %v6146_v38  ;;  %v8271_v60 = vpop.f32.mrb[11].mxu1 }
 0x377   : > { %6257 = vpow2.f32 %v6145_v24 }
 0x378   : > { %6259 = vpow2.f32 %v6147_v44 }
 0x37f   : > { %v6254_v52 = vpop.eup %6253 }
 0x380   : > { %v6256_v57 = vpop.eup %6255  ;;  %v5038_v49 = vadd.f32 1.0, %v6254_v52 }
 0x381   : > { %v6258_v58 = vpop.eup %6257  ;;  %v5040_v59 = vadd.f32 1.0, %v6256_v57 }
 0x382   : > { %v6260_v61 = vpop.eup %6259  ;;  %6261 = vrcp.f32 %v5038_v49  ;;  %v5039_v32 = vadd.f32 1.0, %v6258_v58 }
 0x383   : > { %6263 = vrcp.f32 %v5040_v59  ;;  %v5041_v50 = vadd.f32 1.0, %v6260_v61 }
 0x384   : > { %6265 = vrcp.f32 %v5039_v32 }
 0x385   : > { %6267 = vrcp.f32 %v5041_v50 }
 0x38c   : > { %v6262_v19 = vpop.eup %6261 }
 0x38d   : > { %v6264_v53 = vpop.eup %6263  ;;  %v5113_v62 = vrot.slane %v6262_v19, %v7872_v29  ;;  %v5209_v63 = vrot.slane %v6262_v19, %v7874_v30 }
 0x38e   : > { %v6266_v55 = vpop.eup %6265  ;;  %v5121_v2 = vrot.slane %v6264_v53, %v7872_v29  ;;  %v5217_v36 = vrot.slane %v6264_v53, %v7874_v30 }
 0x38f   : > { %v6268_v3 = vpop.eup %6267  ;;  %v5150_v34 = vmul.f32 %v5113_v62, %v4699_v8  ;;  %v5117_v56 = vrot.slane %v6266_v55, %v7872_v29  ;;  %v5166_v5 = vmul.f32 %v5113_v62, %v4703_v40  ;;  %v5246_v35 = vmul.f32 %v5209_v63, %v4703_v40 }
 0x390   : > { %v5152_v51 = vmul.f32 %v5121_v2, %v8262_v16  ;;  %v5125_v4 = vrot.slane %v6268_v3, %v7872_v29  ;;  %v5168_v9 = vmul.f32 %v5121_v2, %v4789_v20  ;;  %v5248_v41 = vmul.f32 %v5217_v36, %v4789_v20 }
 0x391   : > { %v5311_v42 = vrot.slane %v5150_v34, 2  ;;  %v5151_v43 = vmul.f32 %v5117_v56, %v8264_v21  ;;  %v5312_v47 = vrot.slane %v5166_v5, 2  ;;  %v5375_v48 = vrot.slane %v5246_v35, 2 }
 0x392   : > { %v5317_v13 = vrot.slane %v5152_v51, 2  ;;  %v5153_v14 = vmul.f32 %v5125_v4, %v8268_v31  ;;  %v5318_v27 = vrot.slane %v5168_v9, 2  ;;  %v5377_v22 = vrot.slane %v5248_v41, 2 }
 0x393   : > { %v5314_v17 = vrot.slane %v5151_v43, 2  ;;  %v5313_v25 = vsel %vm5286_vm0, %v5311_v42, %v5312_v47  ;;  %5457 = vst [vmem:[%s7950_s9 + $0xc0] sm:$0x3] %v5375_v48  ;;  %v5167_v11 = vmul.f32 %v5117_v56, %v4705_v46  ;;  %v5213_v33 = vrot.slane %v6266_v55, %v7874_v30 }
 0x394   : > { %v5320_v23 = vrot.slane %v5153_v14, 2  ;;  %v5408_v45 = vsel %vm5399_vm1, %v4974_v1, %v5313_v25  ;;  %v5319_v10 = vsel %vm5286_vm0, %v5317_v13, %v5318_v27  ;;  %5459 = vst [vmem:[%s7950_s9 + $0xd0] sm:$0x3] %v5377_v22  ;;  %v5169_v28 = vmul.f32 %v5125_v4, %v8271_v60 }
 0x395   : > { %v5425_v37 = vsel %vm5416_vm2, %v5408_v45, %v5375_v48  ;;  %v5410_v39 = vsel %vm5399_vm1, %v4976_v26, %v5319_v10  ;;  %v5247_v18 = vmul.f32 %v5213_v33, %v4705_v46  ;;  %v5315_v54 = vrot.slane %v5167_v11, 2 }
 0x396   : > { %5441 = vst [vmem:[%s7950_s9 + $0x40] sm:$0xff] %v5425_v37  ;;  %v5427_v12 = vsel %vm5416_vm2, %v5410_v39, %v5377_v22  ;;  %v5221_v6 = vrot.slane %v6268_v3, %v7874_v30  ;;  %v5321_v7 = vrot.slane %v5169_v28, 2  ;;  %v4977_v8 = vmax.f32 %v8268_v31, 0.0 }
 0x397   : > { %5443 = vst [vmem:[%s7950_s9 + $0x50] sm:$0xff] %v5427_v12  ;;  %v5316_v15 = vsel %vm5286_vm0, %v5314_v17, %v5315_v54  ;;  %v5376_v16 = vrot.slane %v5247_v18, 2 }
 0x398   : > { %v5409_v38 = vsel %vm5399_vm1, %v4975_v0, %v5316_v15  ;;  %v5249_v24 = vmul.f32 %v5221_v6, %v8271_v60  ;;  %v5322_v21 = vsel %vm5286_vm0, %v5320_v23, %v5321_v7 }
 0x399   : > { %v5426_v40 = vsel %vm5416_vm2, %v5409_v38, %v5376_v16  ;;  %5458 = vst [vmem:[%s7950_s9 + $0xc8] sm:$0x3] %v5376_v16  ;;  %v5411_v44 = vsel %vm5399_vm1, %v4977_v8, %v5322_v21 }
 0x39a   : > { %5442 = vst [vmem:[%s7950_s9 + $0x48] sm:$0xff] %v5426_v40  ;;  %v5378_v20 = vrot.slane %v5249_v24, 2 }
 0x39c   : > { %v5428_v46 = vsel %vm5416_vm2, %v5411_v44, %v5378_v20  ;;  %5460 = vst [vmem:[%s7950_s9 + $0xd8] sm:$0x3] %v5378_v20 }
 0x39d   : > { %5444 = vst [vmem:[%s7950_s9 + $0x58] sm:$0xff] %v5428_v46 }
 0x3f2   : > { %v4871_v31 = vpop.f32.mrb[12].mxu0 }
 0x3f3   : > { %v6148_v52 = vmul.f32 -1.442695, %v4871_v31  ;;  %v8309_v57 = vpop.f32.mrb[12].mxu1  ;;  %v8311_v49 = vpop.f32.mrb[13].mxu0  ;;  %v4978_v5 = vmax.f32 %v4871_v31, 0.0 }
 0x3f4   : > { %v6150_v60 = vmul.f32 -1.442695, %v8309_v57  ;;  %v6149_v58 = vmul.f32 -1.442695, %v8311_v49  ;;  %v8315_v59 = vpop.f32.mrb[13].mxu1  ;;  %v4875_v61 = vpop.f32.mrb[14].mxu0 }
 0x3f5   : > { %6269 = vpow2.f32 %v6148_v52  ;;  %v6151_v32 = vmul.f32 -1.442695, %v8315_v59  ;;  %v4961_v50 = vpop.f32.mrb[14].mxu1  ;;  %v4877_v19 = vpop.f32.mrb[15].mxu0  ;;  %v4980_v9 = vmax.f32 %v8309_v57, 0.0  ;;  %v4979_v42 = vmax.f32 %v8311_v49, 0.0 }
 0x3f6   : > { %6271 = vpow2.f32 %v6150_v60  ;;  %v4963_v53 = vpop.f32.mrb[15].mxu1  ;;  %v4981_v60 = vmax.f32 %v8315_v59, 0.0 }
 0x3f7   : > { %6273 = vpow2.f32 %v6149_v58 }
 0x3f8   : > { %6275 = vpow2.f32 %v6151_v32 }
 0x3ff   : > { %v6270_v62 = vpop.eup %6269 }
 0x400   : > { %v6272_v63 = vpop.eup %6271  ;;  %v5042_v55 = vadd.f32 1.0, %v6270_v62  ;;  %v5495_v62 = vld [vmem:[%s7950_s9 + $0x20] sm:$0xff] (%p6358_p5) }
 0x401   : > { %v6274_v1 = vpop.eup %6273  ;;  %v5044_v26 = vadd.f32 1.0, %v6272_v63  ;;  %v5497_v63 = vld [vmem:[%s7950_s9 + $0x28] sm:$0xff] (%p6358_p5)  ;;  %5496 = vst [vmem:[%s8362_s17 + $0x20] sm:$0xff] (%p6358_p5), %v5495_v62 }
 0x402   : > { %v6276_v2 = vpop.eup %6275  ;;  %6277 = vrcp.f32 %v5042_v55  ;;  %v5043_v36 = vadd.f32 1.0, %v6274_v1  ;;  %5498 = vst [vmem:[%s8362_s17 + $0x28] sm:$0xff] (%p6358_p5), %v5497_v63  ;;  %v5499_v55 = vld [vmem:[%s7950_s9 + $0x30] sm:$0xff] (%p6358_p5)  ;;  %v5501_v1 = vld [vmem:[%s7950_s9 + $0x38] sm:$0xff] (%p6358_p5) }
 0x403   : > { %6279 = vrcp.f32 %v5044_v26  ;;  %v5045_v3 = vadd.f32 1.0, %v6276_v2  ;;  %v5503_v26 = vld [vmem:[%s7950_s9 + $0x40] sm:$0xff] (%p6358_p5)  ;;  %5500 = vst [vmem:[%s8362_s17 + $0x30] sm:$0xff] (%p6358_p5), %v5499_v55  ;;  %5502 = vst [vmem:[%s8362_s17 + $0x38] sm:$0xff] (%p6358_p5), %v5501_v1  ;;  %v5505_v2 = vld [vmem:[%s7950_s9 + $0x48] sm:$0xff] (%p6358_p5) }
 0x404   : > { %6281 = vrcp.f32 %v5043_v36  ;;  %5504 = vst [vmem:[%s8362_s17 + $0x40] sm:$0xff] (%p6358_p5), %v5503_v26  ;;  %v5507_v36 = vld [vmem:[%s7950_s9 + $0x50] sm:$0xff] (%p6358_p5)  ;;  %5506 = vst [vmem:[%s8362_s17 + $0x48] sm:$0xff] (%p6358_p5), %v5505_v2 }
 0x405   : > { %6283 = vrcp.f32 %v5045_v3  ;;  %v5509_v3 = vld [vmem:[%s7950_s9 + $0x58] sm:$0xff] (%p6358_p5)  ;;  %5508 = vst [vmem:[%s8362_s17 + $0x50] sm:$0xff] (%p6358_p5), %v5507_v36 }
 0x406   : > { %5510 = vst [vmem:[%s8362_s17 + $0x58] sm:$0xff] (%p6358_p5), %v5509_v3 }
 0x40c   : > { %v6278_v34 = vpop.eup %6277 }
 0x40d   : > { %v6280_v56 = vpop.eup %6279  ;;  %v5129_v35 = vrot.slane %v6278_v34, %v7872_v29  ;;  %v5225_v51 = vrot.slane %v6278_v34, %v7874_v30 }
 0x40e   : > { %v6282_v4 = vpop.eup %6281  ;;  %v5137_v41 = vrot.slane %v6280_v56, %v7872_v29  ;;  %v5233_v43 = vrot.slane %v6280_v56, %v7874_v30 }
 0x40f   : > { %v5154_v47 = vmul.f32 %v5129_v35, %v4871_v31  ;;  %v5170_v48 = vmul.f32 %v5129_v35, %v4875_v61  ;;  %v5250_v13 = vmul.f32 %v5225_v51, %v4875_v61  ;;  %v5133_v14 = vrot.slane %v6282_v4, %v7872_v29  ;;  %v6284_v27 = vpop.eup %6283  ;;  %v5519_v51 = vld [vmem:[%s7950_s9 + $0x80] sm:$0xff] (%p6358_p5) }
 0x410   : > { %v5156_v22 = vmul.f32 %v5137_v41, %v8309_v57  ;;  %v5172_v17 = vmul.f32 %v5137_v41, %v4961_v50  ;;  %v5252_v25 = vmul.f32 %v5233_v43, %v4961_v50  ;;  %v5229_v11 = vrot.slane %v6282_v4, %v7874_v30  ;;  %v5489_v50 = vld [vmem:[%s7950_s9 + $0x8] sm:$0xff] (%p6358_p5)  ;;  %5520 = vst [vmem:[%s8362_s17 + $0x200] sm:$0xff] (%p6358_p5), %v5519_v51  ;;  %v5525_v41 = vld [vmem:[%s7950_s9 + $0x98] sm:$0xff] (%p6358_p5) }
 0x411   : > { %v5323_v33 = vrot.slane %v5154_v47, 2  ;;  %v5324_v23 = vrot.slane %v5170_v48, 2  ;;  %v5379_v45 = vrot.slane %v5250_v13, 2  ;;  %v5155_v10 = vmul.f32 %v5133_v14, %v8311_v49  ;;  %5490 = vst [vmem:[%s8362_s17 + $0x8] sm:$0xff] (%p6358_p5), %v5489_v50  ;;  %v5521_v4 = vld [vmem:[%s7950_s9 + $0x88] sm:$0xff] (%p6358_p5)  ;;  %5526 = vst [vmem:[%s8362_s17 + $0x218] sm:$0xff] (%p6358_p5), %v5525_v41 }
 0x412   : > { %v5329_v28 = vrot.slane %v5156_v22, 2  ;;  %v5330_v37 = vrot.slane %v5172_v17, 2  ;;  %v5381_v39 = vrot.slane %v5252_v25, 2  ;;  %v5171_v18 = vmul.f32 %v5133_v14, %v4877_v19  ;;  %5522 = vst [vmem:[%s8362_s17 + $0x208] sm:$0xff] (%p6358_p5), %v5521_v4  ;;  %v5529_v43 = vld [vmem:[%s7950_s9 + $0xa8] sm:$0xff] (%p6358_p5)  ;;  %v5531_v47 = vld [vmem:[%s7950_s9 + $0xb0] sm:$0xff] (%p6358_p5) }
 0x413   : > { %v5325_v54 = vsel %vm5286_vm0, %v5323_v33, %v5324_v23  ;;  %5461 = vst [vmem:[%s7950_s9 + $0xe0] sm:$0x3] %v5379_v45  ;;  %v5251_v0 = vmul.f32 %v5229_v11, %v4877_v19  ;;  %v5326_v12 = vrot.slane %v5155_v10, 2  ;;  %v5141_v6 = vrot.slane %v6284_v27, %v7872_v29  ;;  %v5491_v19 = vld [vmem:[%s7950_s9 + $0x10] sm:$0xff] (%p6358_p5)  ;;  %v5533_v48 = vld [vmem:[%s7950_s9 + $0xb8] sm:$0xff] (%p6358_p5)  ;;  %5530 = vst [vmem:[%s8362_s17 + $0x228] sm:$0xff] (%p6358_p5), %v5529_v43 }
 0x414   : > { %v5412_v7 = vsel %vm5399_vm1, %v4978_v5, %v5325_v54  ;;  %v5331_v8 = vsel %vm5286_vm0, %v5329_v28, %v5330_v37  ;;  %5463 = vst [vmem:[%s7950_s9 + $0xf0] sm:$0x3] %v5381_v39  ;;  %v5327_v15 = vrot.slane %v5171_v18, 2  ;;  %v5237_v16 = vrot.slane %v6284_v27, %v7874_v30  ;;  %5492 = vst [vmem:[%s8362_s17 + $0x10] sm:$0xff] (%p6358_p5), %v5491_v19  ;;  %v5535_v13 = vld [vmem:[%s7950_s9 + $0xc0] sm:$0xff] (%p6358_p5)  ;;  %v5537_v14 = vld [vmem:[%s7950_s9 + $0xc8] sm:$0xff] (%p6358_p5) }
 0x415   : > { %v5429_v38 = vsel %vm5416_vm2, %v5412_v7, %v5379_v45  ;;  %v5414_v24 = vsel %vm5399_vm1, %v4980_v9, %v5331_v8  ;;  %v5380_v21 = vrot.slane %v5251_v0, 2  ;;  %v5157_v40 = vmul.f32 %v5141_v6, %v8315_v59  ;;  %v5487_v59 = vld [vmem:[%s7950_s9] sm:$0xff] (%p6358_p5)  ;;  %v5523_v9 = vld [vmem:[%s7950_s9 + $0x90] sm:$0xff] (%p6358_p5)  ;;  %5532 = vst [vmem:[%s8362_s17 + $0x230] sm:$0xff] (%p6358_p5), %v5531_v47  ;;  %5534 = vst [vmem:[%s8362_s17 + $0x238] sm:$0xff] (%p6358_p5), %v5533_v48 }
 0x416   : > { %5445 = vst [vmem:[%s7950_s9 + $0x60] sm:$0xff] %v5429_v38  ;;  %v5431_v29 = vsel %vm5416_vm2, %v5414_v24, %v5381_v39  ;;  %v5328_v44 = vsel %vm5286_vm0, %v5326_v12, %v5327_v15  ;;  %v5173_v20 = vmul.f32 %v5141_v6, %v4963_v53  ;;  %v5253_v46 = vmul.f32 %v5237_v16, %v4963_v53  ;;  %v5493_v53 = vld [vmem:[%s7950_s9 + $0x18] sm:$0xff] (%p6358_p5)  ;;  %v5539_v27 = vld [vmem:[%s7950_s9 + $0xd0] sm:$0xff] (%p6358_p5) }
 0x417   : > { %5447 = vst [vmem:[%s7950_s9 + $0x70] sm:$0xff] %v5431_v29  ;;  %v5413_v30 = vsel %vm5399_vm1, %v4979_v42, %v5328_v44  ;;  %5462 = vst [vmem:[%s7950_s9 + $0xe8] sm:$0x3] %v5380_v21  ;;  %v5332_v31 = vrot.slane %v5157_v40, 2  ;;  %5471 = sbr.rel (!%p6358_p5) target bundleno = 1062 (0x426), region = 55  ;;  %v5527_v42 = vld [vmem:[%s7950_s9 + $0xa0] sm:$0xff] (%p6358_p5) }
 0x418   : > { %v5430_v52 = vsel %vm5416_vm2, %v5413_v30, %v5380_v21  ;;  %v5333_v57 = vrot.slane %v5173_v20, 2  ;;  %v5382_v49 = vrot.slane %v5253_v46, 2  ;;  %5488 = vst [vmem:[%s8362_s17] sm:$0xff] (%p6358_p5), %v5487_v59  ;;  %5494 = vst [vmem:[%s8362_s17 + $0x18] sm:$0xff] (%p6358_p5), %v5493_v53  ;;  %v5541_v22 = vld [vmem:[%s7950_s9 + $0xd8] sm:$0xff] (%p6358_p5) }
 0x419   : > { %5446 = vst [vmem:[%s7950_s9 + $0x68] sm:$0xff] %v5430_v52  ;;  %5524 = vst [vmem:[%s8362_s17 + $0x210] sm:$0xff] (%p6358_p5), %v5523_v9 }
 0x41a   : > { %v5334_v58 = vsel %vm5286_vm0, %v5332_v31, %v5333_v57  ;;  %5464 = vst [vmem:[%s7950_s9 + $0xf8] sm:$0x3] %v5382_v49  ;;  %5528 = vst [vmem:[%s8362_s17 + $0x220] sm:$0xff] (%p6358_p5), %v5527_v42  ;;  %v5543_v17 = vld [vmem:[%s7950_s9 + $0xe0] sm:$0xff] (%p6358_p5) }
 0x41b   : > { %v5415_v61 = vsel %vm5399_vm1, %v4981_v60, %v5334_v58  ;;  %5536 = vst [vmem:[%s8362_s17 + $0x240] sm:$0xff] (%p6358_p5), %v5535_v13  ;;  %5538 = vst [vmem:[%s8362_s17 + $0x248] sm:$0xff] (%p6358_p5), %v5537_v14  ;;  %v5547_v11 = vld [vmem:[%s7950_s9 + $0xf0] sm:$0xff] (%p6358_p5) }
 0x41c   : > { %v5432_v32 = vsel %vm5416_vm2, %v5415_v61, %v5382_v49  ;;  %5540 = vst [vmem:[%s8362_s17 + $0x250] sm:$0xff] (%p6358_p5), %v5539_v27  ;;  %5542 = vst [vmem:[%s8362_s17 + $0x258] sm:$0xff] (%p6358_p5), %v5541_v22 }
 0x41d   : > { %5448 = vst [vmem:[%s7950_s9 + $0x78] sm:$0xff] %v5432_v32  ;;  %v5511_v34 = vld [vmem:[%s7950_s9 + $0x60] sm:$0xff] (%p6358_p5)  ;;  %5544 = vst [vmem:[%s8362_s17 + $0x260] sm:$0xff] (%p6358_p5), %v5543_v17 }
 0x41e   : > { %v5515_v5 = vld [vmem:[%s7950_s9 + $0x70] sm:$0xff]  ;;  %5512 = vst [vmem:[%s8362_s17 + $0x60] sm:$0xff] %v5511_v34  ;;  %v5545_v25 = vld [vmem:[%s7950_s9 + $0xe8] sm:$0xff]  ;;  %5548 = vst [vmem:[%s8362_s17 + $0x270] sm:$0xff] %v5547_v11 }
 0x41f   : > { %5516 = vst [vmem:[%s8362_s17 + $0x70] sm:$0xff] %v5515_v5  ;;  %5546 = vst [vmem:[%s8362_s17 + $0x268] sm:$0xff] %v5545_v25 }
 0x420   : > { %v5513_v56 = vld [vmem:[%s7950_s9 + $0x68] sm:$0xff] }
 0x421   : > { %5514 = vst [vmem:[%s8362_s17 + $0x68] sm:$0xff] %v5513_v56  ;;  %v5549_v33 = vld [vmem:[%s7950_s9 + $0xf8] sm:$0xff] }
 0x422   : > { %5550 = vst [vmem:[%s8362_s17 + $0x278] sm:$0xff] %v5549_v33 }
 0x424   : > { %v5517_v35 = vld [vmem:[%s7950_s9 + $0x78] sm:$0xff] }
 0x425   : > { %5518 = vst [vmem:[%s8362_s17 + $0x78] sm:$0xff] %v5517_v35 }
 0x426 PF: > { %p9_p10 = scmp.ge.s32.totalorder %s6345_s13, 6   ;;  %s8439_s9 = smov %s6307_s10 }
 0x427   : > { %s8440_s10 = smov %s6356_s16  ;;  %s8441_s11 = smov %s6345_s13 }
 0x428   :  { %11 = sbr.rel (!%p9_p10) target bundleno = 2 (0x2), region = 109 }

</bundles_post_ra>
